<compile_context>
chip_gen: v6e
topology: v6e:2x2x1
jax: 0.10.0
libtpu: 0.0.40
codegen_flags: <defaults>
</compile_context>

<pallas_src>
import math
import functools

import jax
import jax.numpy as jnp
from jax.experimental import pallas as pl
from jax.experimental.pallas import tpu as pltpu


def _ru(x, m):
    return (x + m - 1) // m * m


def _block_bytes(shape, dtype):
    """Approximate VMEM footprint of one (sublane,128)-tiled block."""
    itemsize = jnp.dtype(dtype).itemsize
    sub = 8 * max(1, 4 // itemsize)          # 8 for f32, 16 for bf16
    lead = 1
    for d in shape[:-2]:
        lead *= d
    return lead * _ru(shape[-2], sub) * _ru(shape[-1], 128) * itemsize


def _vmem_capacity_bytes():
    """Generation-aware physical VMEM size (conservative fallback if query fails)."""
    try:
        return int(pltpu.get_tpu_info().vmem_capacity_bytes)
    except Exception:
        return 64 << 20                       # v7x-sized conservative fallback


def _vmem_need(th, halo, wq, ow_p, s, k, cin, ocp, pack, in_dtype, out_dtype):
    """Double-buffered blocks + scratch for one grid step."""
    m = th * ow_p
    rows_p = s * s * (th + halo)
    xb = _block_bytes((1, 1, rows_p, wq, cin), in_dtype)
    ob = _block_bytes((1, 1, m, ocp), out_dtype)
    if pack:
        wb = _block_bytes((k * k * cin, ocp), in_dtype)
        sb = _block_bytes((m, k * k * cin), in_dtype)
    else:
        wb = _block_bytes((k * k, cin, ocp), in_dtype)
        sb = _block_bytes((m, ocp), jnp.float32)
    bb = _block_bytes((1, ocp), jnp.float32)
    return 2 * (xb + ob + wb + bb) + sb


# ----------------------------- Pallas kernels ------------------------------ #
def _conv_kernel_packed(x_ref, w_ref, b_ref, o_ref, lhs_ref, *,
                        k, s, th, halo, ow_p, cin, ocp):
    # x_ref  : (1, 1, s*s*(th+halo), wq, cin)  halo row tile (compute dtype)
    # w_ref  : (k*k*cin, ocp)                  scaled weight, constant block
    # b_ref  : (1, ocp) f32                    bias row, constant block
    # o_ref  : (1, 1, th*ow_p, ocp)            flat, lane-dense output tile
    # lhs_ref: (th*ow_p, k*k*cin)              packed-K LHS scratch
    rows = th + halo
    m = th * ow_p
    for kh in range(k):
        for kw in range(k):
            ph = (kh % s) * s + (kw % s)      # polyphase index (static)
            r0 = ph * rows + kh // s          # static row offset within block
            c0 = kw // s                      # static col offset within block
            t = kh * k + kw
            xt = x_ref[0, 0, r0:r0 + th, c0:c0 + ow_p, :]
            # cin % 128 == 0 -> aligned, unmasked lane-slice store (VMEM-local).
            lhs_ref[:, t * cin:(t + 1) * cin] = xt.reshape(m, cin)
    out = jnp.dot(lhs_ref[...], w_ref[...], preferred_element_type=jnp.float32)
    o_ref[...] = (out + b_ref[...]).reshape(1, 1, m, ocp).astype(o_ref.dtype)


def _conv_kernel_loop(x_ref, w_ref, b_ref, o_ref, acc_ref, *,
                      k, s, th, halo, ow_p, cin, ocp):
    # Small / lane-unaligned cin path.  Per-tap matmuls, but partial sums are
    # grouped per kh so the f32 accumulator is read-modified-written k times,
    # not k*k (store-slot relief on v5e; direct `acc += dot-sum` keeps v7x MRB
    # accumulation possible).
    # x_ref  : (1, 1, s*s*(th+halo), wq, cin)
    # w_ref  : (k*k, cin, ocp)
    # b_ref  : (1, ocp) f32
    # o_ref  : (1, 1, th*ow_p, ocp)
    # acc_ref: (th*ow_p, ocp) f32
    rows = th + halo
    m = th * ow_p
    for kh in range(k):
        part = None
        for kw in range(k):
            ph = (kh % s) * s + (kw % s)
            r0 = ph * rows + kh // s
            c0 = kw // s
            xt = x_ref[0, 0, r0:r0 + th, c0:c0 + ow_p, :].reshape(m, cin)
            d = jnp.dot(xt, w_ref[kh * k + kw],
                        preferred_element_type=jnp.float32)
            part = d if part is None else part + d
        if kh == 0:
            acc_ref[...] = part
        else:
            acc_ref[...] += part
    o_ref[...] = (acc_ref[...] + b_ref[...]).reshape(1, 1, m, ocp).astype(
        o_ref.dtype)


def _equal_conv2d_pallas(x_tiled, w_packed, bias_row, *, k, s, th, halo,
                         ow_p, cin, ocp, pack, out_dtype, vmem_limit,
                         flops, bytes_accessed):
    nb, n_tiles, rows_p, wq, _ = x_tiled.shape
    m = th * ow_p

    if pack:
        kernel = functools.partial(_conv_kernel_packed, k=k, s=s, th=th,
                                   halo=halo, ow_p=ow_p, cin=cin, ocp=ocp)
        scratch = [pltpu.VMEM((m, k * k * cin), x_tiled.dtype)]
        w_spec = pl.BlockSpec(tuple(w_packed.shape), lambda b, i: (0, 0))
    else:
        kernel = functools.partial(_conv_kernel_loop, k=k, s=s, th=th,
                                   halo=halo, ow_p=ow_p, cin=cin, ocp=ocp)
        scratch = [pltpu.VMEM((m, ocp), jnp.float32)]
        w_spec = pl.BlockSpec(tuple(w_packed.shape), lambda b, i: (0, 0, 0))

    return pl.pallas_call(
        kernel,
        out_shape=jax.ShapeDtypeStruct((nb, n_tiles, m, ocp), out_dtype),
        grid_spec=pltpu.PrefetchScalarGridSpec(
            num_scalar_prefetch=0,
            grid=(nb, n_tiles),
            in_specs=[
                # Halo row tile for (batch b, tile i); block index varies with
                # both grid axes, so the standard pipeline double-buffers it.
                pl.BlockSpec((1, 1, rows_p, wq, cin),
                             lambda b, i: (b, i, 0, 0, 0)),
                # Constant blocks: fetched once, resident for the whole grid.
                w_spec,
                pl.BlockSpec((1, ocp), lambda b, i: (0, 0)),
            ],
            out_specs=pl.BlockSpec((1, 1, m, ocp), lambda b, i: (b, i, 0, 0)),
            scratch_shapes=scratch,
        ),
        compiler_params=pltpu.CompilerParams(
            # Every step writes a disjoint output block and re-inits its
            # accumulator -> both axes are independent (v7x 2-TC sharding).
            dimension_semantics=("parallel", "parallel"),
            vmem_limit_bytes=vmem_limit),
        cost_estimate=pl.CostEstimate(flops=flops, transcendentals=0,
                                      bytes_accessed=bytes_accessed),
    )(x_tiled, w_packed, bias_row)


# -------------------------------- Module port ------------------------------ #
class EqualConv2d:
    """JAX/Pallas port of the PyTorch EqualConv2d forward pass."""

    def __init__(self, in_channel, out_channel, kernel_size, stride=1,
                 padding=0, bias=True, *, key=None, dtype=jnp.float32,
                 compute_dtype=jnp.bfloat16):
        if key is None:
            key = jax.random.PRNGKey(0)
        self.in_channel = in_channel
        self.out_channel = out_channel
        self.kernel_size = kernel_size
        self.stride = stride
        self.padding = padding
        self.compute_dtype = compute_dtype

        self.weight = jax.random.normal(
            key, (out_channel, in_channel, kernel_size, kernel_size), dtype)
        self.scale = 1.0 / math.sqrt(in_channel * kernel_size ** 2)
        self.bias = jnp.zeros((out_channel,), dtype) if bias else None

        self.ocp = _ru(out_channel, 128)
        # Pack all k*k taps into the MXU contraction dim only when cin is
        # lane-aligned (aligned lane-slice stores, no relayouts); otherwise
        # keep the per-tap loop.
        self.pack_taps = (in_channel % 128 == 0)

        k = kernel_size
        w = (self.weight.astype(jnp.float32) * self.scale).astype(compute_dtype)
        w = jnp.transpose(w, (2, 3, 1, 0))                    # (KH, KW, C, OC)
        w = jnp.pad(w, ((0, 0), (0, 0), (0, 0), (0, self.ocp - out_channel)))
        if self.pack_taps:
            self.w_packed = w.reshape(k * k * in_channel, self.ocp)
        else:
            self.w_packed = w.reshape(k * k, in_channel, self.ocp)
        b = self.bias if self.bias is not None else jnp.zeros((out_channel,),
                                                              dtype)
        self.b_packed = jnp.pad(b.astype(jnp.float32),
                                (0, self.ocp - out_channel)).reshape(1, self.ocp)

    # ---------------- NHWC fast path (use when chaining layers) ------------ #
    def call_nhwc(self, x_nhwc):
        nb, h, w, c = x_nhwc.shape
        assert c == self.in_channel
        s, k, p = self.stride, self.kernel_size, self.padding
        oh = (h + 2 * p - k) // s + 1
        ow = (w + 2 * p - k) // s + 1
        assert oh > 0 and ow > 0
        halo = (k - 1) // s
        out_dtype = x_nhwc.dtype

        # Sublane-aligned output width -> layout-free in-kernel row merges and
        # unmasked output stores (garbage columns are stripped below).
        ow_p = _ru(ow, 16)
        wq = ow_p + halo

        # Row tile: ~2048 output pixels, TH a multiple of 8, shrunk until the
        # double-buffered blocks + scratch fit ~50% of physical VMEM.
        vmem_cap = _vmem_capacity_bytes()
        budget = vmem_cap // 2
        if oh >= 8:
            th = min(_ru(oh, 8), max(8, _ru(max(1, 2048 // ow_p), 8)))
        else:
            th = oh
        while True:
            need = _vmem_need(th, halo, wq, ow_p, s, k, c, self.ocp,
                              self.pack_taps, self.compute_dtype, out_dtype)
            if need <= budget or th <= 8:
                break
            th -= 8
        ohp = _ru(oh, th)
        n_tiles = ohp // th
        hq = ohp + halo

        vmem_limit = min(max(int(need * 1.5) + (4 << 20), 16 << 20),
                         int(vmem_cap * 0.85))
        vmem_limit = max(vmem_limit, min(need + (2 << 20), vmem_cap))

        # Single staging pass: cast, pad, polyphase split (identity when s==1)
        # and halo row tiling.  Halo duplication costs (th+halo)/th extra HBM
        # on the staged input only.
        xh = x_nhwc.astype(self.compute_dtype)
        pad_b = max(0, s * hq - h - p)
        pad_r = max(0, s * wq - w - p)
        xp = jnp.pad(xh, ((0, 0), (p, pad_b), (p, pad_r), (0, 0)))
        xp = xp[:, :s * hq, :s * wq, :]
        xp = xp.reshape(nb, hq, s, wq, s, c)
        xph = jnp.transpose(xp, (0, 2, 4, 1, 3, 5)).reshape(
            nb, s * s, hq, wq, c)
        if n_tiles == 1:
            x_tiled = xph.reshape(nb, 1, s * s * (th + halo), wq, c)
        else:
            ridx = (jnp.arange(n_tiles, dtype=jnp.int32)[:, None] * th +
                    jnp.arange(th + halo, dtype=jnp.int32)[None, :]).reshape(-1)
            xt = jnp.take(xph, ridx, axis=2)
            xt = xt.reshape(nb, s * s, n_tiles, th + halo, wq, c)
            x_tiled = jnp.transpose(xt, (0, 2, 1, 3, 4, 5)).reshape(
                nb, n_tiles, s * s * (th + halo), wq, c)

        flops = int(2 * nb * n_tiles * (th * ow_p) * (k * k * c) * self.ocp)
        bytes_accessed = int(
            int(x_tiled.size) * jnp.dtype(x_tiled.dtype).itemsize
            + int(self.w_packed.size) * jnp.dtype(self.w_packed.dtype).itemsize
            + int(self.b_packed.size) * 4
            + nb * n_tiles * th * ow_p * self.ocp
            * jnp.dtype(out_dtype).itemsize)

        out = _equal_conv2d_pallas(
            x_tiled, self.w_packed, self.b_packed, k=k, s=s, th=th, halo=halo,
            ow_p=ow_p, cin=c, ocp=self.ocp, pack=self.pack_taps,
            out_dtype=out_dtype, vmem_limit=vmem_limit, flops=flops,
            bytes_accessed=bytes_accessed)

        out = out.reshape(nb, ohp, ow_p, self.ocp)      # contiguous merge
        return out[:, :oh, :ow, :self.out_channel]      # strip row/col/OC pad

    # ---------------- PyTorch-compatible NCHW interface -------------------- #
    def __call__(self, x_nchw):
        x_nhwc = jnp.transpose(x_nchw, (0, 2, 3, 1))
        out = self.call_nhwc(x_nhwc)
        return jnp.transpose(out, (0, 3, 1, 2))


# ----------------------------------- main ----------------------------------- #
def _reference_conv(x, weight, scale, bias, stride, padding, compute_dtype):
    """XLA reference with the same operand rounding as the Pallas path."""
    xw = x.astype(compute_dtype).astype(jnp.float32)
    ww = (weight.astype(jnp.float32) * scale).astype(compute_dtype)
    ww = ww.astype(jnp.float32)
    out = jax.lax.conv_general_dilated(
        xw, ww, window_strides=(stride, stride),
        padding=((padding, padding), (padding, padding)),
        dimension_numbers=("NCHW", "OIHW", "NCHW"),
        precision=jax.lax.Precision.HIGHEST)
    if bias is not None:
        out = out + bias.astype(jnp.float32).reshape(1, -1, 1, 1)
    return out.astype(x.dtype)


if __name__ == "__main__":
    key = jax.random.PRNGKey(0)
    kx, kw1, kw2, kx3, kw3 = jax.random.split(key, 5)

    x = jax.random.normal(kx, (2, 4, 16, 16), dtype=jnp.float32)

    # Test 1: stride=1, padding=1, tiny channels (per-tap loop path).
    conv = EqualConv2d(in_channel=4, out_channel=8, kernel_size=3,
                       stride=1, padding=1, bias=True, key=kw1)
    out = jax.block_until_ready(conv(x))
    assert out.shape == (2, 8, 16, 16)
    ref = _reference_conv(x, conv.weight, conv.scale, conv.bias,
                          1, 1, conv.compute_dtype)
    assert jnp.allclose(out, ref, atol=1e-2, rtol=1e-2), \
        float(jnp.max(jnp.abs(out - ref)))

    # Test 2: stride=2 downsampling conv (exercises the polyphase path).
    conv2 = EqualConv2d(in_channel=4, out_channel=8, kernel_size=3,
                        stride=2, padding=1, bias=True, key=kw2)
    out2 = jax.block_until_ready(conv2(x))
    assert out2.shape == (2, 8, 8, 8)
    ref2 = _reference_conv(x, conv2.weight, conv2.scale, conv2.bias,
                           2, 1, conv2.compute_dtype)
    assert jnp.allclose(out2, ref2, atol=1e-2, rtol=1e-2), \
        float(jnp.max(jnp.abs(out2 - ref2)))

    # Test 3: lane-aligned channels (packed-K single-matmul path) with
    # multiple halo row tiles and OC padding.
    x3 = jax.random.normal(kx3, (1, 128, 40, 64), dtype=jnp.float32)
    conv3 = EqualConv2d(in_channel=128, out_channel=64, kernel_size=3,
                        stride=1, padding=1, bias=True, key=kw3)
    out3 = jax.block_until_ready(conv3(x3))
    assert out3.shape == (1, 64, 40, 64)
    ref3 = _reference_conv(x3, conv3.weight, conv3.scale, conv3.bias,
                           1, 1, conv3.compute_dtype)
    assert jnp.allclose(out3, ref3, atol=1e-2, rtol=1e-2), \
        float(jnp.max(jnp.abs(out3 - ref3)))

    print("KERNEL_OK")
</pallas_src>

<mosaic_0001>
module attributes {stable_mosaic.version = 11 : i64} {
  func.func @_conv_kernel_loop(%arg0: i32, %arg1: i32, %arg2: memref<1x1x18x18x4xbf16, #tpu.memory_space<vmem>>, %arg3: memref<9x4x128xbf16, #tpu.memory_space<vmem>>, %arg4: memref<1x128xf32, #tpu.memory_space<vmem>>, %arg5: memref<1x1x256x128xf32, #tpu.memory_space<vmem>>, %arg6: memref<256x128xf32, #tpu.memory_space<vmem>>) attributes {dimension_semantics = [#tpu.dimension_semantics<parallel>, #tpu.dimension_semantics<parallel>], iteration_bounds = array<i64: 2, 1>, scalar_prefetch = 0 : i64, scratch_operands = 1 : i64, tpu.core_type = #tpu.core_type<tc>, window_params = [{transform_indices = @transform_0, window_bounds = array<i64: 1, 1, 18, 18, 4>}, {pipeline_mode = #tpu.pipeline_mode<synchronous>, transform_indices = @transform_1, window_bounds = array<i64: 9, 4, 128>}, {pipeline_mode = #tpu.pipeline_mode<synchronous>, transform_indices = @transform_2, window_bounds = array<i64: 1, 128>}, {transform_indices = @transform_3, window_bounds = array<i64: 1, 1, 256, 128>}]} {
    %c0 = arith.constant 0 : index
    %c0_0 = arith.constant 0 : index
    %c0_1 = arith.constant 0 : index
    %c0_2 = arith.constant 0 : index
    %c0_3 = arith.constant 0 : index
    %0 = vector.load %arg2[%c0, %c0_0, %c0_1, %c0_2, %c0_3] : memref<1x1x18x18x4xbf16, #tpu.memory_space<vmem>>, vector<1x1x16x16x4xbf16>
    %1 = vector.shape_cast %0 : vector<1x1x16x16x4xbf16> to vector<16x16x4xbf16>
    %2 = vector.shape_cast %1 : vector<16x16x4xbf16> to vector<256x4xbf16>
    %c0_4 = arith.constant 0 : index
    %c0_5 = arith.constant 0 : index
    %c0_6 = arith.constant 0 : index
    %3 = vector.load %arg3[%c0_4, %c0_5, %c0_6] : memref<9x4x128xbf16, #tpu.memory_space<vmem>>, vector<1x4x128xbf16>
    %4 = vector.shape_cast %3 : vector<1x4x128xbf16> to vector<4x128xbf16>
    %cst = arith.constant dense<0.000000e+00> : vector<256x128xf32>
    %5 = tpu.matmul %2, %4, %cst {dimension_numbers = #tpu.dot_dimension_numbers<[1], [0], [0], [1], [0, 0, 1, 1], [], []>} : vector<256x4xbf16>, vector<4x128xbf16>, vector<256x128xf32> -> vector<256x128xf32>
    %c0_7 = arith.constant 0 : index
    %c0_8 = arith.constant 0 : index
    %c0_9 = arith.constant 0 : index
    %c1 = arith.constant 1 : index
    %c0_10 = arith.constant 0 : index
    %6 = vector.load %arg2[%c0_7, %c0_8, %c0_9, %c1, %c0_10] : memref<1x1x18x18x4xbf16, #tpu.memory_space<vmem>>, vector<1x1x16x16x4xbf16>
    %7 = vector.shape_cast %6 : vector<1x1x16x16x4xbf16> to vector<16x16x4xbf16>
    %8 = vector.shape_cast %7 : vector<16x16x4xbf16> to vector<256x4xbf16>
    %c1_11 = arith.constant 1 : index
    %c0_12 = arith.constant 0 : index
    %c0_13 = arith.constant 0 : index
    %9 = vector.load %arg3[%c1_11, %c0_12, %c0_13] : memref<9x4x128xbf16, #tpu.memory_space<vmem>>, vector<1x4x128xbf16>
    %10 = vector.shape_cast %9 : vector<1x4x128xbf16> to vector<4x128xbf16>
    %cst_14 = arith.constant dense<0.000000e+00> : vector<256x128xf32>
    %11 = tpu.matmul %8, %10, %cst_14 {dimension_numbers = #tpu.dot_dimension_numbers<[1], [0], [0], [1], [0, 0, 1, 1], [], []>} : vector<256x4xbf16>, vector<4x128xbf16>, vector<256x128xf32> -> vector<256x128xf32>
    %12 = arith.addf %5, %11 : vector<256x128xf32>
    %c0_15 = arith.constant 0 : index
    %c0_16 = arith.constant 0 : index
    %c0_17 = arith.constant 0 : index
    %c2 = arith.constant 2 : index
    %c0_18 = arith.constant 0 : index
    %13 = vector.load %arg2[%c0_15, %c0_16, %c0_17, %c2, %c0_18] : memref<1x1x18x18x4xbf16, #tpu.memory_space<vmem>>, vector<1x1x16x16x4xbf16>
    %14 = vector.shape_cast %13 : vector<1x1x16x16x4xbf16> to vector<16x16x4xbf16>
    %15 = vector.shape_cast %14 : vector<16x16x4xbf16> to vector<256x4xbf16>
    %c2_19 = arith.constant 2 : index
    %c0_20 = arith.constant 0 : index
    %c0_21 = arith.constant 0 : index
    %16 = vector.load %arg3[%c2_19, %c0_20, %c0_21] : memref<9x4x128xbf16, #tpu.memory_space<vmem>>, vector<1x4x128xbf16>
    %17 = vector.shape_cast %16 : vector<1x4x128xbf16> to vector<4x128xbf16>
    %cst_22 = arith.constant dense<0.000000e+00> : vector<256x128xf32>
    %18 = tpu.matmul %15, %17, %cst_22 {dimension_numbers = #tpu.dot_dimension_numbers<[1], [0], [0], [1], [0, 0, 1, 1], [], []>} : vector<256x4xbf16>, vector<4x128xbf16>, vector<256x128xf32> -> vector<256x128xf32>
    %19 = arith.addf %12, %18 : vector<256x128xf32>
    %c0_23 = arith.constant 0 : index
    %c0_24 = arith.constant 0 : index
    %20 = vector.load %arg6[%c0_23, %c0_24] : memref<256x128xf32, #tpu.memory_space<vmem>>, vector<256x128xf32>
    tpu.vector_store %arg6[%c0_23, %c0_24], %19 {strides = array<i32>} : memref<256x128xf32, #tpu.memory_space<vmem>>, vector<256x128xf32>,
    %c0_25 = arith.constant 0 : index
    %c0_26 = arith.constant 0 : index
    %c1_27 = arith.constant 1 : index
    %c0_28 = arith.constant 0 : index
    %c0_29 = arith.constant 0 : index
    %21 = vector.load %arg2[%c0_25, %c0_26, %c1_27, %c0_28, %c0_29] : memref<1x1x18x18x4xbf16, #tpu.memory_space<vmem>>, vector<1x1x16x16x4xbf16>
    %22 = vector.shape_cast %21 : vector<1x1x16x16x4xbf16> to vector<16x16x4xbf16>
    %23 = vector.shape_cast %22 : vector<16x16x4xbf16> to vector<256x4xbf16>
    %c3 = arith.constant 3 : index
    %c0_30 = arith.constant 0 : index
    %c0_31 = arith.constant 0 : index
    %24 = vector.load %arg3[%c3, %c0_30, %c0_31] : memref<9x4x128xbf16, #tpu.memory_space<vmem>>, vector<1x4x128xbf16>
    %25 = vector.shape_cast %24 : vector<1x4x128xbf16> to vector<4x128xbf16>
    %cst_32 = arith.constant dense<0.000000e+00> : vector<256x128xf32>
    %26 = tpu.matmul %23, %25, %cst_32 {dimension_numbers = #tpu.dot_dimension_numbers<[1], [0], [0], [1], [0, 0, 1, 1], [], []>} : vector<256x4xbf16>, vector<4x128xbf16>, vector<256x128xf32> -> vector<256x128xf32>
    %c0_33 = arith.constant 0 : index
    %c0_34 = arith.constant 0 : index
    %c1_35 = arith.constant 1 : index
    %c1_36 = arith.constant 1 : index
    %c0_37 = arith.constant 0 : index
    %27 = vector.load %arg2[%c0_33, %c0_34, %c1_35, %c1_36, %c0_37] : memref<1x1x18x18x4xbf16, #tpu.memory_space<vmem>>, vector<1x1x16x16x4xbf16>
    %28 = vector.shape_cast %27 : vector<1x1x16x16x4xbf16> to vector<16x16x4xbf16>
    %29 = vector.shape_cast %28 : vector<16x16x4xbf16> to vector<256x4xbf16>
    %c4 = arith.constant 4 : index
    %c0_38 = arith.constant 0 : index
    %c0_39 = arith.constant 0 : index
    %30 = vector.load %arg3[%c4, %c0_38, %c0_39] : memref<9x4x128xbf16, #tpu.memory_space<vmem>>, vector<1x4x128xbf16>
    %31 = vector.shape_cast %30 : vector<1x4x128xbf16> to vector<4x128xbf16>
    %cst_40 = arith.constant dense<0.000000e+00> : vector<256x128xf32>
    %32 = tpu.matmul %29, %31, %cst_40 {dimension_numbers = #tpu.dot_dimension_numbers<[1], [0], [0], [1], [0, 0, 1, 1], [], []>} : vector<256x4xbf16>, vector<4x128xbf16>, vector<256x128xf32> -> vector<256x128xf32>
    %33 = arith.addf %26, %32 : vector<256x128xf32>
    %c0_41 = arith.constant 0 : index
    %c0_42 = arith.constant 0 : index
    %c1_43 = arith.constant 1 : index
    %c2_44 = arith.constant 2 : index
    %c0_45 = arith.constant 0 : index
    %34 = vector.load %arg2[%c0_41, %c0_42, %c1_43, %c2_44, %c0_45] : memref<1x1x18x18x4xbf16, #tpu.memory_space<vmem>>, vector<1x1x16x16x4xbf16>
    %35 = vector.shape_cast %34 : vector<1x1x16x16x4xbf16> to vector<16x16x4xbf16>
    %36 = vector.shape_cast %35 : vector<16x16x4xbf16> to vector<256x4xbf16>
    %c5 = arith.constant 5 : index
    %c0_46 = arith.constant 0 : index
    %c0_47 = arith.constant 0 : index
    %37 = vector.load %arg3[%c5, %c0_46, %c0_47] : memref<9x4x128xbf16, #tpu.memory_space<vmem>>, vector<1x4x128xbf16>
    %38 = vector.shape_cast %37 : vector<1x4x128xbf16> to vector<4x128xbf16>
    %cst_48 = arith.constant dense<0.000000e+00> : vector<256x128xf32>
    %39 = tpu.matmul %36, %38, %cst_48 {dimension_numbers = #tpu.dot_dimension_numbers<[1], [0], [0], [1], [0, 0, 1, 1], [], []>} : vector<256x4xbf16>, vector<4x128xbf16>, vector<256x128xf32> -> vector<256x128xf32>
    %40 = arith.addf %33, %39 : vector<256x128xf32>
    %c0_49 = arith.constant 0 : index
    %c0_50 = arith.constant 0 : index
    %41 = vector.load %arg6[%c0_49, %c0_50] : memref<256x128xf32, #tpu.memory_space<vmem>>, vector<256x128xf32>
    %42 = arith.addf %41, %40 : vector<256x128xf32>
    %c0_51 = arith.constant 0 : index
    %c0_52 = arith.constant 0 : index
    %43 = vector.load %arg6[%c0_51, %c0_52] : memref<256x128xf32, #tpu.memory_space<vmem>>, vector<256x128xf32>
    tpu.vector_store %arg6[%c0_51, %c0_52], %42 {strides = array<i32>} : memref<256x128xf32, #tpu.memory_space<vmem>>, vector<256x128xf32>,
    %c0_53 = arith.constant 0 : index
    %c0_54 = arith.constant 0 : index
    %c2_55 = arith.constant 2 : index
    %c0_56 = arith.constant 0 : index
    %c0_57 = arith.constant 0 : index
    %44 = vector.load %arg2[%c0_53, %c0_54, %c2_55, %c0_56, %c0_57] : memref<1x1x18x18x4xbf16, #tpu.memory_space<vmem>>, vector<1x1x16x16x4xbf16>
    %45 = vector.shape_cast %44 : vector<1x1x16x16x4xbf16> to vector<16x16x4xbf16>
    %46 = vector.shape_cast %45 : vector<16x16x4xbf16> to vector<256x4xbf16>
    %c6 = arith.constant 6 : index
    %c0_58 = arith.constant 0 : index
    %c0_59 = arith.constant 0 : index
    %47 = vector.load %arg3[%c6, %c0_58, %c0_59] : memref<9x4x128xbf16, #tpu.memory_space<vmem>>, vector<1x4x128xbf16>
    %48 = vector.shape_cast %47 : vector<1x4x128xbf16> to vector<4x128xbf16>
    %cst_60 = arith.constant dense<0.000000e+00> : vector<256x128xf32>
    %49 = tpu.matmul %46, %48, %cst_60 {dimension_numbers = #tpu.dot_dimension_numbers<[1], [0], [0], [1], [0, 0, 1, 1], [], []>} : vector<256x4xbf16>, vector<4x128xbf16>, vector<256x128xf32> -> vector<256x128xf32>
    %c0_61 = arith.constant 0 : index
    %c0_62 = arith.constant 0 : index
    %c2_63 = arith.constant 2 : index
    %c1_64 = arith.constant 1 : index
    %c0_65 = arith.constant 0 : index
    %50 = vector.load %arg2[%c0_61, %c0_62, %c2_63, %c1_64, %c0_65] : memref<1x1x18x18x4xbf16, #tpu.memory_space<vmem>>, vector<1x1x16x16x4xbf16>
    %51 = vector.shape_cast %50 : vector<1x1x16x16x4xbf16> to vector<16x16x4xbf16>
    %52 = vector.shape_cast %51 : vector<16x16x4xbf16> to vector<256x4xbf16>
    %c7 = arith.constant 7 : index
    %c0_66 = arith.constant 0 : index
    %c0_67 = arith.constant 0 : index
    %53 = vector.load %arg3[%c7, %c0_66, %c0_67] : memref<9x4x128xbf16, #tpu.memory_space<vmem>>, vector<1x4x128xbf16>
    %54 = vector.shape_cast %53 : vector<1x4x128xbf16> to vector<4x128xbf16>
    %cst_68 = arith.constant dense<0.000000e+00> : vector<256x128xf32>
    %55 = tpu.matmul %52, %54, %cst_68 {dimension_numbers = #tpu.dot_dimension_numbers<[1], [0], [0], [1], [0, 0, 1, 1], [], []>} : vector<256x4xbf16>, vector<4x128xbf16>, vector<256x128xf32> -> vector<256x128xf32>
    %56 = arith.addf %49, %55 : vector<256x128xf32>
    %c0_69 = arith.constant 0 : index
    %c0_70 = arith.constant 0 : index
    %c2_71 = arith.constant 2 : index
    %c2_72 = arith.constant 2 : index
    %c0_73 = arith.constant 0 : index
    %57 = vector.load %arg2[%c0_69, %c0_70, %c2_71, %c2_72, %c0_73] : memref<1x1x18x18x4xbf16, #tpu.memory_space<vmem>>, vector<1x1x16x16x4xbf16>
    %58 = vector.shape_cast %57 : vector<1x1x16x16x4xbf16> to vector<16x16x4xbf16>
    %59 = vector.shape_cast %58 : vector<16x16x4xbf16> to vector<256x4xbf16>
    %c8 = arith.constant 8 : index
    %c0_74 = arith.constant 0 : index
    %c0_75 = arith.constant 0 : index
    %60 = vector.load %arg3[%c8, %c0_74, %c0_75] : memref<9x4x128xbf16, #tpu.memory_space<vmem>>, vector<1x4x128xbf16>
    %61 = vector.shape_cast %60 : vector<1x4x128xbf16> to vector<4x128xbf16>
    %cst_76 = arith.constant dense<0.000000e+00> : vector<256x128xf32>
    %62 = tpu.matmul %59, %61, %cst_76 {dimension_numbers = #tpu.dot_dimension_numbers<[1], [0], [0], [1], [0, 0, 1, 1], [], []>} : vector<256x4xbf16>, vector<4x128xbf16>, vector<256x128xf32> -> vector<256x128xf32>
    %63 = arith.addf %56, %62 : vector<256x128xf32>
    %c0_77 = arith.constant 0 : index
    %c0_78 = arith.constant 0 : index
    %64 = vector.load %arg6[%c0_77, %c0_78] : memref<256x128xf32, #tpu.memory_space<vmem>>, vector<256x128xf32>
    %65 = arith.addf %64, %63 : vector<256x128xf32>
    %c0_79 = arith.constant 0 : index
    %c0_80 = arith.constant 0 : index
    %66 = vector.load %arg6[%c0_79, %c0_80] : memref<256x128xf32, #tpu.memory_space<vmem>>, vector<256x128xf32>
    tpu.vector_store %arg6[%c0_79, %c0_80], %65 {strides = array<i32>} : memref<256x128xf32, #tpu.memory_space<vmem>>, vector<256x128xf32>,
    %c0_81 = arith.constant 0 : index
    %c0_82 = arith.constant 0 : index
    %67 = vector.load %arg6[%c0_81, %c0_82] : memref<256x128xf32, #tpu.memory_space<vmem>>, vector<256x128xf32>
    %c0_83 = arith.constant 0 : index
    %c0_84 = arith.constant 0 : index
    %68 = vector.load %arg4[%c0_83, %c0_84] : memref<1x128xf32, #tpu.memory_space<vmem>>, vector<1x128xf32>
    %69 = vector.broadcast %68 : vector<1x128xf32> to vector<256x128xf32>
    %70 = arith.addf %67, %69 : vector<256x128xf32>
    %71 = vector.shape_cast %70 : vector<256x128xf32> to vector<1x1x256x128xf32>
    %c0_85 = arith.constant 0 : index
    %c0_86 = arith.constant 0 : index
    %c0_87 = arith.constant 0 : index
    %c0_88 = arith.constant 0 : index
    %72 = vector.load %arg5[%c0_85, %c0_86, %c0_87, %c0_88] : memref<1x1x256x128xf32, #tpu.memory_space<vmem>>, vector<1x1x256x128xf32>
    tpu.vector_store %arg5[%c0_85, %c0_86, %c0_87, %c0_88], %71 {strides = array<i32>} : memref<1x1x256x128xf32, #tpu.memory_space<vmem>>, vector<1x1x256x128xf32>,
    return
  }
  func.func @transform_0(%arg0: i32, %arg1: i32) -> (i32, i32, i32, i32, i32) {
    %c0_i32 = arith.constant 0 : i32
    %c0_i32_0 = arith.constant 0 : i32
    %c0_i32_1 = arith.constant 0 : i32
    %c0_i32_2 = arith.constant 0 : i32
    return %arg0, %arg1, %c0_i32, %c0_i32_0, %c0_i32_1 : i32, i32, i32, i32, i32
  }
  func.func @transform_1(%arg0: i32, %arg1: i32) -> (i32, i32, i32) {
    %c0_i32 = arith.constant 0 : i32
    %c0_i32_0 = arith.constant 0 : i32
    %c0_i32_1 = arith.constant 0 : i32
    %c0_i32_2 = arith.constant 0 : i32
    return %c0_i32, %c0_i32_0, %c0_i32_1 : i32, i32, i32
  }
  func.func @transform_2(%arg0: i32, %arg1: i32) -> (i32, i32) {
    %c0_i32 = arith.constant 0 : i32
    %c0_i32_0 = arith.constant 0 : i32
    %c0_i32_1 = arith.constant 0 : i32
    return %c0_i32, %c0_i32_0 : i32, i32
  }
  func.func @transform_3(%arg0: i32, %arg1: i32) -> (i32, i32, i32, i32) {
    %c0_i32 = arith.constant 0 : i32
    %c0_i32_0 = arith.constant 0 : i32
    %c0_i32_1 = arith.constant 0 : i32
    return %arg0, %arg1, %c0_i32, %c0_i32_0 : i32, i32, i32, i32
  }
}

</mosaic_0001>

<bundles_post_ra>
// kernel: tpu_custom_call.1
= control target key start
LH: loop header
LB: loop body
LE: loop exit
PB: predicated region body
PF: predicated region fallthrough
CT: control target
= control target key end

     0   :  { %8 = vsyncpa [#allocation4], 0  ;;  %s8822_s0 = inlined_call_operand.vmem [shape: bf16[2,1,18,18,4], index: 0, kind: input, shape index: {}]   ;;  %s8823_s1 = inlined_call_operand.vmem [shape: bf16[9,4,128], index: 1, kind: input, shape index: {}]   ;;  %s8824_s2 = inlined_call_operand.vmem [shape: f32[1,128], index: 2, kind: input, shape index: {}]   ;;  %s8825_s3 = inlined_call_operand.hbm [shape: f32[2,1,256,128], index: 3, kind: output, shape index: {}]  }
   0x1   :  { %10 = vsyncpa [#allocation4 + $0x1], 0  ;;  %s6131_s12 = smov 0   ;;  %s6133_s13 = smov 0  }
   0x2   :  { %s6135_s14 = smov 0   ;;  %s6137_s15 = smov 0  }
   0x3   :  { %s6139_s16 = smov 0   ;;  %s6141_s17 = smov 0  }
   0x4 LB: > { %s4958_s18 = sadd.s32 4294967295, %s6106_s17   ;;  %s4959_s19 = sadd.s32 4294967294, %s6106_s17   ;;  %s6106_s17 = sphi %s6141_s17, %s16_s17   ;;  %s6102_s16 = sphi %s6139_s16, %s9122_s16   ;;  %s6098_s15 = sphi %s6137_s15, %s9121_s15   ;;  %s6094_s14 = sphi %s6135_s14, %s9120_s14   ;;  %s6090_s13 = sphi %s6133_s13, %s9119_s13   ;;  %s6086_s12 = sphi %s6131_s12, %s9118_s12  }
   0x5   : > { %s28_s20 = sadd.s32 1, %s6102_s16  ;;  %s107_s21 = sadd.s32 1, %s6094_s14 }
   0x6   : > { %p30_p0 = scmp.ge.s32.totalorder %s28_s20, 2  ;;  %p117_p1 = scmp.ne.s32.totalorder %s6094_s14, %s6090_s13 }
   0x7   : > { %p118_p2 = scmp.eq.s32.totalorder %s4958_s18, 1  ;;  %p123_p3 = scmp.ne.s32.totalorder %s6090_s13, %s6086_s12 }
   0x8   : > { %s9124_s20 = smov (%p30_p0, %s28_s20), 0  ;;  %p124_p5 = scmp.eq.s32.totalorder %s4959_s19, 1 }
   0x9   : > { %p6171_p4 = por %p118_p2, %p117_p1  ;;  %s102_s23 = ssub.s32 %s6102_s16, %s9124_s20 }
   0xa   : > { %p4962_p6 = scmp.ge.s32.totalorder %s6106_s17, 1  ;;  %p105_p7 = scmp.eq.s32.totalorder %s102_s23, 0 }
   0xb   : > { %p6178_p8 = por %p124_p5, %p123_p3  ;;  %p160_p9 = scmp.lt.s32.totalorder %s6106_s17, 3 }
   0xc   : > { %s6184_s25 = scalar_select %p105_p7, %s6094_s14, %s107_s21  }
   0xd   : > { %p161_p10 = pnand %p4962_p6, %p160_p9 }
   0xf   : > { %164 = sbr.rel (%p161_p10) target bundleno = 587 (0x24b), region = 32 }
  0x14   : > { %v4965_v0 = vld [vmem:[%s8823_s1 + $0x2] sm:$0x3]  ;;  %vm733_vm0 = vcmask 1041408   ;;  %p188_p11 = scmp.lt.s32.totalorder %s6098_s15, 1  ;;  %v230_v2 = vld [vmem:[%s8823_s1] sm:$0x3] }
  0x15   : > { %5906 = vmatprep.subr.msk.bf16.mxu1 %vm733_vm0, %v4965_v0  ;;  %5905 = vmatprep.subr.msk.bf16.mxu0 %vm733_vm0, %v4965_v0  ;;  %v735_v1 = vsel %vm733_vm0, %v4965_v0, 0  ;;  %v5046_v3 = vld [vmem:[%s8823_s1 + $0x4] sm:$0x3]  ;;  %v6205_v4 = vld [vmem:[%s8823_s1 + $0x8] sm:$0x3]  ;;  %v6213_v5 = vsel %vm733_vm0, %v230_v2, 0 }
  0x16   : > { %5904 = vmatpush3.bf16.msra.mxu1 %v735_v1  ;;  %5598 = vmatpush3.bf16.msra.mxu0 %v735_v1  ;;  %s189_s30 = scalar_select %p188_p11, %s6098_s15, 1  ;;  %vm247_vm1 = vsmask.f32 3328  ;;  %vm248_vm2 = vsmask.f32 7440  ;;  %v6216_v6 = vsel %vm733_vm0, %v5046_v3, 0 }
  0x17   : > { %5907 = vmatprep.subr.msk.bf16.mxu1 %vm733_vm0, %v230_v2  ;;  %5908 = vmatprep.subr.msk.bf16.mxu0 %vm733_vm0, %v5046_v3  ;;  %v6220_v7 = vsel %vm733_vm0, %v6205_v4, 0  ;;  %v6225_v8 = vld [vmem:[%s8823_s1 + $0x6] sm:$0x3]  ;;  %vm684_vm3 = vcmask 31744   ;;  %vm6267_vm4 = vmor %vm247_vm1, %vm248_vm2  ;;  %vm1238_vm5 = vcmask 1042432   ;;  %vm1239_vm6 = vcmask 1046532  }
  0x18   : > { %s5915_s8 = smul.u32 216, %s189_s30  ;;  %v6252_v20 = vsel %vm733_vm0, %v6225_v8, 0  ;;  %vm6543_vm7 = vmor %vm1238_vm5, %vm1239_vm6  ;;  %s185_s5 = sand.u32 1, %s6090_s13  }
  0x19   : > { %s4963_s6 = sshll.u32 %s185_s5, 8  ;;  %s5443_s10 = sshll.u32 %s6098_s15, 12 }
  0x1a   : > { %s6210_s11 = scalar_lea.vmem %s8822_s0, %s5915_s8  ;;  %s8644_s9 = scalar_lea.vmem [#allocation3], %s4963_s6 }
  0x1b   : > { %v6228_v9 = vld [vmem:[%s6210_s11] sm:$0xf]  ;;  %v6231_v10 = vld [vmem:[%s6210_s11 + $0x4] sm:$0xf]  ;;  %v6234_v11 = vld [vmem:[%s6210_s11 + $0x8] sm:$0x1]  ;;  %s8768_s21 = scalar_lea.hbm %s8825_s3, %s5443_s10 }
  0x1c   : > { %v251_v12 = vshrl.u32 %v6228_v9, 16  ;;  %v254_v13 = vshll.u32 %v6228_v9, 16  ;;  %v260_v14 = vshll.u32 %v6231_v10, 16  ;;  %v264_v15 = vshrl.u32 %v6231_v10, 16  ;;  %v6241_v16 = vld [vmem:[%s6210_s11 + $0x60] sm:$0xf] }
  0x1d   : > { %v270_v17 = vshll.u32 %v6234_v11, 16  ;;  %v6245_v18 = vld [vmem:[%s6210_s11 + $0x64] sm:$0xf]  ;;  %v6248_v19 = vld [vmem:[%s6210_s11 + $0x68] sm:$0x1]  ;;  %v443_v26 = vshrl.u32 %v6241_v16, 16 }
  0x1e   : > { %v253_v21 = vrot.slane %v251_v12, 4  ;;  %v256_v22 = vrot.slane %v254_v13, 5  ;;  %v262_v23 = vrot.slane %v260_v14, 5  ;;  %v266_v24 = vrot.slane %v264_v15, 4  ;;  %v6260_v33 = vld [vmem:[%s6210_s11 + $0xc] sm:$0xf] }
  0x1f   : > { %v272_v25 = vrot.slane %v270_v17, 5  ;;  %v446_v27 = vshll.u32 %v6241_v16, 16  ;;  %v452_v28 = vshll.u32 %v6245_v18, 16  ;;  %v456_v31 = vshrl.u32 %v6245_v18, 16  ;;  %v6263_v34 = vld [vmem:[%s6210_s11 + $0x10] sm:$0xf] }
  0x20   : > { %v257_v29 = vor.u32 %v256_v22, %v253_v21  ;;  %v267_v30 = vor.u32 %v266_v24, %v262_v23  ;;  %v462_v32 = vshll.u32 %v6248_v19, 16  ;;  %v445_v37 = vrot.slane %v443_v26, 4  ;;  %v6273_v45 = vld [vmem:[%s6210_s11 + $0x14] sm:$0x1]  ;;  %v6284_v57 = vld [vmem:[%s6210_s11 + $0x6c] sm:$0xf] }
  0x21   : > { %v448_v38 = vrot.slane %v446_v27, 5  ;;  %v454_v39 = vrot.slane %v452_v28, 5  ;;  %v458_v42 = vrot.slane %v456_v31, 4  ;;  %v275_v46 = vshrl.u32 %v6260_v33, 16  ;;  %v6288_v62 = vld [vmem:[%s6210_s11 + $0x70] sm:$0xf] }
  0x22   : > { %v258_v40 = vrot.slane %v257_v29, 4  ;;  %v268_v41 = vrot.slane %v267_v30, 4  ;;  %v464_v43 = vrot.slane %v462_v32, 5  ;;  %v278_v47 = vshll.u32 %v6260_v33, 16  ;;  %v6296_v3 = vld [vmem:[%s6210_s11 + $0x74] sm:$0x1] }
  0x23   : > { %v449_v44 = vor.u32 %v448_v38, %v445_v37  ;;  %v284_v48 = vshll.u32 %v6263_v34, 16  ;;  %v459_v51 = vor.u32 %v458_v42, %v454_v39  ;;  %v288_v52 = vshrl.u32 %v6263_v34, 16  ;;  %v6302_v17 = vld [vmem:[%s6210_s11 + $0x18] sm:$0xf]  ;;  %v6309_v29 = vld [vmem:[%s6210_s11 + $0x1c] sm:$0xf] }
  0x24   : > { %v263_v49 = vsel %vm6267_vm4, %v258_v40, %v262_v23  ;;  %v273_v50 = vsel %vm6267_vm4, %v268_v41, %v272_v25  ;;  %v277_v55 = vrot.slane %v275_v46, 4  ;;  %v280_v56 = vrot.slane %v278_v47, 5  ;;  %v6315_v37 = vld [vmem:[%s6210_s11 + $0x20] sm:$0x1]  ;;  %s8777_s15 = scalar_lea.sflag [#allocation4], %s185_s5  ;;  %s6108_s26 = smov [#allocation3]  }
  0x25   : > { %v4966_v53 = vcombine.low %v263_v49, %v273_v50  ;;  %v450_v54 = vrot.slane %v449_v44, 4  ;;  %v460_v58 = vrot.slane %v459_v51, 4  ;;  %v286_v59 = vrot.slane %v284_v48, 5  ;;  %s6034_s27 = sshll.u32 %s6108_s26, 4  ;;  %s6035_s27 = int_to_ptr.vmem [resolvable:$false] %s6034_s27 }
  0x26   : > { %v290_v60 = vrot.slane %v288_v52, 4  ;;  %v294_v61 = vshll.u32 %v6273_v45, 16  ;;  %v281_v0 = vor.u32 %v280_v56, %v277_v55  ;;  %v467_v15 = vshrl.u32 %v6284_v57, 16  ;;  %s6036_s28 = scalar_lea.vmem %s6035_s27, 8192 }
  0x27   : > { %5599 = vmatprep.mubr.msk.bf16.mxu0 %vm684_vm3, %v4966_v53  ;;  %v455_v63 = vsel %vm6267_vm4, %v450_v54, %v454_v39  ;;  %v465_v12 = vsel %vm6267_vm4, %v460_v58, %v464_v43  ;;  %v470_v23 = vshll.u32 %v6284_v57, 16  ;;  %v476_v24 = vshll.u32 %v6288_v62, 16  ;;  %v6322_v43 = vld [vmem:[%s6210_s11 + $0x78] sm:$0xf]  ;;  %v6328_v53 = vld [vmem:[%s6210_s11 + $0x7c] sm:$0xf] }
  0x28   : > { %v291_v13 = vor.u32 %v290_v60, %v286_v59  ;;  %v296_v14 = vrot.slane %v294_v61, 5  ;;  %v4974_v21 = vcombine.low %v455_v63, %v465_v12  ;;  %v282_v22 = vrot.slane %v281_v0, 4  ;;  %v6335_v0 = vld [vmem:[%s6210_s11 + $0x80] sm:$0x1] }
  0x29   : > { %v469_v26 = vrot.slane %v467_v15, 4  ;;  %v480_v27 = vshrl.u32 %v6288_v62, 16  ;;  %v486_v28 = vshll.u32 %v6296_v3, 16  ;;  %v472_v31 = vrot.slane %v470_v23, 5  ;;  %8887 = vst [vmem:[#allocation6_spill] sm:$0xff] %v6335_v0 }
  0x2a   : > { %v292_v25 = vrot.slane %v291_v13, 4  ;;  %5615 = vmatprep.mubr.msk.bf16.mxu1 %vm684_vm3, %v4974_v21  ;;  %v287_v30 = vsel %vm6267_vm4, %v282_v22, %v286_v59  ;;  %v478_v32 = vrot.slane %v476_v24, 5  ;;  %v299_v38 = vshrl.u32 %v6302_v17, 16  ;;  %v6341_v21 = vld [vmem:[%s6210_s11 + $0x24] sm:$0xf] }
  0x2b   : > { %v482_v40 = vrot.slane %v480_v27, 4  ;;  %v488_v41 = vrot.slane %v486_v28, 5  ;;  %v302_v42 = vshll.u32 %v6302_v17, 16  ;;  %v473_v46 = vor.u32 %v472_v31, %v469_v26 }
  0x2c   : > { %v297_v39 = vsel %vm6267_vm4, %v292_v25, %v296_v14  ;;  %v301_v47 = vrot.slane %v299_v38, 4  ;;  %v308_v48 = vshll.u32 %v6309_v29, 16  ;;  %v312_v51 = vshrl.u32 %v6309_v29, 16  ;;  %v6349_v25 = vld [vmem:[%s6210_s11 + $0x28] sm:$0xf] }
  0x2d   : > { %v4967_v44 = vcombine.low %v287_v30, %v297_v39  ;;  %v483_v49 = vor.u32 %v482_v40, %v478_v32  ;;  %v304_v50 = vrot.slane %v302_v42, 5  ;;  %v318_v52 = vshll.u32 %v6315_v37, 16  ;;  %v6355_v38 = vld [vmem:[%s6210_s11 + $0x2c] sm:$0x1] }
  0x2e   : > { %v474_v54 = vrot.slane %v473_v46, 4  ;;  %v310_v55 = vrot.slane %v308_v48, 5  ;;  %v491_v56 = vshrl.u32 %v6322_v43, 16  ;;  %v494_v58 = vshll.u32 %v6322_v43, 16  ;;  %v6362_v46 = vld [vmem:[%s6210_s11 + $0x84] sm:$0xf] }
  0x2f   : > { %5600 = vmatmul.mubr.msk.bf16.vlgmr.msra.gmra.mxu0 %vm684_vm3, %v4967_v44  ;;  %v484_v59 = vrot.slane %v483_v49, 4  ;;  %v305_v60 = vor.u32 %v304_v50, %v301_v47  ;;  %v314_v61 = vrot.slane %v312_v51, 4  ;;  %v320_v63 = vrot.slane %v318_v52, 5  ;;  %v6369_v51 = vld [vmem:[%s6210_s11 + $0x88] sm:$0xf] }
  0x30   : > { %5666 = vmatpush3.bf16.msra.mxu0 %v6216_v6  ;;  %v479_v12 = vsel %vm6267_vm4, %v474_v54, %v478_v32  ;;  %v493_v13 = vrot.slane %v491_v56, 4  ;;  %v496_v14 = vrot.slane %v494_v58, 5  ;;  %v500_v15 = vshll.u32 %v6328_v53, 16 }
  0x31   : > { %5910 = vmatprep.subr.msk.bf16.mxu0 %vm733_vm0, %v6225_v8  ;;  %v489_v6 = vsel %vm6267_vm4, %v484_v59, %v488_v41  ;;  %v306_v22 = vrot.slane %v305_v60, 4  ;;  %v315_v23 = vor.u32 %v314_v61, %v310_v55  ;;  %v504_v24 = vshrl.u32 %v6328_v53, 16  ;;  %v6377_v60 = vld [vmem:[%s6210_s11 + $0x8c] sm:$0x1] }
  0x32   : > { %v4975_v26 = vcombine.low %v479_v12, %v489_v6  ;;  %v497_v27 = vor.u32 %v496_v14, %v493_v13  ;;  %v502_v28 = vrot.slane %v500_v15, 5  ;;  %v510_v30 = vshll.u32 %v6335_v0, 16  ;;  %8888 = vst [vmem:[#allocation7_spill] sm:$0xff] %v6377_v60  ;;  %v6385_v15 = vld [vmem:[%s6210_s11 + $0x30] sm:$0xf] }
  0x33   : > { %v311_v31 = vsel %vm6267_vm4, %v306_v22, %v310_v55  ;;  %v316_v8 = vrot.slane %v315_v23, 4  ;;  %v506_v32 = vrot.slane %v504_v24, 4  ;;  %v323_v39 = vshrl.u32 %v6341_v21, 16  ;;  %v6390_v24 = vld [vmem:[%s6210_s11 + $0x34] sm:$0xf] }
  0x34   : > { %5616 = vmatmul.mubr.msk.bf16.vlgmr.msra.gmra.mxu1 %vm684_vm3, %v4975_v26  ;;  %v498_v40 = vrot.slane %v497_v27, 4  ;;  %v512_v41 = vrot.slane %v510_v30, 5  ;;  %v326_v42 = vshll.u32 %v6341_v21, 16  ;;  %v332_v44 = vshll.u32 %v6349_v25, 16  ;;  %v1191_v0 = vld [vmem:[%s6210_s11 + $0xc] sm:$0xe] }
  0x35   : > { %5632 = vmatpush3.bf16.msra.mxu1 %v6213_v5  ;;  %v321_v47 = vsel %vm6267_vm4, %v316_v8, %v320_v63  ;;  %v507_v48 = vor.u32 %v506_v32, %v502_v28  ;;  %v325_v49 = vrot.slane %v323_v39, 4  ;;  %v336_v50 = vshrl.u32 %v6349_v25, 16 }
  0x36   : > { %v4968_v52 = vcombine.low %v311_v31, %v321_v47  ;;  %v503_v54 = vsel %vm6267_vm4, %v498_v40, %v502_v28  ;;  %v328_v55 = vrot.slane %v326_v42, 5  ;;  %v334_v56 = vrot.slane %v332_v44, 5  ;;  %5909 = vmatprep.subr.msk.bf16.mxu1 %vm733_vm0, %v6205_v4  ;;  %v6398_v42 = vld [vmem:[%s6210_s11 + $0x38] sm:$0x1] }
  0x37   : > { %v508_v5 = vrot.slane %v507_v48, 4  ;;  %v338_v58 = vrot.slane %v336_v50, 4  ;;  %v342_v59 = vshll.u32 %v6355_v38, 16  ;;  %v515_v61 = vshrl.u32 %v6362_v46, 16  ;;  %v6403_v48 = vld [vmem:[%s6210_s11 + $0x90] sm:$0xf] }
  0x38   : > { %5603 = vmatprep.mubr.msk.bf16.mxu0 %vm684_vm3, %v4968_v52  ;;  %v329_v63 = vor.u32 %v328_v55, %v325_v49  ;;  %v518_v12 = vshll.u32 %v6362_v46, 16  ;;  %v524_v13 = vshll.u32 %v6369_v51, 16  ;;  %v528_v14 = vshrl.u32 %v6369_v51, 16  ;;  %8889 = vst [vmem:[#allocation8_spill] sm:$0xff] %v6403_v48  ;;  %v6408_v55 = vld [vmem:[%s6210_s11 + $0x94] sm:$0xf] }
  0x39   : > { %v513_v4 = vsel %vm6267_vm4, %v508_v5, %v512_v41  ;;  %v339_v6 = vor.u32 %v338_v58, %v334_v56  ;;  %v344_v22 = vrot.slane %v342_v59, 5  ;;  %v517_v23 = vrot.slane %v515_v61, 4  ;;  %8890 = vst [vmem:[#allocation9_spill] sm:$0xff] %v6408_v55 }
  0x3a   : > { %v4976_v26 = vcombine.low %v503_v54, %v513_v4  ;;  %v330_v27 = vrot.slane %v329_v63, 4  ;;  %v520_v28 = vrot.slane %v518_v12, 5  ;;  %v526_v30 = vrot.slane %v524_v13, 5 }
  0x3b   : > { %v340_v31 = vrot.slane %v339_v6, 4  ;;  %v530_v8 = vrot.slane %v528_v14, 4  ;;  %v534_v32 = vshll.u32 %v6377_v60, 16  ;;  %v347_v39 = vshrl.u32 %v6385_v15, 16  ;;  %v6417_v6 = vld [vmem:[%s6210_s11 + $0x98] sm:$0x1] }
  0x3c   : > { %5619 = vmatprep.mubr.msk.bf16.mxu1 %vm684_vm3, %v4976_v26  ;;  %v335_v40 = vsel %vm6267_vm4, %v330_v27, %v334_v56  ;;  %v521_v41 = vor.u32 %v520_v28, %v517_v23  ;;  %v350_v44 = vshll.u32 %v6385_v15, 16  ;;  %v356_v47 = vshll.u32 %v6390_v24, 16  ;;  %8891 = vst [vmem:[#allocation10_spill] sm:$0xff] %v6417_v6  ;;  %v6422_v26 = vld [vmem:[%s6210_s11 + $0x3c] sm:$0xf] }
  0x3d   : > { %v345_v49 = vsel %vm6267_vm4, %v340_v31, %v344_v22  ;;  %v531_v50 = vor.u32 %v530_v8, %v526_v30  ;;  %v536_v52 = vrot.slane %v534_v32, 5  ;;  %v349_v54 = vrot.slane %v347_v39, 4  ;;  %v6427_v32 = vld [vmem:[%s6210_s11 + $0x40] sm:$0xf] }
  0x3e   : > { %v4969_v56 = vcombine.low %v335_v40, %v345_v49  ;;  %v522_v5 = vrot.slane %v521_v41, 4  ;;  %v352_v58 = vrot.slane %v350_v44, 5  ;;  %v358_v59 = vrot.slane %v356_v47, 5 }
  0x3f   : > { %v532_v61 = vrot.slane %v531_v50, 4  ;;  %v360_v63 = vshrl.u32 %v6390_v24, 16  ;;  %v366_v12 = vshll.u32 %v6398_v42, 16  ;;  %v539_v13 = vshrl.u32 %v6403_v48, 16 }
  0x40   : > { %5604 = vmatmul.mubr.msk.bf16.gmra.mxu0 %vm684_vm3, %v4969_v56  ;;  %v527_v14 = vsel %vm6267_vm4, %v522_v5, %v526_v30  ;;  %v353_v4 = vor.u32 %v352_v58, %v349_v54  ;;  %v542_v22 = vshll.u32 %v6403_v48, 16  ;;  %v548_v23 = vshll.u32 %v6408_v55, 16  ;;  %v6436_v56 = vld [vmem:[%s6210_s11 + $0x44] sm:$0x1] }
  0x41   : > { %v537_v27 = vsel %vm6267_vm4, %v532_v61, %v536_v52  ;;  %v362_v28 = vrot.slane %v360_v63, 4  ;;  %v368_v31 = vrot.slane %v366_v12, 5  ;;  %v541_v8 = vrot.slane %v539_v13, 4  ;;  %v6441_v61 = vld [vmem:[%s6210_s11 + $0x9c] sm:$0xf] }
  0x42   : > { %v4977_v30 = vcombine.low %v527_v14, %v537_v27  ;;  %v354_v39 = vrot.slane %v353_v4, 4  ;;  %v544_v40 = vrot.slane %v542_v22, 5  ;;  %v550_v41 = vrot.slane %v548_v23, 5  ;;  %8892 = vst [vmem:[#allocation11_spill] sm:$0xff] %v6441_v61 }
  0x43   : > { %v363_v44 = vor.u32 %v362_v28, %v358_v59  ;;  %v552_v47 = vshrl.u32 %v6408_v55, 16  ;;  %v558_v49 = vshll.u32 %v6417_v6, 16  ;;  %v371_v50 = vshrl.u32 %v6422_v26, 16  ;;  %v6508_v6 = vld [vmem:[%s6210_s11 + $0x5c] sm:$0x1] }
  0x44   : > { %5620 = vmatmul.mubr.msk.bf16.gmra.mxu1 %vm684_vm3, %v4977_v30  ;;  %v359_v52 = vsel %vm6267_vm4, %v354_v39, %v358_v59  ;;  %v545_v54 = vor.u32 %v544_v40, %v541_v8  ;;  %v374_v5 = vshll.u32 %v6422_v26, 16  ;;  %v380_v58 = vshll.u32 %v6427_v32, 16  ;;  %v6448_v30 = vld [vmem:[%s6210_s11 + $0xa0] sm:$0xf] }
  0x45   : > { %v364_v63 = vrot.slane %v363_v44, 4  ;;  %v554_v12 = vrot.slane %v552_v47, 4  ;;  %v560_v13 = vrot.slane %v558_v49, 5  ;;  %v373_v14 = vrot.slane %v371_v50, 4  ;;  %8893 = vst [vmem:[#allocation12_spill] sm:$0xff] %v6448_v30 }
  0x46   : > { %v546_v4 = vrot.slane %v545_v54, 4  ;;  %v376_v22 = vrot.slane %v374_v5, 5  ;;  %v382_v23 = vrot.slane %v380_v58, 5  ;;  %v384_v59 = vshrl.u32 %v6427_v32, 16  ;;  %v6454_v50 = vld [vmem:[%s6210_s11 + $0xa4] sm:$0x1] }
  0x47   : > { %v369_v27 = vsel %vm6267_vm4, %v364_v63, %v368_v31  ;;  %v555_v28 = vor.u32 %v554_v12, %v550_v41  ;;  %v390_v8 = vshll.u32 %v6436_v56, 16  ;;  %v563_v39 = vshrl.u32 %v6441_v61, 16  ;;  %8894 = vst [vmem:[#allocation13_spill] sm:$0xff] %v6454_v50  ;;  %v6457_v54 = vld [vmem:[%s6210_s11 + $0x48] sm:$0xf] }
  0x48   : > { %v4970_v40 = vcombine.low %v359_v52, %v369_v27  ;;  %v551_v44 = vsel %vm6267_vm4, %v546_v4, %v550_v41  ;;  %v377_v47 = vor.u32 %v376_v22, %v373_v14  ;;  %v386_v49 = vrot.slane %v384_v59, 4  ;;  %v6467_v59 = vld [vmem:[%s6210_s11 + $0x4c] sm:$0xf] }
  0x49   : > { %v556_v5 = vrot.slane %v555_v28, 4  ;;  %v392_v31 = vrot.slane %v390_v8, 5  ;;  %v565_v58 = vrot.slane %v563_v39, 4  ;;  %v566_v63 = vshll.u32 %v6441_v61, 16 }
  0x4a   : > { %5607 = vmatprep.mubr.msk.bf16.mxu0 %vm684_vm3, %v4970_v40  ;;  %v378_v12 = vrot.slane %v377_v47, 4  ;;  %v387_v52 = vor.u32 %v386_v49, %v382_v23  ;;  %v572_v27 = vshll.u32 %v6448_v30, 16  ;;  %v576_v41 = vshrl.u32 %v6448_v30, 16  ;;  %v6473_v49 = vld [vmem:[%s6210_s11 + $0x50] sm:$0x1] }
  0x4b   : > { %v561_v14 = vsel %vm6267_vm4, %v556_v5, %v560_v13  ;;  %v568_v4 = vrot.slane %v566_v63, 5  ;;  %v582_v22 = vshll.u32 %v6454_v50, 16  ;;  %v395_v28 = vshrl.u32 %v6457_v54, 16  ;;  %v6476_v5 = vld [vmem:[%s6210_s11 + $0xa8] sm:$0xf] }
  0x4c   : > { %v4978_v8 = vcombine.low %v551_v44, %v561_v14  ;;  %v383_v39 = vsel %vm6267_vm4, %v378_v12, %v382_v23  ;;  %v388_v40 = vrot.slane %v387_v52, 4  ;;  %v574_v47 = vrot.slane %v572_v27, 5  ;;  %8895 = vst [vmem:[#allocation14_spill] sm:$0xff] %v6476_v5  ;;  %v6486_v14 = vld [vmem:[%s6210_s11 + $0xac] sm:$0xf] }
  0x4d   : > { %v569_v2 = vor.u32 %v568_v4, %v565_v58  ;;  %v578_v36 = vrot.slane %v576_v41, 4  ;;  %v584_v1 = vrot.slane %v582_v22, 5  ;;  %v397_v13 = vrot.slane %v395_v28, 4  ;;  %8896 = vst [vmem:[#allocation15_spill] sm:$0xff] %v6486_v14 }
  0x4e   : > { %5623 = vmatprep.mubr.msk.bf16.mxu1 %vm684_vm3, %v4978_v8  ;;  %v393_v44 = vsel %vm6267_vm4, %v388_v40, %v392_v31  ;;  %v398_v63 = vshll.u32 %v6457_v54, 16  ;;  %v404_v23 = vshll.u32 %v6467_v59, 16  ;;  %v408_v12 = vshrl.u32 %v6467_v59, 16  ;;  %v6489_v8 = vld [vmem:[%s6210_s11 + $0xb0] sm:$0x1] }
  0x4f   : > { %v4971_v52 = vcombine.low %v383_v39, %v393_v44  ;;  %v570_v27 = vrot.slane %v569_v2, 4  ;;  %v579_v58 = vor.u32 %v578_v36, %v574_v47  ;;  %v414_v41 = vshll.u32 %v6473_v49, 16  ;;  %8897 = vst [vmem:[#allocation16_spill] sm:$0xff] %v6489_v8 }
  0x50   : > { %v400_v4 = vrot.slane %v398_v63, 5  ;;  %v406_v22 = vrot.slane %v404_v23, 5  ;;  %v410_v28 = vrot.slane %v408_v12, 4  ;;  %v587_v31 = vshrl.u32 %v6476_v5, 16  ;;  %v6498_v23 = vld [vmem:[%s6210_s11 + $0x54] sm:$0xf] }
  0x51   : > { %5608 = vmatmul.mubr.msk.bf16.gmra.mxu0 %vm684_vm3, %v4971_v52  ;;  %v575_v39 = vsel %vm6267_vm4, %v570_v27, %v574_v47  ;;  %v580_v2 = vrot.slane %v579_v58, 4  ;;  %v416_v36 = vrot.slane %v414_v41, 5  ;;  %v590_v40 = vshll.u32 %v6476_v5, 16  ;;  %v6505_v58 = vld [vmem:[%s6210_s11 + $0x58] sm:$0xf] }
  0x52   : > { %v401_v44 = vor.u32 %v400_v4, %v397_v13  ;;  %v411_v50 = vor.u32 %v410_v28, %v406_v22  ;;  %v589_v61 = vrot.slane %v587_v31, 4  ;;  %v596_v63 = vshll.u32 %v6486_v14, 16 }
  0x53   : > { %v585_v12 = vsel %vm6267_vm4, %v580_v2, %v584_v1  ;;  %v592_v52 = vrot.slane %v590_v40, 5  ;;  %v600_v47 = vshrl.u32 %v6486_v14, 16  ;;  %v606_v27 = vshll.u32 %v6489_v8, 16  ;;  %v6530_v8 = vld [vmem:[%s6210_s11 + $0xbc] sm:$0x1] }
  0x54   : > { %v4979_v13 = vcombine.low %v575_v39, %v585_v12  ;;  %v402_v41 = vrot.slane %v401_v44, 4  ;;  %v412_v4 = vrot.slane %v411_v50, 4  ;;  %v598_v28 = vrot.slane %v596_v63, 5 }
  0x55   : > { %v593_v31 = vor.u32 %v592_v52, %v589_v61  ;;  %v602_v5 = vrot.slane %v600_v47, 4  ;;  %v608_v30 = vrot.slane %v606_v27, 5  ;;  %v419_v1 = vshrl.u32 %v6498_v23, 16  ;;  %v6519_v61 = vld [vmem:[%s6210_s11 + $0xb4] sm:$0xf] }
  0x56   : > { %5624 = vmatmul.mubr.msk.bf16.gmra.mxu1 %vm684_vm3, %v4979_v13  ;;  %v407_v2 = vsel %vm6267_vm4, %v402_v41, %v406_v22  ;;  %v417_v40 = vsel %vm6267_vm4, %v412_v4, %v416_v36  ;;  %v422_v50 = vshll.u32 %v6498_v23, 16  ;;  %v428_v39 = vshll.u32 %v6505_v58, 16  ;;  %8898 = vst [vmem:[#allocation17_spill] sm:$0xff] %v6519_v61  ;;  %v6522_v47 = vld [vmem:[%s6210_s11 + $0xb8] sm:$0xf] }
  0x57   : > { %v4972_v44 = vcombine.low %v407_v2, %v417_v40  ;;  %v594_v63 = vrot.slane %v593_v31, 4  ;;  %v603_v12 = vor.u32 %v602_v5, %v598_v28  ;;  %v421_v52 = vrot.slane %v419_v1, 4 }
  0x58   : > { %v424_v27 = vrot.slane %v422_v50, 5  ;;  %v430_v13 = vrot.slane %v428_v39, 5  ;;  %v432_v22 = vshrl.u32 %v6505_v58, 16  ;;  %v438_v36 = vshll.u32 %v6508_v6, 16  ;;  %v1190_v39 = vld [vmem:[%s6210_s11] sm:$0xe] }
  0x59   : > { %5611 = vmatprep.mubr.msk.bf16.mxu0 %vm684_vm3, %v4972_v44  ;;  %v599_v41 = vsel %vm6267_vm4, %v594_v63, %v598_v28  ;;  %v604_v4 = vrot.slane %v603_v12, 4  ;;  %v611_v5 = vshrl.u32 %v6519_v61, 16  ;;  %v614_v31 = vshll.u32 %v6519_v61, 16 }
  0x5a   : > { %v425_v1 = vor.u32 %v424_v27, %v421_v52  ;;  %v434_v2 = vrot.slane %v432_v22, 4  ;;  %v440_v40 = vrot.slane %v438_v36, 5  ;;  %v620_v50 = vshll.u32 %v6522_v47, 16 }
  0x5b   : > { %v609_v44 = vsel %vm6267_vm4, %v604_v4, %v608_v30  ;;  %v613_v14 = vrot.slane %v611_v5, 4  ;;  %v616_v48 = vrot.slane %v614_v31, 5  ;;  %v624_v28 = vshrl.u32 %v6522_v47, 16 }
  0x5c   : > { %v4980_v63 = vcombine.low %v599_v41, %v609_v44  ;;  %v426_v12 = vrot.slane %v425_v1, 4  ;;  %v435_v55 = vor.u32 %v434_v2, %v430_v13  ;;  %v622_v60 = vrot.slane %v620_v50, 5  ;;  %v1192_v2 = vld [vmem:[%s6210_s11 + $0x18] sm:$0xe] }
  0x5d   : > { %v617_v61 = vor.u32 %v616_v48, %v613_v14  ;;  %v626_v52 = vrot.slane %v624_v28, 4  ;;  %v630_v27 = vshll.u32 %v6530_v8, 16  ;;  %v5030_v30 = vrot.slane %v1190_v39, 9 }
  0x5e   : > { %5627 = vmatprep.mubr.msk.bf16.mxu1 %vm684_vm3, %v4980_v63  ;;  %v431_v36 = vsel %vm6267_vm4, %v426_v12, %v430_v13  ;;  %v436_v41 = vrot.slane %v435_v55, 4  ;;  %v1243_v4 = vrot.slane %v6231_v10, 5  ;;  %v4999_v48 = vcombine.low %v6260_v33, %v6263_v34  ;;  %v1193_v12 = vld [vmem:[%s6210_s11 + $0x24] sm:$0xe] }
  0x5f   : > { %v618_v14 = vrot.slane %v617_v61, 4  ;;  %v627_v5 = vor.u32 %v626_v52, %v622_v60  ;;  %v632_v31 = vrot.slane %v630_v27, 5  ;;  %v5031_v1 = vrot.slane %v1191_v0, 9 }
  0x60   : > { %v441_v50 = vsel %vm6267_vm4, %v436_v41, %v440_v40  ;;  %v1244_v39 = vsel %vm6543_vm7, %v5030_v30, %v1243_v4  ;;  %v1245_v44 = vrot.slane %v1243_v4, 4  ;;  %v8901_v55 = vrot.slane %v6263_v34, 5 }
  0x61   : > { %v4973_v28 = vcombine.low %v431_v36, %v441_v50  ;;  %v623_v63 = vsel %vm6267_vm4, %v618_v14, %v622_v60  ;;  %v628_v61 = vrot.slane %v627_v5, 4  ;;  %v4998_v0 = vcombine.low %v6228_v9, %v6231_v10  ;;  %v1194_v14 = vld [vmem:[%s6210_s11 + $0x30] sm:$0xe] }
  0x62   : > { %v1252_v13 = vrot.slane %v8901_v55, 4  ;;  %v8902_v52 = vrot.slane %v6234_v11, 5  ;;  %v8903_v27 = vmov %v8901_v55  ;;  %v5000_v36 = vcombine.low %v6302_v17, %v6309_v29  ;;  %v1195_v55 = vld [vmem:[%s6210_s11 + $0x3c] sm:$0xe] }
  0x63   : > { %v1251_v30 = vsel %vm6543_vm7, %v5031_v1, %v8903_v27  ;;  %v5032_v41 = vrot.slane %v1192_v2, 9  ;;  %5612 = vmatmul.mubr.msk.bf16.gmra.mxu0 %vm684_vm3, %v4973_v28  ;;  %v633_v9 = vsel %vm6267_vm4, %v628_v61, %v632_v31  ;;  %v8904_v11 = vrot.slane %v6273_v45, 5 }
  0x64   : > { %v1247_v40 = vsel %vm6543_vm7, %v1245_v44, %v8902_v52  ;;  %v1257_v4 = vrot.slane %v6309_v29, 5  ;;  %v1302_v5 = vrot.slane %v6248_v19, 5  ;;  %v4981_v1 = vcombine.low %v623_v63, %v633_v9 }
  0x65   : > { %v5047_v10 = vcombine.low %v1244_v39, %v1247_v40  ;;  %v1254_v60 = vsel %vm6543_vm7, %v1252_v13, %v8904_v11  ;;  %v1260_v2 = vrot.slane %v6315_v37, 5  ;;  %v5033_v50 = vrot.slane %v1193_v12, 9  ;;  %v1196_v40 = vld [vmem:[%s6210_s11 + $0x48] sm:$0xe] }
  0x66   : > { %v1258_v31 = vsel %vm6543_vm7, %v5032_v41, %v1257_v4  ;;  %v1259_v39 = vrot.slane %v1257_v4, 4  ;;  %v1264_v45 = vrot.slane %v6349_v25, 5  ;;  %v1267_v44 = vrot.slane %v6355_v38, 5  ;;  %5628 = vmatmul.mubr.msk.bf16.gmra.mxu1 %vm684_vm3, %v4981_v1 }
  0x67   : > { %5667 = vmatprep.mubr.msk.bf16.mxu0 %vm684_vm3, %v5047_v10  ;;  %v5048_v13 = vcombine.low %v1251_v30, %v1254_v60  ;;  %v5034_v28 = vrot.slane %v1194_v14, 9  ;;  %v1271_v63 = vrot.slane %v6390_v24, 5  ;;  %v1274_v37 = vrot.slane %v6398_v42, 5  ;;  %5633 = vmatprep.mubr.msk.bf16.mxu1 %vm684_vm3, %v4998_v0  ;;  %v1197_v60 = vld [vmem:[%s6210_s11 + $0x54] sm:$0xe] }
  0x68   : > { %v1261_v61 = vsel %vm6543_vm7, %v1259_v39, %v1260_v2  ;;  %v5001_v12 = vcombine.low %v6341_v21, %v6349_v25  ;;  %v1266_v52 = vrot.slane %v1264_v45, 4  ;;  %v5002_v38 = vcombine.low %v6385_v15, %v6390_v24  ;;  %v8909_v21 = vld [vmem:[#allocation10_spill] sm:$0xff] }
  0x69   : > { %v5049_v27 = vcombine.low %v1258_v31, %v1261_v61  ;;  %v1265_v30 = vsel %vm6543_vm7, %v5033_v50, %v1264_v45  ;;  %v1273_v41 = vrot.slane %v1271_v63, 4  ;;  %v5035_v9 = vrot.slane %v1195_v55, 9  ;;  %v6620_v50 = vld [vmem:[%s8823_s1 + $0xe] sm:$0x3] }
  0x6a   : > { %v1268_v42 = vsel %vm6543_vm7, %v1266_v52, %v1267_v44  ;;  %v5003_v0 = vcombine.low %v6422_v26, %v6427_v32  ;;  %v1278_v10 = vrot.slane %v6427_v32, 5  ;;  %v1281_v11 = vrot.slane %v6436_v56, 5  ;;  %v1198_v44 = vld [vmem:[%s6210_s11 + $0x60] sm:$0xe]  ;;  %v1199_v52 = vld [vmem:[%s6210_s11 + $0x6c] sm:$0xe] }
  0x6b   : > { %v1272_v4 = vsel %vm6543_vm7, %v5034_v28, %v1271_v63  ;;  %v1275_v14 = vsel %vm6543_vm7, %v1273_v41, %v1274_v37  ;;  %v5036_v1 = vrot.slane %v1196_v40, 9  ;;  %v1285_v2 = vrot.slane %v6467_v59, 5  ;;  %5668 = vmatmul.mubr.msk.bf16.vlgmr.msra.gmra.mxu0 %vm684_vm3, %v5048_v13  ;;  %v6647_v40 = vld [vmem:[%s8823_s1 + $0xa] sm:$0x3] }
  0x6c   : > { %v5050_v31 = vcombine.low %v1265_v30, %v1268_v42  ;;  %v1280_v56 = vrot.slane %v1278_v10, 4  ;;  %v5004_v39 = vcombine.low %v6457_v54, %v6467_v59  ;;  %v1288_v45 = vrot.slane %v6473_v49, 5  ;;  %5734 = vmatpush3.bf16.msra.mxu0 %v6252_v20  ;;  %5671 = vmatprep.mubr.msk.bf16.mxu0 %vm684_vm3, %v5049_v27  ;;  %v1200_v42 = vld [vmem:[%s6210_s11 + $0x78] sm:$0xe] }
  0x6d   : > { %v6631_v55 = vsel %vm6543_vm7, %v5035_v9, %v1278_v10  ;;  %v6635_v13 = vsel %vm6543_vm7, %v5036_v1, %v1285_v2  ;;  %v1287_v28 = vrot.slane %v1285_v2, 4  ;;  %v5037_v63 = vrot.slane %v1197_v60, 9  ;;  %5912 = vmatprep.subr.msk.bf16.mxu0 %vm733_vm0, %v6620_v50 }
  0x6e   : > { %v5051_v37 = vcombine.low %v1272_v4, %v1275_v14  ;;  %v6639_v61 = vsel %vm6543_vm7, %v1280_v56, %v1281_v11  ;;  %v1292_v49 = vrot.slane %v6505_v58, 5  ;;  %v1295_v20 = vrot.slane %v6508_v6, 5  ;;  %5634 = vmatmul.mubr.msk.bf16.vlgmr.msra.gmra.mxu1 %vm684_vm3, %v4999_v48  ;;  %v1201_v14 = vld [vmem:[%s6210_s11 + $0x84] sm:$0xe] }
  0x6f   : > { %v6657_v27 = vsel %vm6543_vm7, %v1287_v28, %v1288_v45  ;;  %v5005_v6 = vcombine.low %v6498_v23, %v6505_v58  ;;  %v5038_v30 = vrot.slane %v1198_v44, 9  ;;  %v1299_v41 = vrot.slane %v6245_v18, 5  ;;  %5700 = vmatpush3.bf16.msra.mxu1 %v6220_v7  ;;  %5637 = vmatprep.mubr.msk.bf16.mxu1 %vm684_vm3, %v5000_v36  ;;  %v8905_v28 = vld [vmem:[#allocation6_spill] sm:$0xff] }
  0x70   : > { %v5052_v33 = vcombine.low %v6631_v55, %v6639_v61  ;;  %v5053_v34 = vcombine.low %v6635_v13, %v6657_v27  ;;  %v1294_v48 = vrot.slane %v1292_v49, 4  ;;  %v6676_v7 = vsel %vm6543_vm7, %v5037_v63, %v1292_v49  ;;  %5911 = vmatprep.subr.msk.bf16.mxu1 %vm733_vm0, %v6647_v40  ;;  %v1202_v55 = vld [vmem:[%s6210_s11 + $0x90] sm:$0xe]  ;;  %v8906_v49 = vld [vmem:[#allocation7_spill] sm:$0xff]  ;;  %v6801_v27 = vld [vmem:[%s6210_s11 + $0x14] sm:$0x1] }
  0x71   : > { %v1301_v10 = vrot.slane %v1299_v41, 4  ;;  %v5039_v17 = vrot.slane %v1199_v52, 9  ;;  %v1306_v29 = vrot.slane %v6288_v62, 5  ;;  %v6687_v11 = vsel %vm6543_vm7, %v5038_v30, %v1299_v41  ;;  %v1203_v52 = vld [vmem:[%s6210_s11 + $0x9c] sm:$0xe] }
  0x72   : > { %v6683_v36 = vsel %vm6543_vm7, %v1294_v48, %v1295_v20  ;;  %v1309_v4 = vrot.slane %v6296_v3, 5  ;;  %v5040_v45 = vrot.slane %v1200_v42, 9  ;;  %v1313_v19 = vrot.slane %v6328_v53, 5  ;;  %v8907_v42 = vld [vmem:[#allocation9_spill] sm:$0xff] }
  0x73   : > { %v6697_v1 = vsel %vm6543_vm7, %v1301_v10, %v1302_v5  ;;  %v1308_v2 = vrot.slane %v1306_v29, 4  ;;  %5672 = vmatmul.mubr.msk.bf16.gmra.mxu0 %vm684_vm3, %v5050_v31  ;;  %v5054_v44 = vcombine.low %v6676_v7, %v6683_v36  ;;  %v6706_v3 = vsel %vm6543_vm7, %v5039_v17, %v1306_v29  ;;  %v8908_v10 = vld [vmem:[#allocation8_spill] sm:$0xff]  ;;  %v6866_v36 = vld [vmem:[%s6210_s11 + $0x28] sm:$0xf] }
  0x74   : > { %5675 = vmatprep.mubr.msk.bf16.mxu0 %vm684_vm3, %v5051_v37  ;;  %v1316_v63 = vrot.slane %v8905_v28, 5  ;;  %v5041_v61 = vrot.slane %v1201_v14, 9  ;;  %v1320_v31 = vrot.slane %v6369_v51, 5  ;;  %v1323_v20 = vrot.slane %v8906_v49, 5  ;;  %v8914_v37 = vld [vmem:[#allocation14_spill] sm:$0xff] }
  0x75   : > { %v5055_v30 = vcombine.low %v6687_v11, %v6697_v1  ;;  %v6721_v41 = vsel %vm6543_vm7, %v1308_v2, %v1309_v4  ;;  %v1315_v48 = vrot.slane %v1313_v19, 4  ;;  %v5042_v14 = vrot.slane %v1202_v55, 9  ;;  %v8911_v2 = vld [vmem:[#allocation11_spill] sm:$0xff] }
  0x76   : > { %5638 = vmatmul.mubr.msk.bf16.gmra.mxu1 %vm684_vm3, %v5001_v12  ;;  %v6731_v17 = vsel %vm6543_vm7, %v5041_v61, %v1320_v31  ;;  %v1322_v29 = vrot.slane %v1320_v31, 4  ;;  %v1327_v28 = vrot.slane %v8907_v42, 5  ;;  %v6740_v4 = vsel %vm6543_vm7, %v5040_v45, %v1313_v19  ;;  %v8910_v12 = vld [vmem:[#allocation12_spill] sm:$0xff]  ;;  %v1204_v55 = vld [vmem:[%s6210_s11 + $0xa8] sm:$0xe] }
  0x77   : > { %5641 = vmatprep.mubr.msk.bf16.mxu1 %vm684_vm3, %v5002_v38  ;;  %v1330_v25 = vrot.slane %v8909_v21, 5  ;;  %v5043_v31 = vrot.slane %v1203_v52, 9  ;;  %v6748_v49 = vsel %vm6543_vm7, %v1315_v48, %v1316_v63  ;;  %v1334_v19 = vrot.slane %v8910_v12, 5  ;;  %v8912_v52 = vld [vmem:[#allocation13_spill] sm:$0xff]  ;;  %v8913_v61 = vld [vmem:[#allocation15_spill] sm:$0xff] }
  0x78   : > { %v6752_v15 = vsel %vm6543_vm7, %v1322_v29, %v1323_v20  ;;  %v6756_v24 = vsel %vm6543_vm7, %v5042_v14, %v1327_v28  ;;  %v1329_v38 = vrot.slane %v1327_v28, 4  ;;  %v1337_v21 = vrot.slane %v8912_v52, 5  ;;  %v1205_v48 = vld [vmem:[%s6210_s11 + $0xb4] sm:$0xe]  ;;  %v6772_v45 = vld [vmem:[%s6210_s11 + $0xc] sm:$0xf] }
  0x79   : > { %v5044_v29 = vrot.slane %v1204_v55, 9  ;;  %v1341_v14 = vrot.slane %v8913_v61, 5  ;;  %v8915_v28 = vld [vmem:[#allocation16_spill] sm:$0xff]  ;;  %v6779_v63 = vsel %vm6543_vm7, %v5043_v31, %v1334_v19  ;;  %v1336_v56 = vrot.slane %v1334_v19, 4  ;;  %v6875_v11 = vld [vmem:[%s6210_s11 + $0x2c] sm:$0x1] }
  0x7a   : > { %v6767_v20 = vsel %vm6543_vm7, %v1329_v38, %v1330_v25  ;;  %v1344_v5 = vrot.slane %v8915_v28, 5  ;;  %v8916_v25 = vld [vmem:[#allocation17_spill] sm:$0xff]  ;;  %v5045_v28 = vrot.slane %v1205_v48, 9  ;;  %v1348_v52 = vrot.slane %v6522_v47, 5  ;;  %v6793_v31 = vld [vmem:[%s6210_s11 + $0x10] sm:$0xf] }
  0x7b   : > { %5676 = vmatmul.mubr.msk.bf16.gmra.mxu0 %vm684_vm3, %v5052_v33  ;;  %v6789_v33 = vsel %vm6543_vm7, %v5044_v29, %v1341_v14  ;;  %v1343_v38 = vrot.slane %v1341_v14, 4  ;;  %v6797_v19 = vsel %vm6543_vm7, %v1336_v56, %v1337_v21  ;;  %v1351_v13 = vrot.slane %v6530_v8, 5  ;;  %v6818_v14 = vld [vmem:[%s6210_s11 + $0x18] sm:$0xf]  ;;  %v6828_v56 = vld [vmem:[%s6210_s11 + $0x1c] sm:$0xf] }
  0x7c   : > { %5679 = vmatprep.mubr.msk.bf16.mxu0 %vm684_vm3, %v5053_v34  ;;  %v1731_v34 = vshrl.u32 %v6772_v45, 16  ;;  %v1734_v29 = vshll.u32 %v6772_v45, 16  ;;  %v1350_v21 = vrot.slane %v1348_v52, 4  ;;  %v1740_v55 = vshll.u32 %v6793_v31, 16 }
  0x7d   : > { %v6815_v8 = vsel %vm6543_vm7, %v1343_v38, %v1344_v5  ;;  %v5057_v5 = vcombine.low %v6740_v4, %v6748_v49  ;;  %v6834_v38 = vsel %vm6543_vm7, %v5045_v28, %v1348_v52  ;;  %v1744_v54 = vshrl.u32 %v6793_v31, 16 }
  0x7e   : > { %5642 = vmatmul.mubr.msk.bf16.gmra.mxu1 %vm684_vm3, %v5003_v0  ;;  %v1733_v32 = vrot.slane %v1731_v34, 4  ;;  %v1736_v0 = vrot.slane %v1734_v29, 5  ;;  %v1750_v59 = vshll.u32 %v6801_v27, 16  ;;  %v6843_v34 = vsel %vm6543_vm7, %v1350_v21, %v1351_v13 }
  0x7f   : > { %5645 = vmatprep.mubr.msk.bf16.mxu1 %vm684_vm3, %v5004_v39  ;;  %v6839_v39 = vld [vmem:[%s6210_s11 + $0x20] sm:$0x1]  ;;  %v1742_v26 = vrot.slane %v1740_v55, 5  ;;  %v1755_v60 = vshrl.u32 %v6818_v14, 16  ;;  %v1746_v4 = vrot.slane %v1744_v54, 4  ;;  %v1758_v52 = vshll.u32 %v6818_v14, 16 }
  0x80   : > { %v1737_v29 = vor.u32 %v1736_v0, %v1733_v32  ;;  %v1764_v28 = vshll.u32 %v6828_v56, 16  ;;  %v1768_v55 = vshrl.u32 %v6828_v56, 16  ;;  %v1774_v32 = vshll.u32 %v6839_v39, 16  ;;  %v6857_v0 = vld [vmem:[%s6210_s11 + $0x24] sm:$0xf] }
  0x81   : > { %v1757_v21 = vrot.slane %v1755_v60, 4  ;;  %v1747_v54 = vor.u32 %v1746_v4, %v1742_v26  ;;  %v1752_v49 = vrot.slane %v1750_v59, 5  ;;  %v1760_v48 = vrot.slane %v1758_v52, 5 }
  0x82   : > { %v1738_v13 = vrot.slane %v1737_v29, 4  ;;  %v6863_v7 = vrot.slane %v1764_v28, 5  ;;  %v1770_v29 = vrot.slane %v1768_v55, 4  ;;  %v1776_v59 = vrot.slane %v1774_v32, 5  ;;  %v6894_v55 = vld [vmem:[%s6210_s11 + $0x30] sm:$0xf] }
  0x83   : > { %5680 = vmatmul.mubr.msk.bf16.gmra.mxu0 %vm684_vm3, %v5054_v44  ;;  %v1748_v1 = vrot.slane %v1747_v54, 4  ;;  %v1779_v4 = vshrl.u32 %v6857_v0, 16  ;;  %v1782_v28 = vshll.u32 %v6857_v0, 16  ;;  %v1792_v23 = vshrl.u32 %v6866_v36, 16 }
  0x84   : > { %5683 = vmatprep.mubr.msk.bf16.mxu0 %vm684_vm3, %v5055_v30  ;;  %v1743_v44 = vsel %vm6267_vm4, %v1738_v13, %v1742_v26  ;;  %v1761_v30 = vor.u32 %v1760_v48, %v1757_v21  ;;  %v8917_v26 = vcombine.low %v6241_v16, %v6245_v18  ;;  %v1771_v52 = vor.u32 %v1770_v29, %v6863_v7  ;;  %v6905_v29 = vld [vmem:[%s6210_s11 + $0x34] sm:$0xf] }
  0x85   : > { %v1788_v13 = vshll.u32 %v6866_v36, 16  ;;  %v1753_v58 = vsel %vm6267_vm4, %v1748_v1, %v1752_v49  ;;  %v1781_v48 = vrot.slane %v1779_v4, 4  ;;  %v1798_v21 = vshll.u32 %v6875_v11, 16 }
  0x86   : > { %5646 = vmatmul.mubr.msk.bf16.gmra.mxu1 %vm684_vm3, %v5005_v6  ;;  %v1762_v6 = vrot.slane %v1761_v30, 4  ;;  %v6898_v16 = vsel %vm733_vm0, %v6647_v40, 0  ;;  %v6902_v18 = vsel %vm733_vm0, %v6620_v50, 0  ;;  %v1784_v32 = vrot.slane %v1782_v28, 5 }
  0x87   : > { %5649 = vmatprep.mubr.msk.bf16.mxu1 %vm684_vm3, %v8917_v26  ;;  %v1790_v54 = vrot.slane %v1788_v13, 5  ;;  %v6907_v49 = vcombine.low %v1743_v44, %v1753_v58  ;;  %v1772_v30 = vrot.slane %v1771_v52, 4  ;;  %v1794_v4 = vrot.slane %v1792_v23, 4  ;;  %v6913_v26 = vld [vmem:[%s6210_s11 + $0x38] sm:$0x1] }
  0x88   : > { %v1767_v1 = vsel %vm6267_vm4, %v1762_v6, %v6863_v7  ;;  %v8918_v40 = vcombine.low %v6706_v3, %v6721_v41  ;;  %v1785_v50 = vor.u32 %v1784_v32, %v1781_v48  ;;  %v1800_v28 = vrot.slane %v1798_v21, 5  ;;  %v6927_v3 = vld [vmem:[%s6210_s11 + $0x3c] sm:$0xf]  ;;  %v6931_v32 = vld [vmem:[%s6210_s11 + $0x40] sm:$0xf] }
  0x89   : > { %v1803_v13 = vshrl.u32 %v6894_v55, 16  ;;  %v1806_v44 = vshll.u32 %v6894_v55, 16  ;;  %v1795_v58 = vor.u32 %v1794_v4, %v1790_v54  ;;  %v1812_v52 = vshll.u32 %v6905_v29, 16 }
  0x8a   : > { %v1816_v23 = vshrl.u32 %v6905_v29, 16  ;;  %v1786_v41 = vrot.slane %v1785_v50, 4  ;;  %v1822_v21 = vshll.u32 %v6913_v26, 16  ;;  %v1777_v4 = vsel %vm6267_vm4, %v1772_v30, %v1776_v59 }
  0x8b   : > { %5684 = vmatmul.mubr.msk.bf16.gmra.mxu0 %vm684_vm3, %v8918_v40  ;;  %v1805_v6 = vrot.slane %v1803_v13, 4  ;;  %v1808_v48 = vrot.slane %v1806_v44, 5  ;;  %v1796_v40 = vrot.slane %v1795_v58, 4  ;;  %v1814_v7 = vrot.slane %v1812_v52, 5 }
  0x8c   : > { %5687 = vmatprep.mubr.msk.bf16.mxu0 %vm684_vm3, %v5057_v5  ;;  %v8919_v5 = vcombine.low %v6284_v57, %v6288_v62  ;;  %v1818_v9 = vrot.slane %v1816_v23, 4  ;;  %v8920_v50 = vcombine.low %v6322_v43, %v6328_v53  ;;  %v1791_v13 = vsel %vm6267_vm4, %v1786_v41, %v1790_v54  ;;  %v6946_v57 = vld [vmem:[%s6210_s11 + $0x44] sm:$0x1]  ;;  %v6954_v53 = vld [vmem:[%s6210_s11 + $0x48] sm:$0xf] }
  0x8d   : > { %v1809_v44 = vor.u32 %v1808_v48, %v1805_v6  ;;  %v1824_v60 = vrot.slane %v1822_v21, 5  ;;  %v1827_v62 = vshrl.u32 %v6927_v3, 16  ;;  %v1801_v59 = vsel %vm6267_vm4, %v1796_v40, %v1800_v28 }
  0x8e   : > { %5650 = vmatmul.mubr.msk.bf16.gmra.mxu1 %vm684_vm3, %v8919_v5  ;;  %v1819_v30 = vor.u32 %v1818_v9, %v1814_v7  ;;  %v1830_v58 = vshll.u32 %v6927_v3, 16  ;;  %v1836_v43 = vshll.u32 %v6931_v32, 16  ;;  %v6956_v52 = vcombine.low %v1767_v1, %v1777_v4  ;;  %v6961_v9 = vld [vmem:[%s6210_s11 + $0x4c] sm:$0xf] }
  0x8f   : > { %5653 = vmatprep.mubr.msk.bf16.mxu1 %vm684_vm3, %v8920_v50  ;;  %v1810_v54 = vrot.slane %v1809_v44, 4  ;;  %v1829_v23 = vrot.slane %v1827_v62, 4  ;;  %v1840_v41 = vshrl.u32 %v6931_v32, 16  ;;  %v1846_v28 = vshll.u32 %v6946_v57, 16  ;;  %v6972_v50 = vld [vmem:[%s6210_s11 + $0x50] sm:$0x1] }
  0x90   : > { %v1820_v6 = vrot.slane %v1819_v30, 4  ;;  %v1832_v48 = vrot.slane %v1830_v58, 5  ;;  %v1838_v21 = vrot.slane %v1836_v43, 5  ;;  %v8921_v5 = vcombine.low %v6731_v17, %v6752_v15  ;;  %v6985_v30 = vld [vmem:[%s6210_s11 + $0x54] sm:$0xf] }
  0x91   : > { %v6967_v40 = vcombine.low %v1791_v13, %v1801_v59  ;;  %v1842_v4 = vrot.slane %v1840_v41, 4  ;;  %v1851_v44 = vshrl.u32 %v6954_v53, 16  ;;  %v8922_v62 = vcombine.low %v6756_v24, %v6767_v20 }
  0x92   : > { %v1815_v17 = vsel %vm6267_vm4, %v1810_v54, %v1814_v7  ;;  %v1825_v15 = vsel %vm6267_vm4, %v1820_v6, %v1824_v60  ;;  %v1833_v13 = vor.u32 %v1832_v48, %v1829_v23  ;;  %v1854_v59 = vshll.u32 %v6954_v53, 16  ;;  %v6995_v23 = vld [vmem:[%s6210_s11 + $0x58] sm:$0xf] }
  0x93   : > { %5688 = vmatmul.mubr.msk.bf16.gmra.mxu0 %vm684_vm3, %v8921_v5  ;;  %v1843_v58 = vor.u32 %v1842_v4, %v1838_v21  ;;  %v1848_v43 = vrot.slane %v1846_v28, 5  ;;  %v1853_v41 = vrot.slane %v1851_v44, 4  ;;  %v1860_v5 = vshll.u32 %v6961_v9, 16  ;;  %8924 = vst [vmem:[#allocation6_spill] sm:$0xff] %v6995_v23 }
  0x94   : > { %5691 = vmatprep.mubr.msk.bf16.mxu0 %vm684_vm3, %v8922_v62  ;;  %v8923_v24 = vcombine.low %v6362_v46, %v6369_v51  ;;  %v1834_v20 = vrot.slane %v1833_v13, 4  ;;  %v1856_v7 = vrot.slane %v1854_v59, 5  ;;  %v1864_v60 = vshrl.u32 %v6961_v9, 16  ;;  %v7009_v59 = vld [vmem:[%s6210_s11 + $0x5c] sm:$0x1] }
  0x95   : > { %v1870_v54 = vshll.u32 %v6972_v50, 16  ;;  %v8925_v6 = vcombine.low %v8908_v10, %v8907_v42  ;;  %v1844_v48 = vrot.slane %v1843_v58, 4  ;;  %v1862_v51 = vrot.slane %v1860_v5, 5  ;;  %8926 = vst [vmem:[#allocation7_spill] sm:$0xff] %v7009_v59 }
  0x96   : > { %5654 = vmatmul.mubr.msk.bf16.gmra.mxu1 %vm684_vm3, %v8923_v24  ;;  %v1875_v28 = vshrl.u32 %v6985_v30, 16  ;;  %v7004_v4 = vcombine.low %v1815_v17, %v1825_v15  ;;  %v1839_v44 = vsel %vm6267_vm4, %v1834_v20, %v1838_v21  ;;  %v1857_v62 = vor.u32 %v1856_v7, %v1853_v41  ;;  %v7016_v24 = vld [vmem:[%s6210_s11 + $0x60] sm:$0xf]  ;;  %v7022_v41 = vld [vmem:[%s6210_s11 + $0x64] sm:$0xf] }
  0x97   : > { %5657 = vmatprep.mubr.msk.bf16.mxu1 %vm684_vm3, %v8925_v6  ;;  %v1866_v13 = vrot.slane %v1864_v60, 4  ;;  %v1849_v42 = vsel %vm6267_vm4, %v1844_v48, %v1848_v43  ;;  %v1878_v58 = vshll.u32 %v6985_v30, 16  ;;  %v1884_v5 = vshll.u32 %v6995_v23, 16 }
  0x98   : > { %v1877_v10 = vrot.slane %v1875_v28, 4  ;;  %v1872_v17 = vrot.slane %v1870_v54, 5  ;;  %v1888_v15 = vshrl.u32 %v6995_v23, 16  ;;  %v8927_v43 = vcombine.low %v6779_v63, %v6797_v19 }
  0x99   : > { %v1867_v6 = vor.u32 %v1866_v13, %v1862_v51  ;;  %v1858_v20 = vrot.slane %v1857_v62, 4  ;;  %v1880_v7 = vrot.slane %v1878_v58, 5  ;;  %v1886_v60 = vrot.slane %v1884_v5, 5  ;;  %v7039_v62 = vld [vmem:[%s6210_s11 + $0x68] sm:$0x1] }
  0x9a   : > { %v1894_v48 = vshll.u32 %v7009_v59, 16  ;;  %v8928_v54 = vcombine.low %v6789_v33, %v6815_v8  ;;  %v7033_v28 = vcombine.low %v1839_v44, %v1849_v42  ;;  %v1890_v21 = vrot.slane %v1888_v15, 4  ;;  %8929 = vst [vmem:[#allocation9_spill] sm:$0xff] %v7039_v62  ;;  %v5127_v59 = vld [vmem:[%s6210_s11 + $0xc8] sm:$0x1] }
  0x9b   : > { %5692 = vmatmul.mubr.msk.bf16.gmra.mxu0 %vm684_vm3, %v8927_v43  ;;  %v1868_v13 = vrot.slane %v1867_v6, 4  ;;  %v1899_v46 = vshrl.u32 %v7016_v24, 16  ;;  %v1881_v63 = vor.u32 %v1880_v7, %v1877_v10  ;;  %v1902_v58 = vshll.u32 %v7016_v24, 16  ;;  %v7049_v6 = vld [vmem:[%s6210_s11 + $0x6c] sm:$0xf] }
  0x9c   : > { %5695 = vmatprep.mubr.msk.bf16.mxu0 %vm684_vm3, %v8928_v54  ;;  %v1908_v33 = vshll.u32 %v7022_v41, 16  ;;  %v8930_v8 = vcombine.low %v8911_v2, %v8910_v12  ;;  %v1891_v44 = vor.u32 %v1890_v21, %v1886_v60  ;;  %v1896_v42 = vrot.slane %v1894_v48, 5  ;;  %v7058_v21 = vld [vmem:[%s6210_s11 + $0x70] sm:$0xf] }
  0x9d   : > { %v1901_v5 = vrot.slane %v1899_v46, 4  ;;  %v1912_v10 = vshrl.u32 %v7022_v41, 16  ;;  %v8931_v15 = vcombine.low %v8914_v37, %v8913_v61  ;;  %v1863_v43 = vsel %vm6267_vm4, %v1858_v20, %v1862_v51 }
  0x9e   : > { %5658 = vmatmul.mubr.msk.bf16.gmra.mxu1 %vm684_vm3, %v8930_v8  ;;  %v1882_v7 = vrot.slane %v1881_v63, 4  ;;  %v1904_v12 = vrot.slane %v1902_v58, 5  ;;  %v1910_v2 = vrot.slane %v1908_v33, 5  ;;  %v1873_v46 = vsel %vm6267_vm4, %v1868_v13, %v1872_v17  ;;  %v7074_v13 = vld [vmem:[%s6210_s11 + $0x78] sm:$0xf] }
  0x9f   : > { %5661 = vmatprep.mubr.msk.bf16.mxu1 %vm684_vm3, %v8931_v15  ;;  %v1892_v48 = vrot.slane %v1891_v44, 4  ;;  %v1914_v54 = vrot.slane %v1912_v10, 4  ;;  %v1918_v8 = vshll.u32 %v7039_v62, 16  ;;  %v1923_v51 = vshrl.u32 %v7049_v6, 16  ;;  %v7070_v15 = vld [vmem:[%s6210_s11 + $0x74] sm:$0x1] }
  0xa0   : > { %v1887_v37 = vsel %vm6267_vm4, %v1882_v7, %v1886_v60  ;;  %v1905_v61 = vor.u32 %v1904_v12, %v1901_v5  ;;  %v1926_v20 = vshll.u32 %v7049_v6, 16  ;;  %8932 = vst [vmem:[#allocation8_spill] sm:$0xff] %v7070_v15  ;;  %v1932_v17 = vshll.u32 %v7058_v21, 16 }
  0xa1   : > { %v1897_v63 = vsel %vm6267_vm4, %v1892_v48, %v1896_v42  ;;  %v1915_v58 = vor.u32 %v1914_v54, %v1910_v2  ;;  %v1920_v33 = vrot.slane %v1918_v8, 5  ;;  %v8933_v60 = vcombine.low %v6834_v38, %v6843_v34  ;;  %v7092_v34 = vld [vmem:[%s6210_s11 + $0x7c] sm:$0xf]  ;;  %v7134_v48 = vld [vmem:[%s6210_s11 + $0x90] sm:$0xf] }
  0xa2   : > { %v7080_v44 = vcombine.low %v1863_v43, %v1873_v46  ;;  %v1906_v5 = vrot.slane %v1905_v61, 4  ;;  %v1925_v10 = vrot.slane %v1923_v51, 4  ;;  %v1928_v42 = vrot.slane %v1926_v20, 5  ;;  %v7098_v61 = vld [vmem:[%s6210_s11 + $0x80] sm:$0x1] }
  0xa3   : > { %5696 = vmatmul.mubr.msk.bf16.gmra.mxu0 %vm684_vm3, %v8933_v60  ;;  %v8934_v7 = vcombine.low %v6772_v45, %v6793_v31  ;;  %v1916_v12 = vrot.slane %v1915_v58, 4  ;;  %v7088_v54 = vrot.slane %v1932_v17, 5  ;;  %v1936_v38 = vshrl.u32 %v7058_v21, 16  ;;  %8935 = vst [vmem:[#allocation10_spill] sm:$0xff] %v7098_v61  ;;  %v7111_v17 = vld [vmem:[%s6210_s11 + $0x84] sm:$0xf] }
  0xa4   : > { %v7094_v43 = vcombine.low %v1887_v37, %v1897_v63  ;;  %v1929_v46 = vor.u32 %v1928_v42, %v1925_v10  ;;  %v1942_v8 = vshll.u32 %v7070_v15, 16  ;;  %v1947_v45 = vshrl.u32 %v7074_v13, 16 }
  0xa5   : > { %5735 = vmatprep.mubr.msk.bf16.mxu0 %vm684_vm3, %v8934_v7  ;;  %v8936_v51 = vcombine.low %v8916_v25, %v6522_v47  ;;  %v1911_v20 = vsel %vm6267_vm4, %v1906_v5, %v1910_v2  ;;  %v1921_v37 = vsel %vm6267_vm4, %v1916_v12, %v1920_v33  ;;  %v1938_v63 = vrot.slane %v1936_v38, 4  ;;  %v7122_v7 = vld [vmem:[%s6210_s11 + $0x88] sm:$0xf] }
  0xa6   : > { %v1950_v58 = vshll.u32 %v7074_v13, 16  ;;  %v1930_v60 = vrot.slane %v1929_v46, 4  ;;  %v1949_v25 = vrot.slane %v1947_v45, 4  ;;  %v1956_v2 = vshll.u32 %v7092_v34, 16  ;;  %v7127_v46 = vld [vmem:[%s6210_s11 + $0x8c] sm:$0x1] }
  0xa7   : > { %5662 = vmatmul.mubr.msk.bf16.gmra.mxu1 %vm684_vm3, %v8936_v51  ;;  %v1939_v5 = vor.u32 %v1938_v63, %v7088_v54  ;;  %v1960_v10 = vshrl.u32 %v7092_v34, 16  ;;  %v1966_v42 = vshll.u32 %v7098_v61, 16  ;;  %v7124_v12 = vcombine.low %v1911_v20, %v1921_v37  ;;  %8937 = vst [vmem:[#allocation12_spill] sm:$0xff] %v7127_v46  ;;  %v7139_v20 = vld [vmem:[%s8823_s1 + $0x10] sm:$0x3] }
  0xa8   : > { %5701 = vmatprep.mubr.msk.bf16.mxu1 %vm684_vm3, %v6907_v49  ;;  %v1952_v33 = vrot.slane %v1950_v58, 5  ;;  %v1944_v49 = vrot.slane %v1942_v8, 5  ;;  %v1958_v38 = vrot.slane %v1956_v2, 5  ;;  %v1971_v45 = vshrl.u32 %v7111_v17, 16 }
  0xa9   : > { %v1935_v51 = vsel %vm6267_vm4, %v1930_v60, %v7088_v54  ;;  %v1940_v63 = vrot.slane %v1939_v5, 4  ;;  %v1962_v47 = vrot.slane %v1960_v10, 4  ;;  %v8938_v8 = vcombine.low %v6818_v14, %v6828_v56 }
  0xaa   : > { %v1953_v58 = vor.u32 %v1952_v33, %v1949_v25  ;;  %v1973_v37 = vrot.slane %v1971_v45, 4  ;;  %v1974_v2 = vshll.u32 %v7111_v17, 16  ;;  %v1980_v54 = vshll.u32 %v7122_v7, 16  ;;  %v7149_v25 = vld [vmem:[%s6210_s11 + $0x94] sm:$0xf] }
  0xab   : > { %5736 = vmatmul.mubr.msk.bf16.vlgmr.msra.gmra.mxu0 %vm684_vm3, %v8938_v8  ;;  %v1984_v60 = vshrl.u32 %v7122_v7, 16  ;;  %v8939_v5 = vcombine.low %v6857_v0, %v6866_v36  ;;  %v1963_v14 = vor.u32 %v1962_v47, %v1958_v38  ;;  %v1968_v10 = vrot.slane %v1966_v42, 5  ;;  %v7158_v8 = vld [vmem:[%s6210_s11 + $0x98] sm:$0x1] }
  0xac   : > { %5802 = vmatpush3.bf16.msra.mxu0 %v6902_v18  ;;  %v1954_v33 = vrot.slane %v1953_v58, 4  ;;  %v1990_v45 = vshll.u32 %v7127_v46, 16  ;;  %8940 = vst [vmem:[#allocation11_spill] sm:$0xff] %v7158_v8  ;;  %v1976_v1 = vrot.slane %v1974_v2, 5  ;;  %v1982_v61 = vrot.slane %v1980_v54, 5 }
  0xad   : > { %5739 = vmatprep.mubr.msk.bf16.mxu0 %vm684_vm3, %v8939_v5  ;;  %v1986_v15 = vrot.slane %v1984_v60, 4  ;;  %v7165_v18 = vld [vmem:[%s8823_s1 + $0xc] sm:$0x3]  ;;  %5914 = vmatprep.subr.msk.bf16.mxu0 %vm733_vm0, %v7139_v20  ;;  %v1945_v0 = vsel %vm6267_vm4, %v1940_v63, %v1944_v49  ;;  %v1964_v42 = vrot.slane %v1963_v14, 4  ;;  %v1995_v60 = vshrl.u32 %v7134_v48, 16 }
  0xae   : > { %v1959_v47 = vsel %vm6267_vm4, %v1954_v33, %v1958_v38  ;;  %v1992_v58 = vrot.slane %v1990_v45, 5  ;;  %v1977_v2 = vor.u32 %v1976_v1, %v1973_v37  ;;  %v2004_v63 = vshll.u32 %v7149_v25, 16  ;;  %v5126_v46 = vld [vmem:[%s6210_s11 + $0xbc] sm:$0x1] }
  0xaf   : > { %5702 = vmatmul.mubr.msk.bf16.vlgmr.msra.gmra.mxu1 %vm684_vm3, %v6956_v52  ;;  %v1987_v54 = vor.u32 %v1986_v15, %v1982_v61  ;;  %v1998_v52 = vshll.u32 %v7134_v48, 16  ;;  %v1969_v49 = vsel %vm6267_vm4, %v1964_v42, %v1968_v10  ;;  %v2008_v38 = vshrl.u32 %v7149_v25, 16  ;;  %v7195_v42 = vld [vmem:[%s6210_s11 + $0xa0] sm:$0xf] }
  0xb0   : > { %5768 = vmatpush3.bf16.msra.mxu1 %v6898_v16  ;;  %5705 = vmatprep.mubr.msk.bf16.mxu1 %vm684_vm3, %v6967_v40  ;;  %v2014_v5 = vshll.u32 %v7158_v8, 16  ;;  %v7186_v16 = vld [vmem:[%s6210_s11 + $0x9c] sm:$0xf]  ;;  %v7190_v40 = vcombine.low %v1935_v51, %v1945_v0  ;;  %v1978_v1 = vrot.slane %v1977_v2, 4  ;;  %v1997_v37 = vrot.slane %v1995_v60, 4 }
  0xb1   : > { %5913 = vmatprep.subr.msk.bf16.mxu1 %vm733_vm0, %v7165_v18  ;;  %v1988_v15 = vrot.slane %v1987_v54, 4  ;;  %v2000_v14 = vrot.slane %v1998_v52, 5  ;;  %v2006_v10 = vrot.slane %v2004_v63, 5  ;;  %v2010_v45 = vrot.slane %v2008_v38, 4 }
  0xb2   : > { %v8941_v19 = vcombine.low %v6894_v55, %v6905_v29  ;;  %v7201_v51 = vcombine.low %v1959_v47, %v1969_v49  ;;  %v1983_v0 = vsel %vm6267_vm4, %v1978_v1, %v1982_v61  ;;  %v2019_v54 = vshrl.u32 %v7186_v16, 16  ;;  %v7217_v61 = vld [vmem:[%s6210_s11 + $0xa8] sm:$0xf] }
  0xb3   : > { %v1993_v2 = vsel %vm6267_vm4, %v1988_v15, %v1992_v58  ;;  %v8942_v60 = vcombine.low %v6927_v3, %v6931_v32  ;;  %v2001_v52 = vor.u32 %v2000_v14, %v1997_v37  ;;  %v2011_v55 = vor.u32 %v2010_v45, %v2006_v10  ;;  %v7228_v14 = vld [vmem:[%s6210_s11 + $0xac] sm:$0xf]  ;;  %v7234_v58 = vld [vmem:[%s6210_s11 + $0xb0] sm:$0x1] }
  0xb4   : > { %5740 = vmatmul.mubr.msk.bf16.gmra.mxu0 %vm684_vm3, %v8941_v19  ;;  %v2016_v63 = vrot.slane %v2014_v5, 5  ;;  %v7213_v19 = vld [vmem:[%s6210_s11 + $0xa4] sm:$0x1]  ;;  %v2022_v47 = vshll.u32 %v7186_v16, 16  ;;  %v2021_v49 = vrot.slane %v2019_v54, 4  ;;  %v2028_v38 = vshll.u32 %v7195_v42, 16 }
  0xb5   : > { %5743 = vmatprep.mubr.msk.bf16.mxu0 %vm684_vm3, %v8942_v60  ;;  %8943 = vst [vmem:[#allocation13_spill] sm:$0xff] %v7213_v19  ;;  %v2032_v3 = vshrl.u32 %v7195_v42, 16  ;;  %v7225_v5 = vcombine.low %v1983_v0, %v1993_v2  ;;  %v2002_v1 = vrot.slane %v2001_v52, 4  ;;  %v2012_v15 = vrot.slane %v2011_v55, 4  ;;  %8944 = vst [vmem:[#allocation15_spill] sm:$0xff] %v7234_v58 }
  0xb6   : > { %v2024_v37 = vrot.slane %v2022_v47, 5  ;;  %v2030_v45 = vrot.slane %v2028_v38, 5  ;;  %v2038_v60 = vshll.u32 %v7213_v19, 16  ;;  %v2046_v55 = vshll.u32 %v7217_v61, 16  ;;  %v7243_v47 = vld [vmem:[%s6210_s11 + $0xb4] sm:$0xf] }
  0xb7   : > { %5706 = vmatmul.mubr.msk.bf16.gmra.mxu1 %vm684_vm3, %v7004_v4  ;;  %v2034_v54 = vrot.slane %v2032_v3, 4  ;;  %v2043_v4 = vshrl.u32 %v7217_v61, 16  ;;  %v2007_v0 = vsel %vm6267_vm4, %v2002_v1, %v2006_v10  ;;  %v2052_v33 = vshll.u32 %v7228_v14, 16  ;;  %v7251_v1 = vld [vmem:[%s6210_s11 + $0xb8] sm:$0xf] }
  0xb8   : > { %5709 = vmatprep.mubr.msk.bf16.mxu1 %vm684_vm3, %v7033_v28  ;;  %v2025_v2 = vor.u32 %v2024_v37, %v2021_v49  ;;  %v2017_v28 = vsel %vm6267_vm4, %v2012_v15, %v2016_v63  ;;  %v2048_v8 = vrot.slane %v2046_v55, 5  ;;  %v2056_v10 = vshrl.u32 %v7228_v14, 16 }
  0xb9   : > { %v2035_v38 = vor.u32 %v2034_v54, %v2030_v45  ;;  %v2045_v3 = vrot.slane %v2043_v4, 4  ;;  %v2062_v49 = vshll.u32 %v7234_v58, 16  ;;  %v8945_v37 = vcombine.low %v6954_v53, %v6961_v9 }
  0xba   : > { %v2026_v19 = vrot.slane %v2025_v2, 4  ;;  %v2040_v15 = vrot.slane %v2038_v60, 5  ;;  %v2054_v54 = vrot.slane %v2052_v33, 5  ;;  %v2067_v4 = vshrl.u32 %v7243_v47, 16 }
  0xbb   : > { %v2036_v63 = vrot.slane %v2035_v38, 4  ;;  %v8946_v2 = vcombine.low %v6985_v30, %v6995_v23  ;;  %v7262_v55 = vcombine.low %v2007_v0, %v2017_v28  ;;  %v2049_v52 = vor.u32 %v2048_v8, %v2045_v3  ;;  %v7272_v30 = vld [vmem:[%s6210_s11 + $0xc0] sm:$0xf] }
  0xbc   : > { %5744 = vmatmul.mubr.msk.bf16.gmra.mxu0 %vm684_vm3, %v8945_v37  ;;  %v2058_v58 = vrot.slane %v2056_v10, 4  ;;  %v2031_v60 = vsel %vm6267_vm4, %v2026_v19, %v2030_v45  ;;  %v2069_v33 = vrot.slane %v2067_v4, 4  ;;  %v2070_v38 = vshll.u32 %v7243_v47, 16  ;;  %v7278_v10 = vld [vmem:[%s6210_s11 + $0xc4] sm:$0xf] }
  0xbd   : > { %5747 = vmatprep.mubr.msk.bf16.mxu0 %vm684_vm3, %v8946_v2  ;;  %v2076_v37 = vshll.u32 %v7251_v1, 16  ;;  %v2050_v0 = vrot.slane %v2049_v52, 4  ;;  %v2064_v28 = vrot.slane %v2062_v49, 5  ;;  %v2080_v3 = vshrl.u32 %v7251_v1, 16 }
  0xbe   : > { %v2059_v8 = vor.u32 %v2058_v58, %v2054_v54  ;;  %v2041_v19 = vsel %vm6267_vm4, %v2036_v63, %v2040_v15  ;;  %v2072_v45 = vrot.slane %v2070_v38, 5  ;;  %v2086_v2 = vshll.u32 %v5126_v46, 16 }
  0xbf   : > { %5710 = vmatmul.mubr.msk.bf16.gmra.mxu1 %vm684_vm3, %v7080_v44  ;;  %v2078_v4 = vrot.slane %v2076_v37, 5  ;;  %v2055_v44 = vsel %vm6267_vm4, %v2050_v0, %v2054_v54  ;;  %v2082_v58 = vrot.slane %v2080_v3, 4  ;;  %v2091_v49 = vshrl.u32 %v7272_v30, 16  ;;  %v5193_v54 = vld [vmem:[%s6210_s11 + $0xc] sm:$0xe] }
  0xc0   : > { %5713 = vmatprep.mubr.msk.bf16.mxu1 %vm684_vm3, %v7094_v43  ;;  %v2060_v52 = vrot.slane %v2059_v8, 4  ;;  %v2073_v53 = vor.u32 %v2072_v45, %v2069_v33  ;;  %v2088_v62 = vrot.slane %v2086_v2, 5  ;;  %v2094_v23 = vshll.u32 %v7272_v30, 16 }
  0xc1   : > { %v2100_v43 = vshll.u32 %v7278_v10, 16  ;;  %v2083_v15 = vor.u32 %v2082_v58, %v2078_v4  ;;  %v2093_v38 = vrot.slane %v2091_v49, 4  ;;  %v2104_v46 = vshrl.u32 %v7278_v10, 16  ;;  %v5259_v49 = vld [vmem:[%s6210_s11 + $0x1c] sm:$0xf] }
  0xc2   : > { %v2065_v63 = vsel %vm6267_vm4, %v2060_v52, %v2064_v28  ;;  %v8947_v37 = vcombine.low %v7016_v24, %v7022_v41  ;;  %v7298_v33 = vcombine.low %v2031_v60, %v2041_v19  ;;  %v2074_v0 = vrot.slane %v2073_v53, 4  ;;  %v5258_v53 = vld [vmem:[%s6210_s11 + $0x18] sm:$0xf] }
  0xc3   : > { %v2096_v8 = vrot.slane %v2094_v23, 5  ;;  %v7300_v3 = vrot.slane %v2100_v43, 5  ;;  %v8948_v28 = vcombine.low %v7049_v6, %v7058_v21  ;;  %v2084_v45 = vrot.slane %v2083_v15, 4 }
  0xc4   : > { %5748 = vmatmul.mubr.msk.bf16.gmra.mxu0 %vm684_vm3, %v8947_v37  ;;  %v5175_v2 = vcombine.low %v7243_v47, %v7251_v1  ;;  %v2106_v24 = vrot.slane %v2104_v46, 4  ;;  %v2110_v52 = vshll.u32 %v5127_v59, 16  ;;  %v7308_v58 = vcombine.low %v2055_v44, %v2065_v63  ;;  %v5291_v44 = vld [vmem:[%s6210_s11 + $0x20] sm:$0x1]  ;;  %v7469_v1 = vld [vmem:[%s6210_s11 + $0x48] sm:$0xf] }
  0xc5   : > { %5751 = vmatprep.mubr.msk.bf16.mxu0 %vm684_vm3, %v8948_v28  ;;  %v2097_v60 = vor.u32 %v2096_v8, %v2093_v38  ;;  %v5209_v19 = vrot.slane %v5193_v54, 9  ;;  %v2718_v23 = vrot.slane %v6793_v31, 5  ;;  %v2079_v6 = vsel %vm6267_vm4, %v2074_v0, %v2078_v4  ;;  %v5194_v8 = vld [vmem:[%s6210_s11 + $0x18] sm:$0xe] }
  0xc6   : > { %v2089_v43 = vsel %vm6267_vm4, %v2084_v45, %v2088_v62  ;;  %v2107_v15 = vor.u32 %v2106_v24, %v7300_v3  ;;  %v2721_v59 = vrot.slane %v6801_v27, 5  ;;  %v2112_v63 = vrot.slane %v2110_v52, 5 }
  0xc7   : > { %5714 = vmatmul.mubr.msk.bf16.gmra.mxu1 %vm684_vm3, %v7124_v12  ;;  %v2098_v31 = vrot.slane %v2097_v60, 4  ;;  %v5176_v12 = vcombine.low %v7272_v30, %v7278_v10  ;;  %v2720_v4 = vrot.slane %v2718_v23, 4  ;;  %v3270_v46 = vshrl.u32 %v5258_v53, 16  ;;  %v5260_v60 = vld [vmem:[%s6210_s11 + $0x24] sm:$0xf] }
  0xc8   : > { %5717 = vmatprep.mubr.msk.bf16.mxu1 %vm684_vm3, %v7190_v40  ;;  %v2108_v38 = vrot.slane %v2107_v15, 4  ;;  %v3273_v62 = vshll.u32 %v5258_v53, 16  ;;  %v3279_v54 = vshll.u32 %v5259_v49, 16  ;;  %v7326_v37 = vcombine.low %v2079_v6, %v2089_v43  ;;  %v5261_v53 = vld [vmem:[%s6210_s11 + $0x28] sm:$0xf] }
  0xc9   : > { %v7330_v27 = vsel %vm6543_vm7, %v5209_v19, %v2718_v23  ;;  %v3283_v0 = vshrl.u32 %v5259_v49, 16  ;;  %v3289_v40 = vshll.u32 %v5291_v44, 16  ;;  %v2103_v28 = vsel %vm6267_vm4, %v2098_v31, %v7300_v3 }
  0xca   : > { %v7338_v45 = vsel %vm6543_vm7, %v2720_v4, %v2721_v59  ;;  %v3272_v24 = vrot.slane %v3270_v46, 4  ;;  %v3275_v52 = vrot.slane %v3273_v62, 5  ;;  %v8949_v19 = vcombine.low %v7074_v13, %v7092_v34  ;;  %v7355_v4 = vld [vmem:[%s6210_s11 + $0x2c] sm:$0x1] }
  0xcb   : > { %v2113_v23 = vsel %vm6267_vm4, %v2108_v38, %v2112_v63  ;;  %v3281_v49 = vrot.slane %v3279_v54, 5  ;;  %v3285_v6 = vrot.slane %v3283_v0, 4  ;;  %v3291_v3 = vrot.slane %v3289_v40, 5 }
  0xcc   : > { %5752 = vmatmul.mubr.msk.bf16.gmra.mxu0 %vm684_vm3, %v8949_v19  ;;  %v8950_v43 = vcombine.low %v7111_v17, %v7122_v7  ;;  %v3276_v15 = vor.u32 %v3275_v52, %v3272_v24  ;;  %v5210_v59 = vrot.slane %v5194_v8, 9  ;;  %v2725_v44 = vrot.slane %v6828_v56, 5  ;;  %v5195_v19 = vld [vmem:[%s6210_s11 + $0x24] sm:$0xe] }
  0xcd   : > { %v2728_v31 = vrot.slane %v6839_v39, 5  ;;  %v3286_v13 = vor.u32 %v3285_v6, %v3281_v49  ;;  %v3294_v46 = vshrl.u32 %v5260_v60, 16  ;;  %v3297_v62 = vshll.u32 %v5260_v60, 16 }
  0xce   : > { %5755 = vmatprep.mubr.msk.bf16.mxu0 %vm684_vm3, %v8950_v43  ;;  %v3303_v63 = vshll.u32 %v5261_v53, 16  ;;  %v3277_v38 = vrot.slane %v3276_v15, 4  ;;  %v7361_v17 = vsel %vm6543_vm7, %v5210_v59, %v2725_v44  ;;  %v2727_v54 = vrot.slane %v2725_v44, 4  ;;  %v7380_v15 = vld [vmem:[%s6210_s11 + $0x30] sm:$0xf] }
  0xcf   : > { %5718 = vmatmul.mubr.msk.bf16.gmra.mxu1 %vm684_vm3, %v7201_v51  ;;  %v3307_v56 = vshrl.u32 %v5261_v53, 16  ;;  %v3287_v39 = vrot.slane %v3286_v13, 4  ;;  %v3296_v0 = vrot.slane %v3294_v46, 4  ;;  %v3299_v40 = vrot.slane %v3297_v62, 5 }
  0xd0   : > { %5721 = vmatprep.mubr.msk.bf16.mxu1 %vm684_vm3, %v7225_v5  ;;  %v3305_v8 = vrot.slane %v3303_v63, 5  ;;  %v3282_v24 = vsel %vm6267_vm4, %v3277_v38, %v3281_v49  ;;  %v7369_v51 = vsel %vm6543_vm7, %v2727_v54, %v2728_v31  ;;  %v3313_v60 = vshll.u32 %v7355_v4, 16  ;;  %v7688_v31 = vld [vmem:[%s6210_s11 + $0x8c] sm:$0x1] }
  0xd1   : > { %v3309_v52 = vrot.slane %v3307_v56, 4  ;;  %v7373_v53 = vcombine.low %v2103_v28, %v2113_v23  ;;  %v5226_v5 = vcombine.low %v7330_v27, %v7338_v45  ;;  %v3292_v6 = vsel %vm6267_vm4, %v3287_v39, %v3291_v3  ;;  %v7388_v28 = vld [vmem:[%s6210_s11 + $0x34] sm:$0xf]  ;;  %v7401_v56 = vld [vmem:[%s6210_s11 + $0x38] sm:$0x1] }
  0xd2   : > { %v3300_v43 = vor.u32 %v3299_v40, %v3296_v0  ;;  %v7382_v49 = vcombine.low %v3282_v24, %v3292_v6  ;;  %v5227_v59 = vcombine.low %v7361_v17, %v7369_v51  ;;  %v8951_v23 = vcombine.low %v7134_v48, %v7149_v25  ;;  %v5196_v24 = vld [vmem:[%s6210_s11 + $0x30] sm:$0xe] }
  0xd3   : > { %v3310_v44 = vor.u32 %v3309_v52, %v3305_v8  ;;  %v3315_v13 = vrot.slane %v3313_v60, 5  ;;  %v5211_v46 = vrot.slane %v5195_v19, 9  ;;  %v2732_v62 = vrot.slane %v6866_v36, 5  ;;  %v7421_v19 = vld [vmem:[%s6210_s11 + $0x3c] sm:$0xf] }
  0xd4   : > { %5756 = vmatmul.mubr.msk.bf16.gmra.mxu0 %vm684_vm3, %v8951_v23  ;;  %v3301_v3 = vrot.slane %v3300_v43, 4  ;;  %v8952_v63 = vcombine.low %v7186_v16, %v7195_v42  ;;  %v2735_v54 = vrot.slane %v6875_v11, 5  ;;  %v3318_v48 = vshrl.u32 %v7380_v15, 16  ;;  %v7433_v43 = vld [vmem:[%s6210_s11 + $0x40] sm:$0xf] }
  0xd5   : > { %v3311_v38 = vrot.slane %v3310_v44, 4  ;;  %v3321_v39 = vshll.u32 %v7380_v15, 16  ;;  %v7407_v0 = vsel %vm733_vm0, %v7165_v18, 0  ;;  %v7411_v36 = vsel %vm733_vm0, %v7139_v20, 0 }
  0xd6   : > { %5759 = vmatprep.mubr.msk.bf16.mxu0 %vm684_vm3, %v8952_v63  ;;  %v2734_v16 = vrot.slane %v2732_v62, 4  ;;  %v3327_v40 = vshll.u32 %v7388_v28, 16  ;;  %v3306_v11 = vsel %vm6267_vm4, %v3301_v3, %v3305_v8  ;;  %v3320_v52 = vrot.slane %v3318_v48, 4 }
  0xd7   : > { %5722 = vmatmul.mubr.msk.bf16.gmra.mxu1 %vm684_vm3, %v7262_v55  ;;  %v3323_v60 = vrot.slane %v3321_v39, 5  ;;  %v3331_v18 = vshrl.u32 %v7388_v28, 16  ;;  %v3316_v20 = vsel %vm6267_vm4, %v3311_v38, %v3315_v13  ;;  %v7429_v6 = vsel %vm6543_vm7, %v5211_v46, %v2732_v62  ;;  %v7443_v39 = vld [vmem:[%s6210_s11 + $0x44] sm:$0x1] }
  0xd8   : > { %5725 = vmatprep.mubr.msk.bf16.mxu1 %vm684_vm3, %v7298_v33  ;;  %v3329_v55 = vrot.slane %v3327_v40, 5  ;;  %v3337_v8 = vshll.u32 %v7401_v56, 16  ;;  %v7437_v44 = vsel %vm6543_vm7, %v2734_v16, %v2735_v54  ;;  %v5212_v33 = vrot.slane %v5196_v24, 9 }
  0xd9   : > { %v3324_v23 = vor.u32 %v3323_v60, %v3320_v52  ;;  %v3333_v3 = vrot.slane %v3331_v18, 4  ;;  %v2739_v48 = vrot.slane %v6905_v29, 5  ;;  %v2742_v13 = vrot.slane %v6913_v26, 5 }
  0xda   : > { %v3339_v63 = vrot.slane %v3337_v8, 5  ;;  %v3342_v46 = vshrl.u32 %v7421_v19, 16  ;;  %v3345_v40 = vshll.u32 %v7421_v19, 16  ;;  %v3351_v54 = vshll.u32 %v7433_v43, 16 }
  0xdb   : > { %v3325_v62 = vrot.slane %v3324_v23, 4  ;;  %v3334_v38 = vor.u32 %v3333_v3, %v3329_v55  ;;  %v8953_v16 = vcombine.low %v7217_v61, %v7228_v14  ;;  %v7451_v29 = vcombine.low %v3306_v11, %v3316_v20  ;;  %v5197_v23 = vld [vmem:[%s6210_s11 + $0x3c] sm:$0xe] }
  0xdc   : > { %v2741_v26 = vrot.slane %v2739_v48, 4  ;;  %v3344_v24 = vrot.slane %v3342_v46, 4  ;;  %v3355_v52 = vshrl.u32 %v7433_v43, 16  ;;  %v5228_v60 = vcombine.low %v7429_v6, %v7437_v44 }
  0xdd   : > { %5760 = vmatmul.mubr.msk.bf16.gmra.mxu0 %vm684_vm3, %v8953_v16  ;;  %v3335_v18 = vrot.slane %v3334_v38, 4  ;;  %v3347_v61 = vrot.slane %v3345_v40, 5  ;;  %v3353_v8 = vrot.slane %v3351_v54, 5  ;;  %v3330_v11 = vsel %vm6267_vm4, %v3325_v62, %v3329_v55  ;;  %v7488_v16 = vld [vmem:[%s6210_s11 + $0x50] sm:$0x1] }
  0xde   : > { %5763 = vmatprep.mubr.msk.bf16.mxu0 %vm684_vm3, %v5175_v2  ;;  %v7465_v20 = vsel %vm6543_vm7, %v5212_v33, %v2739_v48  ;;  %v3357_v3 = vrot.slane %v3355_v52, 4  ;;  %v3361_v47 = vshll.u32 %v7443_v39, 16  ;;  %v7477_v46 = vsel %vm6543_vm7, %v2741_v26, %v2742_v13  ;;  %v7481_v48 = vld [vmem:[%s6210_s11 + $0x4c] sm:$0xf] }
  0xdf   : > { %5726 = vmatmul.mubr.msk.bf16.gmra.mxu1 %vm684_vm3, %v7308_v58  ;;  %v3340_v2 = vsel %vm6267_vm4, %v3335_v18, %v3339_v63  ;;  %v3348_v55 = vor.u32 %v3347_v61, %v3344_v24  ;;  %v5213_v40 = vrot.slane %v5197_v23, 9  ;;  %v2746_v58 = vrot.slane %v6931_v32, 5 }
  0xe0   : > { %5729 = vmatprep.mubr.msk.bf16.mxu1 %vm684_vm3, %v7326_v37  ;;  %v3358_v62 = vor.u32 %v3357_v3, %v3353_v8  ;;  %v3363_v38 = vrot.slane %v3361_v47, 5  ;;  %v2749_v63 = vrot.slane %v6946_v57, 5  ;;  %v3366_v13 = vshrl.u32 %v7469_v1, 16  ;;  %v5198_v3 = vld [vmem:[%s6210_s11 + $0x48] sm:$0xe] }
  0xe1   : > { %v3349_v54 = vrot.slane %v3348_v55, 4  ;;  %v3369_v26 = vshll.u32 %v7469_v1, 16  ;;  %v5229_v24 = vcombine.low %v7465_v20, %v7477_v46  ;;  %v2748_v52 = vrot.slane %v2746_v58, 4 }
  0xe2   : > { %v3359_v37 = vrot.slane %v3358_v62, 4  ;;  %v3375_v18 = vshll.u32 %v7481_v48, 16  ;;  %v5310_v61 = vcombine.low %v3330_v11, %v3340_v2  ;;  %v3368_v32 = vrot.slane %v3366_v13, 4  ;;  %v7509_v2 = vld [vmem:[%s6210_s11 + $0x54] sm:$0xf] }
  0xe3   : > { %v3371_v23 = vrot.slane %v3369_v26, 5  ;;  %v3379_v57 = vshrl.u32 %v7481_v48, 16  ;;  %v3354_v47 = vsel %vm6267_vm4, %v3349_v54, %v3353_v8  ;;  %v7505_v55 = vsel %vm6543_vm7, %v5213_v40, %v2746_v58  ;;  %v7520_v40 = vld [vmem:[%s6210_s11 + $0x58] sm:$0xf] }
  0xe4   : > { %v3377_v62 = vrot.slane %v3375_v18, 5  ;;  %v3385_v11 = vshll.u32 %v7488_v16, 16  ;;  %v3364_v30 = vsel %vm6267_vm4, %v3359_v37, %v3363_v38  ;;  %v7517_v10 = vsel %vm6543_vm7, %v2748_v52, %v2749_v63  ;;  %v7527_v37 = vld [vmem:[%s6210_s11 + $0x5c] sm:$0x1] }
  0xe5   : > { %5764 = vmatmul.mubr.msk.bf16.gmra.mxu0 %vm684_vm3, %v5176_v12  ;;  %v3372_v12 = vor.u32 %v3371_v23, %v3368_v32  ;;  %v3381_v8 = vrot.slane %v3379_v57, 4  ;;  %v5214_v54 = vrot.slane %v5198_v3, 9  ;;  %v2753_v13 = vrot.slane %v6961_v9, 5 }
  0xe6   : > { %5803 = vmatprep.mubr.msk.bf16.mxu0 %vm684_vm3, %v7382_v49  ;;  %v3387_v58 = vrot.slane %v3385_v11, 5  ;;  %v2756_v26 = vrot.slane %v6972_v50, 5  ;;  %v3390_v63 = vshrl.u32 %v7509_v2, 16  ;;  %v3393_v52 = vshll.u32 %v7509_v2, 16  ;;  %v5199_v11 = vld [vmem:[%s6210_s11 + $0x54] sm:$0xe] }
  0xe7   : > { %5730 = vmatmul.mubr.msk.bf16.gmra.mxu1 %vm684_vm3, %v7373_v53  ;;  %v3373_v49 = vrot.slane %v3372_v12, 4  ;;  %v3382_v38 = vor.u32 %v3381_v8, %v3377_v62  ;;  %v5311_v9 = vcombine.low %v3354_v47, %v3364_v30  ;;  %v2755_v50 = vrot.slane %v2753_v13, 4  ;;  %v7548_v30 = vld [vmem:[%s6210_s11 + $0x60] sm:$0xf] }
  0xe8   : > { %5769 = vmatprep.mubr.msk.bf16.mxu1 %vm684_vm3, %v5226_v5  ;;  %v3399_v18 = vshll.u32 %v7520_v40, 16  ;;  %v3403_v53 = vshrl.u32 %v7520_v40, 16  ;;  %v7539_v23 = vsel %vm6543_vm7, %v5214_v54, %v2753_v13  ;;  %v3392_v57 = vrot.slane %v3390_v63, 4 }
  0xe9   : > { %v3383_v32 = vrot.slane %v3382_v38, 4  ;;  %v3395_v3 = vrot.slane %v3393_v52, 5  ;;  %v7544_v27 = vsel %vm6543_vm7, %v2755_v50, %v2756_v26  ;;  %v3409_v47 = vshll.u32 %v7527_v37, 16  ;;  %v7557_v38 = vld [vmem:[%s6210_s11 + $0x64] sm:$0xf] }
  0xea   : > { %v3401_v45 = vrot.slane %v3399_v18, 5  ;;  %v3405_v5 = vrot.slane %v3403_v53, 4  ;;  %v5230_v12 = vcombine.low %v7505_v55, %v7517_v10  ;;  %v3378_v8 = vsel %vm6267_vm4, %v3373_v49, %v3377_v62  ;;  %v8954_v49 = vld [vmem:[#allocation6_spill] sm:$0xff]  ;;  %v8955_v18 = vld [vmem:[#allocation7_spill] sm:$0xff] }
  0xeb   : > { %v3388_v54 = vsel %vm6267_vm4, %v3383_v32, %v3387_v58  ;;  %v3396_v13 = vor.u32 %v3395_v3, %v3392_v57  ;;  %v5231_v26 = vcombine.low %v7539_v23, %v7544_v27  ;;  %v3411_v52 = vrot.slane %v3409_v47, 5 }
  0xec   : > { %v3406_v63 = vor.u32 %v3405_v5, %v3401_v45  ;;  %v5215_v50 = vrot.slane %v5199_v11, 9  ;;  %v2760_v58 = vrot.slane %v8954_v49, 5  ;;  %v2763_v53 = vrot.slane %v8955_v18, 5 }
  0xed   : > { %5804 = vmatmul.mubr.msk.bf16.vlgmr.msra.gmra.mxu0 %vm684_vm3, %v7451_v29  ;;  %v3397_v62 = vrot.slane %v3396_v13, 4  ;;  %v3414_v32 = vshrl.u32 %v7548_v30, 16  ;;  %v7569_v29 = vld [vmem:[%s6210_s11 + $0x68] sm:$0x1]  ;;  %v3417_v3 = vshll.u32 %v7548_v30, 16  ;;  %v3423_v11 = vshll.u32 %v7557_v38, 16 }
  0xee   : > { %5870 = vmatpush3.bf16.msra.mxu0 %v7411_v36  ;;  %5807 = vmatprep.mubr.msk.bf16.mxu0 %vm684_vm3, %v5310_v61  ;;  %v3407_v57 = vrot.slane %v3406_v63, 4  ;;  %v3427_v36 = vshrl.u32 %v7557_v38, 16  ;;  %v5312_v61 = vcombine.low %v3378_v8, %v3388_v54  ;;  %v2762_v47 = vrot.slane %v2760_v58, 4  ;;  %v5200_v63 = vld [vmem:[%s6210_s11 + $0x60] sm:$0xe] }
  0xef   : > { %5770 = vmatmul.mubr.msk.bf16.vlgmr.msra.gmra.mxu1 %vm684_vm3, %v5227_v59  ;;  %v3416_v13 = vrot.slane %v3414_v32, 4  ;;  %v3402_v49 = vsel %vm6267_vm4, %v3397_v62, %v3401_v45  ;;  %v3419_v17 = vrot.slane %v3417_v3, 5  ;;  %v3425_v51 = vrot.slane %v3423_v11, 5  ;;  %v7588_v8 = vld [vmem:[%s6210_s11 + $0x6c] sm:$0xf]  ;;  %v8956_v11 = vld [vmem:[#allocation9_spill] sm:$0xff] }
  0xf0   : > { %5836 = vmatpush3.bf16.msra.mxu1 %v7407_v0  ;;  %5773 = vmatprep.mubr.msk.bf16.mxu1 %vm684_vm3, %v5228_v60  ;;  %v3429_v59 = vrot.slane %v3427_v36, 4  ;;  %v3412_v54 = vsel %vm6267_vm4, %v3407_v57, %v3411_v52  ;;  %v7594_v0 = vsel %vm6543_vm7, %v5215_v50, %v2760_v58  ;;  %v7598_v6 = vsel %vm6543_vm7, %v2762_v47, %v2763_v53  ;;  %v7603_v32 = vld [vmem:[%s6210_s11 + $0x70] sm:$0xf]  ;;  %v7607_v57 = vld [vmem:[%s6210_s11 + $0x74] sm:$0x1] }
  0xf1   : > { %v3433_v44 = vshll.u32 %v7569_v29, 16  ;;  %v3420_v60 = vor.u32 %v3419_v17, %v3416_v13  ;;  %v5216_v62 = vrot.slane %v5200_v63, 9  ;;  %v2767_v18 = vrot.slane %v7022_v41, 5  ;;  %8957 = vst [vmem:[#allocation14_spill] sm:$0xff] %v7607_v57  ;;  %v7612_v41 = vpop.f32.mrf.mxu0 }
  0xf2   : > { %v3430_v45 = vor.u32 %v3429_v59, %v3425_v51  ;;  %v2770_v52 = vrot.slane %v8956_v11, 5  ;;  %v3438_v50 = vshrl.u32 %v7588_v8, 16  ;;  %v3441_v58 = vshll.u32 %v7588_v8, 16  ;;  %v5201_v11 = vld [vmem:[%s6210_s11 + $0x6c] sm:$0xe] }
  0xf3   : > { %v3435_v3 = vrot.slane %v3433_v44, 5  ;;  %v5313_v53 = vcombine.low %v3402_v49, %v3412_v54  ;;  %v3421_v36 = vrot.slane %v3420_v60, 4  ;;  %v2769_v13 = vrot.slane %v2767_v18, 4 }
  0xf4   : > { %v3431_v47 = vrot.slane %v3430_v45, 4  ;;  %v3440_v63 = vrot.slane %v3438_v50, 4  ;;  %v3443_v17 = vrot.slane %v3441_v58, 5  ;;  %v3447_v59 = vshll.u32 %v7603_v32, 16  ;;  %v7643_v50 = vpop.f32.mrf.mxu1 }
  0xf5   : > { %5808 = vmatmul.mubr.msk.bf16.gmra.mxu0 %vm684_vm3, %v5311_v9  ;;  %v3451_v44 = vshrl.u32 %v7603_v32, 16  ;;  %v5232_v9 = vcombine.low %v7594_v0, %v7598_v6  ;;  %v3426_v49 = vsel %vm6267_vm4, %v3421_v36, %v3425_v51  ;;  %v3457_v60 = vshll.u32 %v7607_v57, 16  ;;  %8958 = vst [vmem:[#allocation16_spill] sm:$0xff] %v7643_v50  ;;  %v8959_v36 = vld [vmem:[#allocation8_spill] sm:$0xff] }
  0xf6   : > { %5811 = vmatprep.mubr.msk.bf16.mxu0 %vm684_vm3, %v5312_v61  ;;  %v3436_v54 = vsel %vm6267_vm4, %v3431_v47, %v3435_v3  ;;  %v7626_v61 = vld [vmem:[%s6210_s11 + $0x78] sm:$0xf]  ;;  %v7634_v45 = vsel %vm6543_vm7, %v5216_v62, %v2767_v18  ;;  %v7638_v51 = vsel %vm6543_vm7, %v2769_v13, %v2770_v52  ;;  %v3444_v0 = vor.u32 %v3443_v17, %v3440_v63  ;;  %v7641_v3 = vld [vmem:[%s6210_s11 + $0x7c] sm:$0xf]  ;;  %v7649_v18 = vpop.f32.mrf.mxu0  ;;  %v7654_v13 = vld [vmem:[%s6210_s11 + $0x80] sm:$0x1] }
  0xf7   : > { %5774 = vmatmul.mubr.msk.bf16.gmra.mxu1 %vm684_vm3, %v5229_v24  ;;  %v3449_v6 = vrot.slane %v3447_v59, 5  ;;  %v5314_v20 = vcombine.low %v3426_v49, %v3436_v54  ;;  %v3453_v46 = vrot.slane %v3451_v44, 4  ;;  %v3459_v24 = vrot.slane %v3457_v60, 5  ;;  %v5202_v59 = vld [vmem:[%s6210_s11 + $0x78] sm:$0xe]  ;;  %v7665_v54 = vpop.f32.mrf.mxu1 }
  0xf8   : > { %5777 = vmatprep.mubr.msk.bf16.mxu1 %vm684_vm3, %v5230_v12  ;;  %v5217_v62 = vrot.slane %v5201_v11, 9  ;;  %v3445_v52 = vrot.slane %v3444_v0, 4  ;;  %v2774_v58 = vrot.slane %v7058_v21, 5  ;;  %v2777_v47 = vrot.slane %v8959_v36, 5  ;;  %8960 = vst [vmem:[#allocation17_spill] sm:$0xff] %v7665_v54  ;;  %v7668_v5 = vpop.f32.mrf.mxu0 }
  0xf9   : > { %v3462_v63 = vshrl.u32 %v7626_v61, 16  ;;  %v3454_v17 = vor.u32 %v3453_v46, %v3449_v6  ;;  %v3465_v55 = vshll.u32 %v7626_v61, 16  ;;  %v3471_v10 = vshll.u32 %v7641_v3, 16  ;;  %v7725_v50 = vld [vmem:[%s6210_s11 + $0x94] sm:$0xf] }
  0xfa   : > { %v3475_v12 = vshrl.u32 %v7641_v3, 16  ;;  %v3450_v21 = vsel %vm6267_vm4, %v3445_v52, %v3449_v6  ;;  %v2776_v11 = vrot.slane %v2774_v58, 4  ;;  %v7673_v33 = vsel %vm6543_vm7, %v5217_v62, %v2774_v58  ;;  %v7703_v27 = vpop.f32.mrf.mxu0  ;;  %8965 = vst [vmem:[#allocation8_spill] sm:$0xff] %v7725_v50 }
  0xfb   : > { %v3464_v49 = vrot.slane %v3462_v63, 4  ;;  %v3455_v60 = vrot.slane %v3454_v17, 4  ;;  %v3467_v0 = vrot.slane %v3465_v55, 5  ;;  %v3473_v46 = vrot.slane %v3471_v10, 5 }
  0xfc   : > { %v3477_v36 = vrot.slane %v3475_v12, 4  ;;  %v3481_v6 = vshll.u32 %v7654_v13, 16  ;;  %v5218_v52 = vrot.slane %v5202_v59, 9  ;;  %v2781_v63 = vrot.slane %v7092_v34, 5 }
  0xfd   : > { %5812 = vmatmul.mubr.msk.bf16.gmra.mxu0 %vm684_vm3, %v5313_v53  ;;  %v7678_v53 = vld [vmem:[%s6210_s11 + $0x84] sm:$0xf]  ;;  %v3460_v17 = vsel %vm6267_vm4, %v3455_v60, %v3459_v24  ;;  %v2778_v55 = vsel %vm6543_vm7, %v2776_v11, %v2777_v47  ;;  %v3468_v10 = vor.u32 %v3467_v0, %v3464_v49  ;;  %v7698_v47 = vpop.f32.mrf.mxu1 }
  0xfe   : > { %5815 = vmatprep.mubr.msk.bf16.mxu0 %vm684_vm3, %v5314_v20  ;;  %v3478_v12 = vor.u32 %v3477_v36, %v3473_v46  ;;  %v7685_v20 = vld [vmem:[%s6210_s11 + $0x88] sm:$0xf]  ;;  %v5315_v34 = vcombine.low %v3450_v21, %v3460_v17  ;;  %v3483_v62 = vrot.slane %v3481_v6, 5  ;;  %v7696_v24 = vsel %vm6543_vm7, %v5218_v52, %v2781_v63  ;;  %8961 = vst [vmem:[#allocation6_spill] sm:$0xff] %v7698_v47  ;;  %v8962_v49 = vld [vmem:[#allocation10_spill] sm:$0xff] }
  0xff   : > { %5778 = vmatmul.mubr.msk.bf16.gmra.mxu1 %vm684_vm3, %v5231_v26  ;;  %v2783_v58 = vrot.slane %v2781_v63, 4  ;;  %v3469_v59 = vrot.slane %v3468_v10, 4  ;;  %v2784_v60 = vrot.slane %v8962_v49, 5  ;;  %v3486_v23 = vshrl.u32 %v7678_v53, 16  ;;  %v5203_v6 = vld [vmem:[%s6210_s11 + $0x84] sm:$0xe]  ;;  %v7722_v54 = vpop.f32.mrf.mxu1 }
 0x100   : > { %5781 = vmatprep.mubr.msk.bf16.mxu1 %vm684_vm3, %v5232_v9  ;;  %v3479_v11 = vrot.slane %v3478_v12, 4  ;;  %v3489_v26 = vshll.u32 %v7678_v53, 16  ;;  %v3495_v21 = vshll.u32 %v7685_v20, 16  ;;  %v3499_v0 = vshrl.u32 %v7685_v20, 16  ;;  %v7719_v10 = vld [vmem:[%s6210_s11 + $0x90] sm:$0xf] }
 0x101   : > { %v3505_v36 = vshll.u32 %v7688_v31, 16  ;;  %v3474_v9 = vsel %vm6267_vm4, %v3469_v59, %v3473_v46  ;;  %v7716_v63 = vsel %vm6543_vm7, %v2783_v58, %v2784_v60  ;;  %v3488_v17 = vrot.slane %v3486_v23, 4  ;;  %8963 = vst [vmem:[#allocation7_spill] sm:$0xff] %v7719_v10  ;;  %8964 = vst [vmem:[#allocation9_spill] sm:$0xff] %v7722_v54  ;;  %v8966_v60 = vld [vmem:[#allocation12_spill] sm:$0xff] }
 0x102   : > { %v3484_v52 = vsel %vm6267_vm4, %v3479_v11, %v3483_v62  ;;  %v5234_v12 = vcombine.low %v7673_v33, %v2778_v55  ;;  %v3491_v44 = vrot.slane %v3489_v26, 5  ;;  %v3497_v47 = vrot.slane %v3495_v21, 5  ;;  %v7730_v11 = vpop.f32.mrf.mxu0  ;;  %v7736_v26 = vld [vmem:[%s6210_s11 + $0x98] sm:$0x1] }
 0x103   : > { %v5316_v49 = vcombine.low %v3474_v9, %v3484_v52  ;;  %v5235_v46 = vcombine.low %v7696_v24, %v7716_v63  ;;  %v3501_v62 = vrot.slane %v3499_v0, 4  ;;  %v3507_v58 = vrot.slane %v3505_v36, 5  ;;  %8967 = vst [vmem:[#allocation10_spill] sm:$0xff] %v7736_v26  ;;  %v5204_v36 = vld [vmem:[%s6210_s11 + $0x90] sm:$0xe] }
 0x104   : > { %v5219_v59 = vrot.slane %v5203_v6, 9  ;;  %v3492_v33 = vor.u32 %v3491_v44, %v3488_v17  ;;  %v2788_v55 = vrot.slane %v7122_v7, 5  ;;  %v2791_v23 = vrot.slane %v8966_v60, 5  ;;  %v7749_v17 = vpop.f32.mrf.mxu1 }
 0x105   : > { %5816 = vmatmul.mubr.msk.bf16.gmra.mxu0 %vm684_vm3, %v5315_v34  ;;  %v3510_v34 = vshrl.u32 %v7719_v10, 16  ;;  %v3502_v21 = vor.u32 %v3501_v62, %v3497_v47  ;;  %v3513_v9 = vshll.u32 %v7719_v10, 16  ;;  %v3519_v24 = vshll.u32 %v7725_v50, 16  ;;  %8969 = vst [vmem:[#allocation12_spill] sm:$0xff] %v7749_v17  ;;  %v7752_v10 = vpop.f32.mrf.mxu0 }
 0x106   : > { %5819 = vmatprep.mubr.msk.bf16.mxu0 %vm684_vm3, %v5316_v49  ;;  %v3523_v0 = vshrl.u32 %v7725_v50, 16  ;;  %v8968_v6 = vcombine.low %v7634_v45, %v7638_v51  ;;  %v3493_v7 = vrot.slane %v3492_v33, 4  ;;  %v2789_v44 = vsel %vm6543_vm7, %v5219_v59, %v2788_v55  ;;  %v6022_v50 = vld [vmem:[%s6210_s11 + $0xbc] sm:$0x1] }
 0x107   : > { %v2790_v52 = vrot.slane %v2788_v55, 4  ;;  %v3512_v63 = vrot.slane %v3510_v34, 4  ;;  %v3503_v49 = vrot.slane %v3502_v21, 4  ;;  %v3515_v62 = vrot.slane %v3513_v9, 5  ;;  %v7760_v55 = vld [vmem:[%s6210_s11 + $0x9c] sm:$0xf] }
 0x108   : > { %5782 = vmatmul.mubr.msk.bf16.gmra.mxu1 %vm684_vm3, %v8968_v6  ;;  %v3521_v60 = vrot.slane %v3519_v24, 5  ;;  %v3525_v54 = vrot.slane %v3523_v0, 4  ;;  %v3498_v45 = vsel %vm6267_vm4, %v3493_v7, %v3497_v47  ;;  %v3529_v59 = vshll.u32 %v7736_v26, 16  ;;  %8970 = vst [vmem:[#allocation18_spill] sm:$0xff] %v7760_v55  ;;  %v7765_v24 = vld [vmem:[%s6210_s11 + $0xa0] sm:$0xf] }
 0x109   : > { %5785 = vmatprep.mubr.msk.bf16.mxu1 %vm684_vm3, %v5234_v12  ;;  %v2792_v51 = vsel %vm6543_vm7, %v2790_v52, %v2791_v23  ;;  %v5220_v33 = vrot.slane %v5204_v36, 9  ;;  %v3508_v12 = vsel %vm6267_vm4, %v3503_v49, %v3507_v58  ;;  %v3516_v21 = vor.u32 %v3515_v62, %v3512_v63  ;;  %8971 = vst [vmem:[#allocation19_spill] sm:$0xff] %v7765_v24  ;;  %v8972_v7 = vld [vmem:[#allocation11_spill] sm:$0xff]  ;;  %v7769_v52 = vpop.f32.mrf.mxu1  ;;  %v7779_v63 = vld [vmem:[%s6210_s11 + $0xa4] sm:$0x1] }
 0x10a   : > { %v5236_v34 = vcombine.low %v2789_v44, %v2792_v51  ;;  %v3526_v9 = vor.u32 %v3525_v54, %v3521_v60  ;;  %v5317_v0 = vcombine.low %v3498_v45, %v3508_v12  ;;  %v3531_v6 = vrot.slane %v3529_v59, 5  ;;  %8973 = vst [vmem:[#allocation11_spill] sm:$0xff] %v7769_v52  ;;  %v7773_v44 = vpop.f32.mrf.mxu0  ;;  %v7794_v52 = vld [vmem:[%s6210_s11 + $0xa8] sm:$0xf] }
 0x10b   : > { %v2795_v47 = vrot.slane %v7149_v25, 5  ;;  %v2798_v23 = vrot.slane %v8972_v7, 5  ;;  %v3517_v36 = vrot.slane %v3516_v21, 4  ;;  %v3534_v26 = vshrl.u32 %v7760_v55, 16  ;;  %v5205_v21 = vld [vmem:[%s6210_s11 + $0x9c] sm:$0xe]  ;;  %v7791_v7 = vpop.f32.mrf.mxu1 }
 0x10c   : > { %v3527_v17 = vrot.slane %v3526_v9, 4  ;;  %v3537_v58 = vshll.u32 %v7760_v55, 16  ;;  %v3543_v49 = vshll.u32 %v7765_v24, 16  ;;  %v3547_v62 = vshrl.u32 %v7765_v24, 16  ;;  %8974 = vst [vmem:[#allocation20_spill] sm:$0xff] %v7791_v7  ;;  %8975 = vst [vmem:[#allocation21_spill] sm:$0xff] %v7794_v52 }
 0x10d   : > { %5820 = vmatmul.mubr.msk.bf16.gmra.mxu0 %vm684_vm3, %v5317_v0  ;;  %v2796_v54 = vsel %vm6543_vm7, %v5220_v33, %v2795_v47  ;;  %v2797_v25 = vrot.slane %v2795_v47, 4  ;;  %v3522_v45 = vsel %vm6267_vm4, %v3517_v36, %v3521_v60  ;;  %v3536_v59 = vrot.slane %v3534_v26, 4  ;;  %v7802_v36 = vld [vmem:[%s6210_s11 + $0xac] sm:$0xf]  ;;  %v5206_v7 = vld [vmem:[%s6210_s11 + $0xa8] sm:$0xe] }
 0x10e   : > { %v3532_v51 = vsel %vm6267_vm4, %v3527_v17, %v3531_v6  ;;  %v3539_v12 = vrot.slane %v3537_v58, 5  ;;  %v3545_v0 = vrot.slane %v3543_v49, 5  ;;  %v3549_v47 = vrot.slane %v3547_v62, 4  ;;  %8976 = vst [vmem:[#allocation22_spill] sm:$0xff] %v7802_v36  ;;  %v8977_v49 = vld [vmem:[#allocation13_spill] sm:$0xff]  ;;  %v9037_v22 = vld [vmem:[#allocation12_spill] sm:$0xff] }
 0x10f   : > { %v5318_v33 = vcombine.low %v3522_v45, %v3532_v51  ;;  %v2799_v9 = vsel %vm6543_vm7, %v2797_v25, %v2798_v23  ;;  %v3553_v6 = vshll.u32 %v7779_v63, 16  ;;  %v5221_v58 = vrot.slane %v5205_v21, 9 }
 0x110   : > { %5786 = vmatmul.mubr.msk.bf16.gmra.mxu1 %vm684_vm3, %v5235_v46  ;;  %v5237_v26 = vcombine.low %v2796_v54, %v2799_v9  ;;  %v3540_v17 = vor.u32 %v3539_v12, %v3536_v59  ;;  %v7799_v46 = vpop.f32.mrf.mxu0  ;;  %v3550_v23 = vor.u32 %v3549_v47, %v3545_v0  ;;  %v2802_v25 = vrot.slane %v7195_v42, 5  ;;  %v7812_v9 = vpop.f32.mrf.mxu1 }
 0x111   : > { %5789 = vmatprep.mubr.msk.bf16.mxu1 %vm684_vm3, %v5236_v34  ;;  %5823 = vmatprep.mubr.msk.bf16.mxu0 %vm684_vm3, %v5318_v33  ;;  %v2805_v62 = vrot.slane %v8977_v49, 5  ;;  %v3555_v51 = vrot.slane %v3553_v6, 5  ;;  %v7808_v34 = vld [vmem:[%s6210_s11 + $0xb0] sm:$0x1]  ;;  %v3558_v54 = vshrl.u32 %v7794_v52, 16  ;;  %v3561_v59 = vshll.u32 %v7794_v52, 16 }
 0x112   : > { %v3541_v45 = vrot.slane %v3540_v17, 4  ;;  %8978 = vst [vmem:[#allocation13_spill] sm:$0xff] %v7808_v34  ;;  %v3551_v12 = vrot.slane %v3550_v23, 4  ;;  %8979 = vst [vmem:[#allocation23_spill] sm:$0xff] %v7812_v9  ;;  %v2803_v21 = vsel %vm6543_vm7, %v5221_v58, %v2802_v25  ;;  %v2804_v33 = vrot.slane %v2802_v25, 4  ;;  %v7820_v60 = vpop.f32.mrf.mxu0 }
 0x113   : > { %v3567_v42 = vshll.u32 %v7802_v36, 16  ;;  %v3560_v17 = vrot.slane %v3558_v54, 4  ;;  %v3563_v6 = vrot.slane %v3561_v59, 5  ;;  %v3571_v49 = vshrl.u32 %v7802_v36, 16  ;;  %v7829_v52 = vld [vmem:[%s6210_s11 + $0xb4] sm:$0xf] }
 0x114   : > { %v3546_v47 = vsel %vm6267_vm4, %v3541_v45, %v3545_v0  ;;  %v3556_v23 = vsel %vm6267_vm4, %v3551_v12, %v3555_v51  ;;  %v2806_v58 = vsel %vm6543_vm7, %v2804_v33, %v2805_v62  ;;  %v3577_v9 = vshll.u32 %v7808_v34, 16  ;;  %8980 = vst [vmem:[#allocation24_spill] sm:$0xff] %v7829_v52  ;;  %v7832_v36 = vld [vmem:[%s6210_s11 + $0xb8] sm:$0xf]  ;;  %v8983_v12 = vld [vmem:[#allocation15_spill] sm:$0xff] }
 0x115   : > { %v3569_v25 = vrot.slane %v3567_v42, 5  ;;  %v5319_v0 = vcombine.low %v3546_v47, %v3556_v23  ;;  %v5238_v45 = vcombine.low %v2803_v21, %v2806_v58  ;;  %v3564_v54 = vor.u32 %v3563_v6, %v3560_v17  ;;  %8981 = vst [vmem:[#allocation25_spill] sm:$0xff] %v7832_v36  ;;  %v7842_v47 = vld [vmem:[%s6210_s11 + $0xbc] sm:$0x1]  ;;  %v6021_v34 = vld [vmem:[%s6210_s11 + $0xb8] sm:$0xf] }
 0x116   : > { %v3573_v59 = vrot.slane %v3571_v49, 4  ;;  %v3579_v55 = vrot.slane %v3577_v9, 5  ;;  %v7835_v24 = vpop.f32.mrf.mxu1  ;;  %v5222_v51 = vrot.slane %v5206_v7, 9  ;;  %v2809_v62 = vrot.slane %v7228_v14, 5  ;;  %8984 = vst [vmem:[#allocation15_spill] sm:$0xff] %v7842_v47  ;;  %v7846_v9 = vpop.f32.mrf.mxu0 }
 0x117   : > { %8982 = vst [vmem:[#allocation26_spill] sm:$0xff] %v7835_v24  ;;  %v2812_v33 = vrot.slane %v8983_v12, 5  ;;  %5824 = vmatmul.mubr.msk.bf16.gmra.mxu0 %vm684_vm3, %v5319_v0  ;;  %v3565_v21 = vrot.slane %v3564_v54, 4  ;;  %v3582_v17 = vshrl.u32 %v7829_v52, 16  ;;  %8985 = vst [vmem:[#allocation27_spill] sm:$0xff] %v7846_v9  ;;  %v3591_v6 = vshll.u32 %v7832_v36, 16 }
 0x118   : > { %5790 = vmatmul.mubr.msk.bf16.gmra.mxu1 %vm684_vm3, %v5237_v26  ;;  %v3574_v42 = vor.u32 %v3573_v59, %v3569_v25  ;;  %v3585_v26 = vshll.u32 %v7829_v52, 16  ;;  %v2810_v14 = vsel %vm6543_vm7, %v5222_v51, %v2809_v62  ;;  %v2811_v7 = vrot.slane %v2809_v62, 4  ;;  %v5207_v54 = vld [vmem:[%s6210_s11 + $0xb4] sm:$0xe]  ;;  %v7858_v62 = vpop.f32.mrf.mxu1  ;;  %v7861_v52 = vld [vmem:[%s6210_s11 + $0xc0] sm:$0xf] }
 0x119   : > { %5793 = vmatprep.mubr.msk.bf16.mxu1 %vm684_vm3, %v5238_v45  ;;  %v3595_v49 = vshrl.u32 %v7832_v36, 16  ;;  %v3570_v23 = vsel %vm6267_vm4, %v3565_v21, %v3569_v25  ;;  %v3584_v0 = vrot.slane %v3582_v17, 4  ;;  %v3593_v12 = vrot.slane %v3591_v6, 5  ;;  %8986 = vst [vmem:[#allocation28_spill] sm:$0xff] %v7858_v62  ;;  %8987 = vst [vmem:[#allocation29_spill] sm:$0xff] %v7861_v52 }
 0x11a   : > { %v3575_v58 = vrot.slane %v3574_v42, 4  ;;  %v3587_v45 = vrot.slane %v3585_v26, 5  ;;  %v2813_v59 = vsel %vm6543_vm7, %v2811_v7, %v2812_v33  ;;  %v3601_v51 = vshll.u32 %v7842_v47, 16  ;;  %v7866_v26 = vpop.f32.mrf.mxu0  ;;  %v7869_v33 = vld [vmem:[%s6210_s11 + $0xc4] sm:$0xf] }
 0x11b   : > { %v3597_v24 = vrot.slane %v3595_v49, 4  ;;  %v5239_v42 = vcombine.low %v2810_v14, %v2813_v59  ;;  %8988 = vst [vmem:[#allocation30_spill] sm:$0xff] %v7869_v33  ;;  %v5223_v36 = vrot.slane %v5207_v54, 9  ;;  %v2816_v9 = vrot.slane %v6021_v34, 5  ;;  %v7874_v25 = vld [vmem:[%s6210_s11 + $0xc8] sm:$0x1] }
 0x11c   : > { %v3580_v21 = vsel %vm6267_vm4, %v3575_v58, %v3579_v55  ;;  %v3588_v17 = vor.u32 %v3587_v45, %v3584_v0  ;;  %v3603_v49 = vrot.slane %v3601_v51, 5  ;;  %v2819_v57 = vrot.slane %v6022_v50, 5  ;;  %8989 = vst [vmem:[#allocation31_spill] sm:$0xff] %v7874_v25  ;;  %v5208_v0 = vld [vmem:[%s6210_s11 + $0xc0] sm:$0xe]  ;;  %v7887_v45 = vpop.f32.mrf.mxu0 }
 0x11d   : > { %v5320_v7 = vcombine.low %v3570_v23, %v3580_v21  ;;  %v3598_v6 = vor.u32 %v3597_v24, %v3593_v12  ;;  %v3606_v55 = vshrl.u32 %v7861_v52, 16  ;;  %v7879_v23 = vpop.f32.mrf.mxu1  ;;  %v3609_v24 = vshll.u32 %v7861_v52, 16  ;;  %v5375_v47 = vld [vmem:[%s6210_s11 + $0x3c] sm:$0xe] }
 0x11e   : > { %v3589_v62 = vrot.slane %v3588_v17, 4  ;;  %8990 = vst [vmem:[#allocation32_spill] sm:$0xff] %v7879_v23  ;;  %v3615_v58 = vshll.u32 %v7869_v33, 16  ;;  %v3619_v34 = vshrl.u32 %v7869_v33, 16  ;;  %v2817_v54 = vsel %vm6543_vm7, %v5223_v36, %v2816_v9 }
 0x11f   : > { %5827 = vmatprep.mubr.msk.bf16.mxu0 %vm684_vm3, %v5320_v7  ;;  %v3599_v14 = vrot.slane %v3598_v6, 4  ;;  %v2818_v59 = vrot.slane %v2816_v9, 4  ;;  %v3608_v51 = vrot.slane %v3606_v55, 4  ;;  %v7894_v6 = vld [vmem:[%s6210_s11 + $0xcc] sm:$0xf]  ;;  %v3625_v36 = vshll.u32 %v7874_v25, 16  ;;  %v7899_v9 = vpop.f32.mrf.mxu1 }
 0x120   : > { %5794 = vmatmul.mubr.msk.bf16.gmra.mxu1 %vm684_vm3, %v5239_v42  ;;  %v3594_v50 = vsel %vm6267_vm4, %v3589_v62, %v3593_v12  ;;  %v3611_v42 = vrot.slane %v3609_v24, 5  ;;  %v3617_v17 = vrot.slane %v3615_v58, 5  ;;  %v3621_v7 = vrot.slane %v3619_v34, 4  ;;  %8991 = vst [vmem:[#allocation33_spill] sm:$0xff] %v7894_v6  ;;  %8992 = vst [vmem:[#allocation34_spill] sm:$0xff] %v7899_v9 }
 0x121   : > { %v3604_v21 = vsel %vm6267_vm4, %v3599_v14, %v3603_v49  ;;  %v2820_v12 = vsel %vm6543_vm7, %v2818_v59, %v2819_v57  ;;  %v5224_v62 = vrot.slane %v5208_v0, 9  ;;  %v6023_v49 = vld [vmem:[%s6210_s11 + $0xc4] sm:$0xf]  ;;  %v7903_v24 = vld [vmem:[%s6210_s11 + $0xd0] sm:$0xf]  ;;  %v3627_v58 = vrot.slane %v3625_v36, 5 }
 0x122   : > { %v5321_v23 = vcombine.low %v3594_v50, %v3604_v21  ;;  %v5240_v55 = vcombine.low %v2817_v54, %v2820_v12  ;;  %v3612_v52 = vor.u32 %v3611_v42, %v3608_v51  ;;  %v3622_v33 = vor.u32 %v3621_v7, %v3617_v17  ;;  %8993 = vst [vmem:[#allocation35_spill] sm:$0xff] %v7903_v24  ;;  %v6024_v50 = vld [vmem:[%s6210_s11 + $0xc8] sm:$0x1]  ;;  %v7910_v57 = vld [vmem:[%s6210_s11 + $0xd4] sm:$0x1] }
 0x123   : > { %v2823_v14 = vrot.slane %v6023_v49, 5  ;;  %v7906_v34 = vpop.f32.mrf.mxu0  ;;  %v2826_v21 = vrot.slane %v6024_v50, 5  ;;  %v3630_v0 = vshrl.u32 %v7894_v6, 16  ;;  %v3633_v59 = vshll.u32 %v7894_v6, 16 }
 0x124   : > { %5828 = vmatmul.mubr.msk.bf16.gmra.mxu0 %vm684_vm3, %v5321_v23  ;;  %5797 = vmatprep.mubr.msk.bf16.mxu1 %vm684_vm3, %v5240_v55  ;;  %v3613_v54 = vrot.slane %v3612_v52, 4  ;;  %v3623_v51 = vrot.slane %v3622_v33, 4  ;;  %v3639_v36 = vshll.u32 %v7903_v24, 16  ;;  %v3643_v49 = vshrl.u32 %v7903_v24, 16 }
 0x125   : > { %v2824_v42 = vsel %vm6543_vm7, %v5224_v62, %v2823_v14  ;;  %v2825_v23 = vrot.slane %v2823_v14, 4  ;;  %v3632_v7 = vrot.slane %v3630_v0, 4  ;;  %v3635_v12 = vrot.slane %v3633_v59, 5  ;;  %v7919_v50 = vpop.f32.mrf.mxu0  ;;  %v5372_v14 = vld [vmem:[%s6210_s11 + $0x18] sm:$0xe] }
 0x126   : > { %8994 = vst [vmem:[#allocation36_spill] sm:$0xff] %v7919_v50  ;;  %v3618_v9 = vsel %vm6267_vm4, %v3613_v54, %v3617_v17  ;;  %v3628_v52 = vsel %vm6267_vm4, %v3623_v51, %v3627_v58  ;;  %v7925_v33 = vpop.f32.mrf.mxu1  ;;  %v3649_v55 = vshll.u32 %v7910_v57, 16  ;;  %v3641_v24 = vrot.slane %v3639_v36, 5  ;;  %v5373_v17 = vld [vmem:[%s6210_s11 + $0x24] sm:$0xe] }
 0x127   : > { %8995 = vst [vmem:[#allocation37_spill] sm:$0xff] %v7925_v33  ;;  %v2827_v62 = vsel %vm6543_vm7, %v2825_v23, %v2826_v21  ;;  %v5322_v0 = vcombine.low %v3618_v9, %v3628_v52  ;;  %v3636_v6 = vor.u32 %v3635_v12, %v3632_v7  ;;  %v7931_v25 = vpop.f32.mrf.mxu0  ;;  %v3645_v51 = vrot.slane %v3643_v49, 4  ;;  %v6025_v21 = vld [vmem:[%s6210_s11 + $0x18] sm:$0xf]  ;;  %v6026_v23 = vld [vmem:[%s6210_s11 + $0x1c] sm:$0xf] }
 0x128   : > { %v5241_v59 = vcombine.low %v2824_v42, %v2827_v62  ;;  %v7936_v33 = vpop.f32.mrf.mxu1  ;;  %v5340_v50 = vcombine.low %v6025_v21, %v6026_v23  ;;  %v5388_v7 = vrot.slane %v5372_v14, 9  ;;  %v4257_v12 = vrot.slane %v6026_v23, 5  ;;  %v6027_v36 = vld [vmem:[%s6210_s11 + $0x20] sm:$0x1]  ;;  %v5374_v62 = vld [vmem:[%s6210_s11 + $0x30] sm:$0xe] }
 0x129   : > { %8996 = vst [vmem:[#allocation38_spill] sm:$0xff] %v7936_v33  ;;  %5831 = vmatprep.mubr.msk.bf16.mxu0 %vm684_vm3, %v5322_v0  ;;  %v3637_v9 = vrot.slane %v3636_v6, 4  ;;  %v7942_v42 = vpop.f32.mrf.mxu0  ;;  %v4260_v52 = vrot.slane %v6027_v36, 5  ;;  %v3646_v49 = vor.u32 %v3645_v51, %v3641_v24  ;;  %v3651_v54 = vrot.slane %v3649_v55, 5  ;;  %v6028_v0 = vld [vmem:[%s6210_s11 + $0x28] sm:$0xf] }
 0x12a   : > { %5798 = vmatmul.mubr.msk.bf16.gmra.mxu1 %vm684_vm3, %v5241_v59  ;;  %8997 = vst [vmem:[#allocation39_spill] sm:$0xff] %v7942_v42  ;;  %v7946_v58 = vpop.f32.mrf.mxu1  ;;  %v5389_v21 = vrot.slane %v5373_v17, 9  ;;  %v4264_v33 = vrot.slane %v6028_v0, 5  ;;  %v4258_v14 = vsel %vm6543_vm7, %v5388_v7, %v4257_v12  ;;  %v4259_v59 = vrot.slane %v4257_v12, 4  ;;  %v6029_v42 = vld [vmem:[%s6210_s11 + $0x24] sm:$0xf] }
 0x12b   : > { %8998 = vst [vmem:[#allocation40_spill] sm:$0xff] %v7946_v58  ;;  %5837 = vmatprep.mubr.msk.bf16.mxu1 %vm684_vm3, %v5340_v50  ;;  %v5669_v23 = vpop.f32.mrf.mxu0  ;;  %v5341_v36 = vcombine.low %v6029_v42, %v6028_v0  ;;  %v3642_v55 = vsel %vm6267_vm4, %v3637_v9, %v3641_v24  ;;  %v3647_v51 = vrot.slane %v3646_v49, 4  ;;  %v5390_v17 = vrot.slane %v5374_v62, 9 }
 0x12c   : > { %v7956_v58 = vpop.f32.mrf.mxu1  ;;  %v4266_v50 = vrot.slane %v4264_v33, 4  ;;  %v4261_v6 = vsel %vm6543_vm7, %v4259_v59, %v4260_v52  ;;  %v7963_v7 = vsel %vm6543_vm7, %v5389_v21, %v4264_v33  ;;  %v5342_v42 = vcombine.low %v7380_v15, %v7388_v28  ;;  %v5376_v33 = vld [vmem:[%s6210_s11 + $0x48] sm:$0xe] }
 0x12d   : > { %8999 = vst [vmem:[#allocation41_spill] sm:$0xff] %v7956_v58  ;;  %v1488_v12 = vpop.f32.mrf.mxu0  ;;  %v4271_v24 = vrot.slane %v7388_v28, 5  ;;  %v3652_v9 = vsel %vm6267_vm4, %v3647_v51, %v3651_v54  ;;  %v5405_v49 = vcombine.low %v4258_v14, %v4261_v6  ;;  %v9000_v62 = vrot.slane %v7355_v4, 5 }
 0x12e   : > { %v5635_v0 = vpop.f32.mrf.mxu1  ;;  %v4274_v59 = vrot.slane %v7401_v56, 5  ;;  %v5323_v21 = vcombine.low %v3642_v55, %v3652_v9  ;;  %v5343_v28 = vcombine.low %v7421_v19, %v7433_v43  ;;  %v5391_v35 = vrot.slane %v5375_v47, 9 }
 0x12f   : > { %v4268_v52 = vsel %vm6543_vm7, %v4266_v50, %v9000_v62  ;;  %v1072_v58 = vadd.f32 %v5635_v0, %v7612_v41  ;;  %v5670_v15 = vpop.f32.mrf.mxu0  ;;  %v4272_v4 = vsel %vm6543_vm7, %v5390_v17, %v4271_v24  ;;  %v4273_v14 = vrot.slane %v4271_v24, 4  ;;  %v5377_v50 = vld [vmem:[%s6210_s11 + $0x54] sm:$0xe] }
 0x130   : > { %v5406_v54 = vcombine.low %v7963_v7, %v4268_v52  ;;  %v1063_v6 = vpop.f32.mrf.mxu1  ;;  %v4278_v51 = vrot.slane %v7433_v43, 5  ;;  %5832 = vmatmul.mubr.msk.bf16.gmra.mxu0 %vm684_vm3, %v5323_v21  ;;  %v5392_v19 = vrot.slane %v5376_v33, 9  ;;  %v4285_v47 = vrot.slane %v7481_v48, 5 }
 0x131   : > { %v7984_v56 = vadd.f32 %v5669_v23, %v1072_v58  ;;  %v1064_v41 = vadd.f32 %v1063_v6, %v7649_v18  ;;  %v1491_v55 = vpop.f32.mrf.mxu0  ;;  %5871 = vmatprep.mubr.msk.bf16.mxu0 %vm684_vm3, %v5405_v49  ;;  %v4275_v43 = vsel %vm6543_vm7, %v4273_v14, %v4274_v59  ;;  %v5344_v23 = vcombine.low %v7469_v1, %v7481_v48  ;;  %v5378_v49 = vld [vmem:[%s6210_s11 + $0x60] sm:$0xe] }
 0x132   : > { %5838 = vmatmul.mubr.msk.bf16.vlgmr.msra.gmra.mxu1 %vm684_vm3, %v5341_v36  ;;  %v5636_v17 = vpop.f32.mrf.mxu1  ;;  %v4280_v58 = vrot.slane %v4278_v51, 4  ;;  %v4288_v18 = vrot.slane %v7488_v16, 5  ;;  %v8002_v9 = vsel %vm6543_vm7, %v5391_v35, %v4278_v51  ;;  %v9001_v62 = vrot.slane %v7443_v39, 5 }
 0x133   : > { %5841 = vmatprep.mubr.msk.bf16.mxu1 %vm684_vm3, %v5342_v42  ;;  %v7997_v36 = vadd.f32 %v1488_v12, %v1064_v41  ;;  %v1075_v7 = vadd.f32 %v5636_v17, %v7668_v5  ;;  %v5673_v24 = vpop.f32.mrf.mxu0  ;;  %v5345_v42 = vcombine.low %v7509_v2, %v7520_v40  ;;  %v4287_v48 = vrot.slane %v4285_v47, 4 }
 0x134   : > { %v1066_v0 = vpop.f32.mrf.mxu1  ;;  %v8011_v1 = vsel %vm6543_vm7, %v4280_v58, %v9001_v62  ;;  %v5393_v16 = vrot.slane %v5377_v50, 9  ;;  %v4292_v5 = vrot.slane %v7520_v40, 5  ;;  %v5407_v59 = vcombine.low %v4272_v4, %v4275_v43  ;;  %v5380_v50 = vld [vmem:[%s6210_s11 + $0x78] sm:$0xe]  ;;  %v9009_v40 = vld [vmem:[#allocation10_spill] sm:$0xff] }
 0x135   : > { %v8014_v12 = vadd.f32 %v5670_v15, %v1075_v7  ;;  %v1067_v52 = vadd.f32 %v1066_v0, %v7703_v27  ;;  %v1504_v33 = vpop.f32.mrf.mxu0  ;;  %v8019_v21 = vsel %vm6543_vm7, %v5392_v19, %v4285_v47  ;;  %v5408_v35 = vcombine.low %v8002_v9, %v8011_v1  ;;  %v5379_v47 = vld [vmem:[%s6210_s11 + $0x6c] sm:$0xe] }
 0x136   : > { %v5639_v39 = vpop.f32.mrf.mxu1  ;;  %v8025_v6 = vsel %vm6543_vm7, %v4287_v48, %v4288_v18  ;;  %v4294_v14 = vrot.slane %v4292_v5, 4  ;;  %v5394_v15 = vrot.slane %v5378_v49, 9  ;;  %v5346_v41 = vcombine.low %v7548_v30, %v7557_v38  ;;  %v9010_v1 = vld [vmem:[#allocation19_spill] sm:$0xff] }
 0x137   : > { %v8027_v51 = vadd.f32 %v1491_v55, %v1067_v52  ;;  %v1088_v27 = vadd.f32 %v5639_v39, %v7730_v11  ;;  %v5674_v4 = vpop.f32.mrf.mxu0  ;;  %v4299_v19 = vrot.slane %v7557_v38, 5  ;;  %v5409_v43 = vcombine.low %v8019_v21, %v8025_v6 }
 0x138   : > { %v1079_v17 = vpop.f32.mrf.mxu1  ;;  %v8039_v58 = vsel %vm6543_vm7, %v5393_v16, %v4292_v5  ;;  %v9002_v55 = vrot.slane %v7527_v37, 5  ;;  %v4302_v18 = vrot.slane %v7569_v29, 5  ;;  %5872 = vmatmul.mubr.msk.bf16.vlgmr.msra.gmra.mxu0 %vm684_vm3, %v5406_v54  ;;  %v5395_v54 = vrot.slane %v5379_v47, 9 }
 0x139   : > { %v8049_v7 = vadd.f32 %v5673_v24, %v1088_v27  ;;  %v1080_v49 = vadd.f32 %v1079_v17, %v7752_v10  ;;  %v1507_v0 = vpop.f32.mrf.mxu0  ;;  %v4301_v62 = vrot.slane %v4299_v19, 4  ;;  %5875 = vmatprep.mubr.msk.bf16.mxu0 %vm684_vm3, %v5407_v59  ;;  %v8059_v29 = vsel %vm6543_vm7, %v5394_v15, %v4299_v19 }
 0x13a   : > { %v8045_v11 = vsel %vm6543_vm7, %v4294_v14, %v9002_v55  ;;  %5842 = vmatmul.mubr.msk.bf16.gmra.mxu1 %vm684_vm3, %v5343_v28  ;;  %v5640_v48 = vpop.f32.mrf.mxu1  ;;  %v4306_v28 = vrot.slane %v7603_v32, 5  ;;  %v5396_v24 = vrot.slane %v5380_v50, 9  ;;  %v4313_v59 = vrot.slane %v7641_v3, 5 }
 0x13b   : > { %5845 = vmatprep.mubr.msk.bf16.mxu1 %vm684_vm3, %v5344_v23  ;;  %v8062_v10 = vadd.f32 %v1504_v33, %v1080_v49  ;;  %v1091_v16 = vadd.f32 %v5640_v48, %v7773_v44  ;;  %v5677_v5 = vpop.f32.mrf.mxu0  ;;  %v8067_v52 = vsel %vm6543_vm7, %v4301_v62, %v4302_v18  ;;  %v5381_v23 = vld [vmem:[%s6210_s11 + $0x84] sm:$0xe]  ;;  %v5410_v39 = vcombine.low %v8039_v58, %v8045_v11 }
 0x13c   : > { %v1082_v21 = vpop.f32.mrf.mxu1  ;;  %v4308_v6 = vrot.slane %v4306_v28, 4  ;;  %v4316_v14 = vrot.slane %v7654_v13, 5  ;;  %v4315_v47 = vrot.slane %v4313_v59, 4  ;;  %v8083_v17 = vsel %vm6543_vm7, %v5395_v54, %v4306_v28  ;;  %v9003_v48 = vld [vmem:[#allocation14_spill] sm:$0xff]  ;;  %v5383_v28 = vld [vmem:[%s6210_s11 + $0x9c] sm:$0xe] }
 0x13d   : > { %v8076_v44 = vadd.f32 %v5674_v4, %v1091_v16  ;;  %v1083_v15 = vadd.f32 %v1082_v21, %v7799_v46  ;;  %v1520_v27 = vpop.f32.mrf.mxu0  ;;  %v5397_v18 = vrot.slane %v5381_v23, 9  ;;  %v4320_v13 = vrot.slane %v7685_v20, 5  ;;  %v5382_v4 = vld [vmem:[%s6210_s11 + $0x90] sm:$0xe] }
 0x13e   : > { %v5643_v50 = vpop.f32.mrf.mxu1  ;;  %v9004_v16 = vrot.slane %v9003_v48, 5  ;;  %v8100_v54 = vsel %vm6543_vm7, %v5396_v24, %v4313_v59  ;;  %v9006_v48 = vld [vmem:[#allocation7_spill] sm:$0xff]  ;;  %v9008_v9 = vrot.slane %v7688_v31, 5  ;;  %v9020_v58 = vcombine.low %v8059_v29, %v8067_v52 }
 0x13f   : > { %v8089_v49 = vadd.f32 %v1507_v0, %v1083_v15  ;;  %v1104_v46 = vadd.f32 %v5643_v50, %v7820_v60  ;;  %v5678_v62 = vpop.f32.mrf.mxu0  ;;  %v8105_v0 = vsel %vm6543_vm7, %v4315_v47, %v4316_v14  ;;  %v8109_v60 = vsel %vm6543_vm7, %v5397_v18, %v4320_v13  ;;  %v9005_v50 = vld [vmem:[#allocation8_spill] sm:$0xff]  ;;  %v9007_v59 = vld [vmem:[#allocation27_spill] sm:$0xff] }
 0x140   : > { %v8096_v21 = vsel %vm6543_vm7, %v4308_v6, %v9004_v16  ;;  %v1095_v23 = vpop.f32.mrf.mxu1  ;;  %v4322_v15 = vrot.slane %v4320_v13, 4  ;;  %5876 = vmatmul.mubr.msk.bf16.gmra.mxu0 %vm684_vm3, %v5408_v35  ;;  %v5398_v47 = vrot.slane %v5382_v4, 9  ;;  %v4327_v18 = vrot.slane %v9005_v50, 5  ;;  %v5384_v13 = vld [vmem:[%s6210_s11 + $0xa8] sm:$0xe]  ;;  %v9011_v35 = vld [vmem:[#allocation18_spill] sm:$0xff] }
 0x141   : > { %v8117_v24 = vadd.f32 %v5677_v5, %v1104_v46  ;;  %v1096_v6 = vadd.f32 %v1095_v23, %v9007_v59  ;;  %v1523_v14 = vpop.f32.mrf.mxu0  ;;  %5879 = vmatprep.mubr.msk.bf16.mxu0 %vm684_vm3, %v5409_v43  ;;  %v5399_v4 = vrot.slane %v5383_v28, 9  ;;  %v9012_v59 = vld [vmem:[#allocation22_spill] sm:$0xff]  ;;  %v9013_v28 = vld [vmem:[#allocation21_spill] sm:$0xff] }
 0x142   : > { %5846 = vmatmul.mubr.msk.bf16.gmra.mxu1 %vm684_vm3, %v5345_v42  ;;  %v5644_v16 = vpop.f32.mrf.mxu1  ;;  %v8135_v2 = vsel %vm6543_vm7, %v4322_v15, %v9008_v9  ;;  %v4330_v42 = vrot.slane %v9009_v40, 5  ;;  %v8147_v31 = vsel %vm6543_vm7, %v5398_v47, %v4327_v18  ;;  %v4329_v23 = vrot.slane %v4327_v18, 4  ;;  %v9014_v5 = vld [vmem:[#allocation13_spill] sm:$0xff]  ;;  %v5385_v47 = vld [vmem:[%s6210_s11 + $0xb4] sm:$0xe] }
 0x143   : > { %5849 = vmatprep.mubr.msk.bf16.mxu1 %vm684_vm3, %v5346_v41  ;;  %v8140_v43 = vadd.f32 %v1520_v27, %v1096_v6  ;;  %v1107_v46 = vadd.f32 %v5644_v16, %v7866_v26  ;;  %v5681_v30 = vpop.f32.mrf.mxu0  ;;  %v4334_v15 = vrot.slane %v9010_v1, 5  ;;  %v5400_v27 = vrot.slane %v5384_v13, 9 }
 0x144   : > { %v1098_v41 = vpop.f32.mrf.mxu1  ;;  %v4341_v40 = vrot.slane %v9012_v59, 5  ;;  %v4344_v38 = vrot.slane %v9014_v5, 5  ;;  %v8160_v18 = vsel %vm6543_vm7, %v4329_v23, %v4330_v42  ;;  %v9017_v23 = vrot.slane %v7779_v63, 5  ;;  %v9019_v63 = vld [vmem:[#allocation36_spill] sm:$0xff] }
 0x145   : > { %v8152_v6 = vadd.f32 %v5678_v62, %v1107_v46  ;;  %v1099_v26 = vadd.f32 %v1098_v41, %v7887_v45  ;;  %v1536_v16 = vpop.f32.mrf.mxu0  ;;  %v8164_v33 = vsel %vm6543_vm7, %v5399_v4, %v4334_v15  ;;  %v4336_v13 = vrot.slane %v4334_v15, 4  ;;  %v9015_v62 = vld [vmem:[#allocation25_spill] sm:$0xff]  ;;  %v9016_v46 = vld [vmem:[#allocation24_spill] sm:$0xff]  ;;  %v5386_v45 = vld [vmem:[%s6210_s11 + $0xc0] sm:$0xe] }
 0x146   : > { %v5647_v55 = vpop.f32.mrf.mxu1  ;;  %v8176_v42 = vsel %vm6543_vm7, %v5400_v27, %v4341_v40  ;;  %v9018_v27 = vcombine.low %v7588_v8, %v7603_v32 }
 0x147   : > { %v8169_v41 = vadd.f32 %v1523_v14, %v1099_v26  ;;  %v1120_v19 = vadd.f32 %v5647_v55, %v7906_v34  ;;  %v5682_v5 = vpop.f32.mrf.mxu0  ;;  %v8182_v15 = vsel %vm6543_vm7, %v4336_v13, %v9017_v23  ;;  %v4343_v14 = vrot.slane %v4341_v40, 4  ;;  %v5387_v23 = vld [vmem:[%s6210_s11 + $0xcc] sm:$0xe]  ;;  %s4876_s11 = sshll.u32 %s8644_s9, 4  ;;  %s8770_s11 = int_to_ptr.vmem [resolvable:$true] %s4876_s11 }
 0x148   : > { %v1111_v4 = vpop.f32.mrf.mxu1  ;;  %v5401_v26 = vrot.slane %v5385_v47, 9  ;;  %v4348_v34 = vrot.slane %v9015_v62, 5  ;;  %5880 = vmatmul.mubr.msk.bf16.gmra.mxu0 %vm684_vm3, %v5410_v39  ;;  %v5402_v47 = vrot.slane %v5386_v45, 9  ;;  %v9021_v39 = vcombine.low %v7626_v61, %v7641_v3  ;;  %v9023_v45 = vld [vmem:[#allocation29_spill] sm:$0xff]  ;;  %v9029_v61 = vld [vmem:[#allocation39_spill] sm:$0xff]  ;;  %s6030_s23 = scalar_lea.vmem %s8770_s11, 4096  ;;  %p6037_p1 = scmp.lt.s32.totalorder %s8770_s11, %s6035_s27 }
 0x149   : > { %v8189_v55 = vadd.f32 %v5681_v30, %v1120_v19  ;;  %v1112_v9 = vadd.f32 %v1111_v4, %v9019_v63  ;;  %v1539_v13 = vpop.f32.mrf.mxu0  ;;  %5883 = vmatprep.mubr.msk.bf16.mxu0 %vm684_vm3, %v9020_v58  ;;  %v8209_v8 = vsel %vm6543_vm7, %v4343_v14, %v4344_v38  ;;  %v9022_v30 = vld [vmem:[#allocation30_spill] sm:$0xff]  ;;  %v9024_v14 = vld [vmem:[#allocation15_spill] sm:$0xff]  ;;  %v5403_v29 = vrot.slane %v5387_v23, 9  ;;  %p6031_p12 = scmp.ne.s32.totalorder %s8770_s11, %s6030_s23  ;;  %p6038_p2 = scmp.lt.s32.totalorder %s6036_s28, %s6030_s23 }
 0x14a   : > { %5850 = vmatmul.mubr.msk.bf16.gmra.mxu1 %vm684_vm3, %v9018_v27  ;;  %v5648_v11 = vpop.f32.mrf.mxu1  ;;  %v8213_v32 = vsel %vm6543_vm7, %v5401_v26, %v4348_v34  ;;  %v4350_v19 = vrot.slane %v4348_v34, 4  ;;  %v4355_v3 = vrot.slane %v9022_v30, 5  ;;  %v9025_v63 = vrot.slane %v9024_v14, 5  ;;  %v9026_v34 = vld [vmem:[#allocation31_spill] sm:$0xff] }
 0x14b   : > { %5853 = vmatprep.mubr.msk.bf16.mxu1 %vm684_vm3, %v9021_v39  ;;  %v8217_v52 = vadd.f32 %v1536_v16, %v1112_v9  ;;  %v1123_v4 = vadd.f32 %v5648_v11, %v7931_v25  ;;  %v5685_v27 = vpop.f32.mrf.mxu0  ;;  %v4358_v58 = vrot.slane %v9026_v34, 5  ;;  %v9027_v39 = vld [vmem:[#allocation35_spill] sm:$0xff]  ;;  %v9028_v9 = vld [vmem:[#allocation33_spill] sm:$0xff]  ;;  %v5412_v25 = vcombine.low %v8083_v17, %v8096_v21  ;;  %v9030_v21 = vld [vmem:[#allocation16_spill] sm:$0xff]  ;;  %p6032_p13 = pnand %p6031_p12, %p6171_p4  ;;  %p6039_p3 = por %p6038_p2, %p6037_p1 }
 0x14c   : > { %v1114_v38 = vpop.f32.mrf.mxu1  ;;  %v8227_v26 = vsel %vm6543_vm7, %v4350_v19, %v9025_v63  ;;  %v5413_v19 = vcombine.low %v8100_v54, %v8105_v0  ;;  %v8243_v34 = vsel %vm6543_vm7, %v5402_v47, %v4355_v3  ;;  %v4357_v23 = vrot.slane %v4355_v3, 4 }
 0x14d   : > { %v8234_v11 = vadd.f32 %v5682_v5, %v1123_v4  ;;  %v1115_v40 = vadd.f32 %v1114_v38, %v9029_v61  ;;  %v1552_v37 = vpop.f32.mrf.mxu0  ;;  %v5418_v14 = vcombine.low %v8213_v32, %v8227_v26  ;;  %v4362_v16 = vrot.slane %v9027_v39, 5  ;;  %v9063_v32 = vld [vmem:[#allocation40_spill] sm:$0xff]  ;;  %p6033_p0 = pneg %p6032_p13 }
 0x14e   : > { %v5651_v63 = vpop.f32.mrf.mxu1  ;;  %v8251_v38 = vsel %vm6543_vm7, %v4357_v23, %v4358_v58 }
 0x14f   : > { %v8246_v17 = vadd.f32 %v1539_v13, %v1115_v40  ;;  %v1136_v5 = vadd.f32 %v5651_v63, %v9030_v21  ;;  %v5686_v4 = vpop.f32.mrf.mxu0  ;;  %v8255_v54 = vsel %vm6543_vm7, %v5403_v29, %v4362_v16  ;;  %v4364_v0 = vrot.slane %v4362_v16, 4  ;;  %v9032_v40 = vld [vmem:[#allocation17_spill] sm:$0xff]  ;;  %p6040_p5 = pnand %p6039_p3, %p6033_p0 }
 0x150   : > { %v1127_v61 = vpop.f32.mrf.mxu1  ;;  %5884 = vmatmul.mubr.msk.bf16.gmra.mxu0 %vm684_vm3, %v5412_v25  ;;  %v9031_v13 = vcombine.low %v7678_v53, %v7685_v20  ;;  %v5419_v58 = vcombine.low %v8243_v34, %v8251_v38  ;;  %v9033_v16 = vcombine.low %v9006_v48, %v9005_v50  ;;  %v9035_v25 = vld [vmem:[#allocation6_spill] sm:$0xff]  ;;  %v9036_v50 = vld [vmem:[#allocation9_spill] sm:$0xff] }
 0x151   : > { %v8258_v47 = vadd.f32 %v5685_v27, %v1136_v5  ;;  %v1128_v3 = vadd.f32 %v1127_v61, %v9032_v40  ;;  %v1555_v63 = vpop.f32.mrf.mxu0  ;;  %5887 = vmatprep.mubr.msk.bf16.mxu0 %vm684_vm3, %v5413_v19  ;;  %v9034_v27 = vrot.slane %v7910_v57, 5 }
 0x152   : > { %5854 = vmatmul.mubr.msk.bf16.gmra.mxu1 %vm684_vm3, %v9031_v13  ;;  %v5652_v29 = vpop.f32.mrf.mxu1 }
 0x153   : > { %5857 = vmatprep.mubr.msk.bf16.mxu1 %vm684_vm3, %v9033_v16  ;;  %v8276_v53 = vsel %vm6543_vm7, %v4364_v0, %v9034_v27  ;;  %v8278_v20 = vadd.f32 %v1552_v37, %v1128_v3  ;;  %v1139_v23 = vadd.f32 %v5652_v29, %v9035_v25  ;;  %v5689_v21 = vpop.f32.mrf.mxu0  ;;  %v9038_v3 = vcombine.low %v8109_v60, %v8135_v2  ;;  %v9040_v27 = vld [vmem:[#allocation11_spill] sm:$0xff] }
 0x154   : > { %v5420_v19 = vcombine.low %v8255_v54, %v8276_v53  ;;  %v1130_v5 = vpop.f32.mrf.mxu1  ;;  %v9042_v60 = vcombine.low %v9013_v28, %v9012_v59  ;;  %v9047_v28 = vcombine.low %v8164_v33, %v8182_v15  ;;  %v9052_v33 = vcombine.low %v9023_v45, %v9022_v30 }
 0x155   : > { %v8283_v61 = vadd.f32 %v5686_v4, %v1139_v23  ;;  %v1131_v48 = vadd.f32 %v1130_v5, %v9036_v50  ;;  %v1568_v13 = vpop.f32.mrf.mxu0  ;;  %v9039_v4 = vcombine.low %v9011_v35, %v9010_v1  ;;  %v9041_v23 = vcombine.low %v8147_v31, %v8160_v18 }
 0x156   : > { %v5655_v40 = vpop.f32.mrf.mxu1 }
 0x157   : > { %v8286_v57 = vadd.f32 %v1555_v63, %v1131_v48  ;;  %v1152_v0 = vadd.f32 %v5655_v40, %v9037_v22  ;;  %v5690_v16 = vpop.f32.mrf.mxu0  ;;  %v9044_v40 = vld [vmem:[#allocation23_spill] sm:$0xff] }
 0x158   : > { %v1143_v37 = vpop.f32.mrf.mxu1  ;;  %5888 = vmatmul.mubr.msk.bf16.gmra.mxu0 %vm684_vm3, %v9038_v3 }
 0x159   : > { %v8293_v29 = vadd.f32 %v5689_v21, %v1152_v0  ;;  %v1144_v25 = vadd.f32 %v1143_v37, %v9040_v27  ;;  %v1571_v63 = vpop.f32.mrf.mxu0  ;;  %5891 = vmatprep.mubr.msk.bf16.mxu0 %vm684_vm3, %v9041_v23  ;;  %v9043_v21 = vld [vmem:[#allocation20_spill] sm:$0xff]  ;;  %v9046_v37 = vld [vmem:[#allocation26_spill] sm:$0xff]  ;;  %v9051_v23 = vcombine.low %v8176_v42, %v8209_v8 }
 0x15a   : > { %5858 = vmatmul.mubr.msk.bf16.gmra.mxu1 %vm684_vm3, %v9039_v4  ;;  %v5656_v5 = vpop.f32.mrf.mxu1  ;;  %v9050_v27 = vld [vmem:[#allocation28_spill] sm:$0xff] }
 0x15b   : > { %5861 = vmatprep.mubr.msk.bf16.mxu1 %vm684_vm3, %v9042_v60  ;;  %v8308_v2 = vadd.f32 %v1568_v13, %v1144_v25  ;;  %v1155_v1 = vadd.f32 %v5656_v5, %v9043_v21  ;;  %v5693_v35 = vpop.f32.mrf.mxu0  ;;  %v9054_v60 = vld [vmem:[#allocation32_spill] sm:$0xff] }
 0x15c   : > { %v1146_v50 = vpop.f32.mrf.mxu1 }
 0x15d   : > { %v8311_v48 = vadd.f32 %v5690_v16, %v1155_v1  ;;  %v1147_v22 = vadd.f32 %v1146_v50, %v9044_v40  ;;  %v1584_v0 = vpop.f32.mrf.mxu0  ;;  %v9049_v16 = vcombine.low %v9016_v46, %v9015_v62 }
 0x15e   : > { %v5659_v31 = vpop.f32.mrf.mxu1 }
 0x15f   : > { %v8314_v18 = vadd.f32 %v1571_v63, %v1147_v22  ;;  %v1168_v3 = vadd.f32 %v5659_v31, %v9046_v37  ;;  %v5694_v4 = vpop.f32.mrf.mxu0  ;;  %v9058_v22 = vld [vmem:[#allocation37_spill] sm:$0xff] }
 0x160   : > { %v1159_v59 = vpop.f32.mrf.mxu1  ;;  %5892 = vmatmul.mubr.msk.bf16.gmra.mxu0 %vm684_vm3, %v9047_v28 }
 0x161   : > { %9045 = vst [vmem:[#allocation14_spill] sm:$0xff] %v8314_v18  ;;  %v8321_v13 = vadd.f32 %v5693_v35, %v1168_v3  ;;  %v1160_v25 = vadd.f32 %v1159_v59, %v9050_v27  ;;  %v1587_v63 = vpop.f32.mrf.mxu0  ;;  %5895 = vmatprep.mubr.msk.bf16.mxu0 %vm684_vm3, %v9051_v23  ;;  %v9056_v35 = vld [vmem:[#allocation34_spill] sm:$0xff] }
 0x162   : > { %5862 = vmatmul.mubr.msk.bf16.gmra.mxu1 %vm684_vm3, %v9049_v16  ;;  %v5660_v5 = vpop.f32.mrf.mxu1  ;;  %v9061_v3 = vld [vmem:[#allocation38_spill] sm:$0xff] }
 0x163   : > { %9048 = vst [vmem:[#allocation8_spill] sm:$0xff] %v8321_v13  ;;  %5865 = vmatprep.mubr.msk.bf16.mxu1 %vm684_vm3, %v9052_v33  ;;  %v8336_v15 = vadd.f32 %v1584_v0, %v1160_v25  ;;  %v1171_v62 = vadd.f32 %v5660_v5, %v9054_v60  ;;  %v5697_v46 = vpop.f32.mrf.mxu0  ;;  %v9060_v0 = vcombine.low %v9028_v9, %v9027_v39  ;;  %v9065_v39 = vld [vmem:[#allocation41_spill] sm:$0xff] }
 0x164   : > { %v1162_v21 = vpop.f32.mrf.mxu1 }
 0x165   : > { %9053 = vst [vmem:[#allocation7_spill] sm:$0xff] %v8336_v15  ;;  %v8339_v1 = vadd.f32 %v5694_v4, %v1171_v62  ;;  %v1163_v50 = vadd.f32 %v1162_v21, %v9056_v35  ;;  %v1600_v40 = vpop.f32.mrf.mxu0 }
 0x167   : > { %9055 = vst [vmem:[#allocation27_spill] sm:$0xff] %v8339_v1  ;;  %v5663_v42 = vpop.f32.mrf.mxu1  ;;  %v8342_v8 = vadd.f32 %v1587_v63, %v1163_v50  ;;  %v5698_v37 = vpop.f32.mrf.mxu0 }
 0x168   : > { %v1184_v31 = vadd.f32 %v5663_v42, %v9058_v22  ;;  %5896 = vmatmul.mubr.msk.bf16.gmra.mxu0 %vm684_vm3, %v5418_v14 }
 0x169   : > { %9057 = vst [vmem:[#allocation10_spill] sm:$0xff] %v8342_v8  ;;  %v1175_v30 = vpop.f32.mrf.mxu1  ;;  %v1603_v59 = vpop.f32.mrf.mxu0  ;;  %5899 = vmatprep.mubr.msk.bf16.mxu0 %vm684_vm3, %v5419_v58 }
 0x16a   : > { %v8349_v45 = vadd.f32 %v5697_v46, %v1184_v31  ;;  %5866 = vmatmul.mubr.msk.bf16.gmra.mxu1 %vm684_vm3, %v9060_v0  ;;  %v1176_v4 = vadd.f32 %v1175_v30, %v9061_v3 }
 0x16b   : > { %v5664_v28 = vpop.f32.mrf.mxu1  ;;  %v5737_v14 = vpop.f32.mrf.mxu0 }
 0x16c   : > { %9059 = vst [vmem:[#allocation19_spill] sm:$0xff] %v8349_v45  ;;  %v8360_v16 = vadd.f32 %v1600_v40, %v1176_v4  ;;  %v1187_v26 = vadd.f32 %v5664_v28, %v9063_v32 }
 0x16d   : > { %v1178_v27 = vpop.f32.mrf.mxu1  ;;  %v2541_v63 = vpop.f32.mrf.mxu0 }
 0x16e   : > { %9062 = vst [vmem:[#allocation18_spill] sm:$0xff] %v8360_v16  ;;  %v8363_v25 = vadd.f32 %v5698_v37, %v1187_v26  ;;  %v1179_v9 = vadd.f32 %v1178_v27, %v9065_v39 }
 0x16f   : > { %v5703_v23 = vpop.f32.mrf.mxu1  ;;  %v5738_v34 = vpop.f32.mrf.mxu0 }
 0x170   : > { %9064 = vst [vmem:[#allocation22_spill] sm:$0xff] %v8363_v25  ;;  %v8366_v5 = vadd.f32 %v1603_v59, %v1179_v9  ;;  %v8368_v33 = vadd.f32 %v5737_v14, %v5703_v23  ;;  %5900 = vmatmul.mubr.msk.bf16.gmra.mxu0 %vm684_vm3, %v5420_v19 }
 0x171   : > { %v2249_v38 = vpop.f32.mrf.mxu1  ;;  %v2544_v60 = vpop.f32.mrf.mxu0 }
 0x172   : > { %9066 = vst [vmem:[#allocation21_spill] sm:$0xff] %v8366_v5  ;;  %v8374_v58 = vadd.f32 %v2541_v63, %v2249_v38 }
 0x173   : > { %v5704_v62 = vpop.f32.mrf.mxu1 }
 0x174   : > { %v8376_v46 = vadd.f32 %v5738_v34, %v5704_v62  ;;  %v5741_v21 = vpop.f32.mrf.mxu0 }
 0x175   : > { %v2252_v35 = vpop.f32.mrf.mxu1 }
 0x176   : > { %v8378_v50 = vadd.f32 %v2544_v60, %v2252_v35  ;;  %v2557_v40 = vpop.f32.mrf.mxu0 }
 0x177   : > { %v5707_v42 = vpop.f32.mrf.mxu1 }
 0x178   : > { %v8380_v22 = vadd.f32 %v5741_v21, %v5707_v42  ;;  %v5742_v31 = vpop.f32.mrf.mxu0 }
 0x179   : > { %v2265_v37 = vpop.f32.mrf.mxu1 }
 0x17a   : > { %v8382_v30 = vadd.f32 %v2557_v40, %v2265_v37  ;;  %v2560_v54 = vpop.f32.mrf.mxu0 }
 0x17b   : > { %v5708_v53 = vpop.f32.mrf.mxu1 }
 0x17c   : > { %v8384_v19 = vadd.f32 %v5742_v31, %v5708_v53  ;;  %v5745_v0 = vpop.f32.mrf.mxu0 }
 0x17d   : > { %v2268_v3 = vpop.f32.mrf.mxu1 }
 0x17e   : > { %v8386_v4 = vadd.f32 %v2560_v54, %v2268_v3  ;;  %v2573_v59 = vpop.f32.mrf.mxu0 }
 0x17f   : > { %v5711_v28 = vpop.f32.mrf.mxu1 }
 0x180   : > { %v8388_v32 = vadd.f32 %v5745_v0, %v5711_v28  ;;  %v5746_v26 = vpop.f32.mrf.mxu0 }
 0x181   : > { %v2281_v14 = vpop.f32.mrf.mxu1 }
 0x182   : > { %v8390_v27 = vadd.f32 %v2573_v59, %v2281_v14  ;;  %v2576_v39 = vpop.f32.mrf.mxu0 }
 0x183   : > { %v5712_v9 = vpop.f32.mrf.mxu1 }
 0x184   : > { %v8392_v63 = vadd.f32 %v5746_v26, %v5712_v9  ;;  %v5749_v23 = vpop.f32.mrf.mxu0 }
 0x185   : > { %v2284_v34 = vpop.f32.mrf.mxu1 }
 0x186   : > { %v8394_v38 = vadd.f32 %v2576_v39, %v2284_v34  ;;  %v2589_v60 = vpop.f32.mrf.mxu0 }
 0x187   : > { %v5715_v62 = vpop.f32.mrf.mxu1 }
 0x188   : > { %v8396_v21 = vadd.f32 %v5749_v23, %v5715_v62  ;;  %v5750_v35 = vpop.f32.mrf.mxu0 }
 0x189   : > { %v2297_v40 = vpop.f32.mrf.mxu1 }
 0x18a   : > { %v8398_v42 = vadd.f32 %v2589_v60, %v2297_v40  ;;  %v2592_v31 = vpop.f32.mrf.mxu0 }
 0x18b   : > { %v5716_v37 = vpop.f32.mrf.mxu1 }
 0x18c   : > { %v8400_v54 = vadd.f32 %v5750_v35, %v5716_v37  ;;  %v5753_v53 = vpop.f32.mrf.mxu0 }
 0x18d   : > { %v2300_v0 = vpop.f32.mrf.mxu1 }
 0x18e   : > { %v8402_v3 = vadd.f32 %v2592_v31, %v2300_v0  ;;  %v2605_v59 = vpop.f32.mrf.mxu0 }
 0x18f   : > { %v5719_v28 = vpop.f32.mrf.mxu1 }
 0x190   : > { %v8404_v26 = vadd.f32 %v5753_v53, %v5719_v28  ;;  %v5754_v14 = vpop.f32.mrf.mxu0 }
 0x191   : > { %v2313_v39 = vpop.f32.mrf.mxu1 }
 0x192   : > { %v8406_v9 = vadd.f32 %v2605_v59, %v2313_v39  ;;  %v2608_v23 = vpop.f32.mrf.mxu0 }
 0x193   : > { %v5720_v34 = vpop.f32.mrf.mxu1 }
 0x194   : > { %v8408_v60 = vadd.f32 %v5754_v14, %v5720_v34  ;;  %v5757_v62 = vpop.f32.mrf.mxu0 }
 0x195   : > { %v2316_v40 = vpop.f32.mrf.mxu1 }
 0x196   : > { %v8410_v35 = vadd.f32 %v2608_v23, %v2316_v40  ;;  %v2621_v37 = vpop.f32.mrf.mxu0 }
 0x197   : > { %v5723_v5 = vpop.f32.mrf.mxu1 }
 0x198   : > { %v8412_v31 = vadd.f32 %v5757_v62, %v5723_v5  ;;  %v5758_v0 = vpop.f32.mrf.mxu0 }
 0x199   : > { %v2329_v25 = vpop.f32.mrf.mxu1 }
 0x19a   : > { %v8414_v53 = vadd.f32 %v2621_v37, %v2329_v25  ;;  %v2624_v28 = vpop.f32.mrf.mxu0 }
 0x19b   : > { %v5724_v16 = vpop.f32.mrf.mxu1 }
 0x19c   : > { %v8416_v59 = vadd.f32 %v5758_v0, %v5724_v16 }
 0x19d   : > { %v5761_v39 = vpop.f32.mrf.mxu0  ;;  %v2332_v45 = vpop.f32.mrf.mxu1 }
 0x19e   : > { %v8418_v14 = vadd.f32 %v2624_v28, %v2332_v45 }
 0x19f   : > { %v2637_v34 = vpop.f32.mrf.mxu0  ;;  %v5727_v8 = vpop.f32.mrf.mxu1 }
 0x1a0   : > { %9067 = vst [vmem:[#allocation13_spill] sm:$0xff] %v8418_v14  ;;  %v8420_v23 = vadd.f32 %v5761_v39, %v5727_v8 }
 0x1a1   : > { %v5762_v40 = vpop.f32.mrf.mxu0  ;;  %v2345_v1 = vpop.f32.mrf.mxu1 }
 0x1a2   : > { %9068 = vst [vmem:[#allocation25_spill] sm:$0xff] %v8420_v23  ;;  %v8422_v5 = vadd.f32 %v2637_v34, %v2345_v1 }
 0x1a3   : > { %v2640_v62 = vpop.f32.mrf.mxu0  ;;  %v5728_v15 = vpop.f32.mrf.mxu1 }
 0x1a4   : > { %v8424_v25 = vadd.f32 %v5762_v40, %v5728_v15 }
 0x1a5   : > { %v5765_v37 = vpop.f32.mrf.mxu0  ;;  %v2348_v13 = vpop.f32.mrf.mxu1 }
 0x1a6   : > { %9069 = vst [vmem:[#allocation24_spill] sm:$0xff] %v8424_v25  ;;  %v8426_v16 = vadd.f32 %v2640_v62, %v2348_v13 }
 0x1a7   : > { %v2653_v0 = vpop.f32.mrf.mxu0  ;;  %v5731_v18 = vpop.f32.mrf.mxu1 }
 0x1a8   : > { %v8428_v45 = vadd.f32 %v5765_v37, %v5731_v18 }
 0x1a9   : > { %v5766_v28 = vpop.f32.mrf.mxu0  ;;  %v2361_v14 = vpop.f32.mrf.mxu1 }
 0x1aa   : > { %v8430_v8 = vadd.f32 %v2653_v0, %v2361_v14 }
 0x1ab   : > { %v2656_v39 = vpop.f32.mrf.mxu0  ;;  %v5732_v23 = vpop.f32.mrf.mxu1 }
 0x1ac   : > { %v8432_v1 = vadd.f32 %v5766_v28, %v5732_v23 }
 0x1ad   : > { %v8434_v34 = vpop.f32.mrf.mxu0  ;;  %v2364_v15 = vpop.f32.mrf.mxu1 }
 0x1ae   : > { %9070 = vst [vmem:[#allocation36_spill] sm:$0xff] %v8434_v34  ;;  %v8436_v40 = vadd.f32 %v2656_v39, %v2364_v15 }
 0x1af   : > { %v8438_v25 = vpop.f32.mrf.mxu0  ;;  %v5771_v13 = vpop.f32.mrf.mxu1 }
 0x1b0   : > { %9071 = vst [vmem:[#allocation30_spill] sm:$0xff] %v8438_v25  ;;  %v3092_v62 = vadd.f32 %v5771_v13, %v8368_v33 }
 0x1b1   : > { %v8441_v18 = vpop.f32.mrf.mxu0  ;;  %v2963_v37 = vpop.f32.mrf.mxu1 }
 0x1b2   : > { %v8444_v14 = vadd.f32 %v3092_v62, %v7984_v56  ;;  %v3090_v0 = vadd.f32 %v2963_v37, %v8374_v58 }
 0x1b3   : > { %v8447_v23 = vpop.f32.mrf.mxu0  ;;  %v5772_v28 = vpop.f32.mrf.mxu1 }
 0x1b4   : > { %v8450_v34 = vadd.f32 %v3090_v0, %v7997_v36  ;;  %v3093_v39 = vadd.f32 %v5772_v28, %v8376_v46 }
 0x1b5   : > { %v8453_v15 = vpop.f32.mrf.mxu0  ;;  %v2966_v25 = vpop.f32.mrf.mxu1 }
 0x1b6   : > { %v8456_v33 = vadd.f32 %v3093_v39, %v8014_v12  ;;  %v3091_v13 = vadd.f32 %v2966_v25, %v8378_v50 }
 0x1b7   : > { %v8459_v56 = vpop.f32.mrf.mxu0  ;;  %v5775_v62 = vpop.f32.mrf.mxu1 }
 0x1b8   : > { %v8462_v58 = vadd.f32 %v3091_v13, %v8027_v51  ;;  %v3096_v37 = vadd.f32 %v5775_v62, %v8380_v22 }
 0x1b9   : > { %v8465_v36 = vpop.f32.mrf.mxu0  ;;  %v2979_v0 = vpop.f32.mrf.mxu1 }
 0x1ba   : > { %v8468_v46 = vadd.f32 %v3096_v37, %v8049_v7  ;;  %v3094_v28 = vadd.f32 %v2979_v0, %v8382_v30 }
 0x1bb   : > { %v8471_v12 = vpop.f32.mrf.mxu0  ;;  %v5776_v39 = vpop.f32.mrf.mxu1 }
 0x1bc   : > { %v8474_v50 = vadd.f32 %v3094_v28, %v8062_v10  ;;  %v3097_v25 = vadd.f32 %v5776_v39, %v8384_v19 }
 0x1bd   : > { %v8477_v51 = vpop.f32.mrf.mxu0  ;;  %v2982_v13 = vpop.f32.mrf.mxu1 }
 0x1be   : > { %v8480_v22 = vadd.f32 %v3097_v25, %v8076_v44  ;;  %v3095_v62 = vadd.f32 %v2982_v13, %v8386_v4 }
 0x1bf   : > { %v8483_v7 = vpop.f32.mrf.mxu0  ;;  %v5779_v37 = vpop.f32.mrf.mxu1 }
 0x1c0   : > { %v8486_v30 = vadd.f32 %v3095_v62, %v8089_v49  ;;  %v3100_v0 = vadd.f32 %v5779_v37, %v8388_v32 }
 0x1c1   : > { %v8489_v10 = vpop.f32.mrf.mxu0  ;;  %v2995_v28 = vpop.f32.mrf.mxu1 }
 0x1c2   : > { %v8492_v19 = vadd.f32 %v3100_v0, %v8117_v24  ;;  %v3098_v39 = vadd.f32 %v2995_v28, %v8390_v27 }
 0x1c3   : > { %v8495_v44 = vpop.f32.mrf.mxu0  ;;  %v5780_v25 = vpop.f32.mrf.mxu1 }
 0x1c4   : > { %v8498_v4 = vadd.f32 %v3098_v39, %v8140_v43  ;;  %v3101_v13 = vadd.f32 %v5780_v25, %v8392_v63 }
 0x1c5   : > { %v8501_v49 = vpop.f32.mrf.mxu0  ;;  %v2998_v62 = vpop.f32.mrf.mxu1 }
 0x1c6   : > { %v8504_v32 = vadd.f32 %v3101_v13, %v8152_v6  ;;  %v3099_v37 = vadd.f32 %v2998_v62, %v8394_v38 }
 0x1c7   : > { %v8507_v24 = vpop.f32.mrf.mxu0 }
 0x1c8   : > { %v5783_v0 = vpop.f32.mrf.mxu1  ;;  %v8510_v27 = vadd.f32 %v3099_v37, %v8169_v41 }
 0x1c9   : > { %v3104_v28 = vadd.f32 %v5783_v0, %v8396_v21  ;;  %v8513_v43 = vpop.f32.mrf.mxu0 }
 0x1ca   : > { %v3011_v39 = vpop.f32.mrf.mxu1 }
 0x1cb   : > { %v8516_v63 = vadd.f32 %v3104_v28, %v8189_v55  ;;  %v3102_v25 = vadd.f32 %v3011_v39, %v8398_v42  ;;  %v8519_v6 = vpop.f32.mrf.mxu0 }
 0x1cc   : > { %v5784_v13 = vpop.f32.mrf.mxu1 }
 0x1cd   : > { %v8522_v38 = vadd.f32 %v3102_v25, %v8217_v52  ;;  %v3105_v62 = vadd.f32 %v5784_v13, %v8400_v54  ;;  %v8525_v37 = vpop.f32.mrf.mxu0 }
 0x1ce   : > { %v3014_v41 = vpop.f32.mrf.mxu1 }
 0x1cf   : > { %v8528_v21 = vadd.f32 %v3105_v62, %v8234_v11  ;;  %v3103_v0 = vadd.f32 %v3014_v41, %v8402_v3  ;;  %v8531_v28 = vpop.f32.mrf.mxu0 }
 0x1d0   : > { %v5787_v55 = vpop.f32.mrf.mxu1 }
 0x1d1   : > { %v8534_v42 = vadd.f32 %v3103_v0, %v8246_v17  ;;  %v3108_v39 = vadd.f32 %v5787_v55, %v8404_v26  ;;  %v8537_v25 = vpop.f32.mrf.mxu0 }
 0x1d2   : > { %v3027_v52 = vpop.f32.mrf.mxu1 }
 0x1d3   : > { %v8540_v54 = vadd.f32 %v3108_v39, %v8258_v47  ;;  %v3106_v13 = vadd.f32 %v3027_v52, %v8406_v9  ;;  %v8547_v41 = vpop.f32.mrf.mxu0 }
 0x1d4   : > { %v5788_v11 = vpop.f32.mrf.mxu1 }
 0x1d5   : > { %v8544_v62 = vadd.f32 %v3106_v13, %v8278_v20  ;;  %v3109_v3 = vadd.f32 %v5788_v11, %v8408_v60 }
 0x1d6   : > { %v3030_v17 = vpop.f32.mrf.mxu1 }
 0x1d7   : > { %v8550_v0 = vadd.f32 %v3109_v3, %v8283_v61  ;;  %v3107_v26 = vadd.f32 %v3030_v17, %v8410_v35  ;;  %v8557_v39 = vpop.f32.mrf.mxu0  ;;  %v9076_v17 = vld [vmem:[#allocation13_spill] sm:$0xff] }
 0x1d8   : > { %v5791_v55 = vpop.f32.mrf.mxu1 }
 0x1d9   : > { %v8554_v47 = vadd.f32 %v3107_v26, %v8286_v57  ;;  %v3112_v9 = vadd.f32 %v5791_v55, %v8412_v31  ;;  %v8563_v13 = vpop.f32.mrf.mxu0  ;;  %v9077_v55 = vld [vmem:[#allocation14_spill] sm:$0xff] }
 0x1da   : > { %v3043_v20 = vpop.f32.mrf.mxu1 }
 0x1db   : > { %v8560_v52 = vadd.f32 %v3112_v9, %v8293_v29  ;;  %v3110_v60 = vadd.f32 %v3043_v20, %v8414_v53  ;;  %v8569_v57 = vpop.f32.mrf.mxu0  ;;  %v9079_v20 = vld [vmem:[#allocation25_spill] sm:$0xff] }
 0x1dc   : > { %v5792_v61 = vpop.f32.mrf.mxu1  ;;  %9074 = vst [vmem:[#allocation31_spill] sm:$0xff] %v8569_v57 }
 0x1dd   : > { %9072 = vst [vmem:[#allocation29_spill] sm:$0xff] %v8560_v52  ;;  %v8566_v11 = vadd.f32 %v3110_v60, %v8308_v2  ;;  %v3113_v35 = vadd.f32 %v5792_v61, %v8416_v59  ;;  %v8578_v53 = vpop.f32.mrf.mxu0  ;;  %v9080_v60 = vld [vmem:[#allocation8_spill] sm:$0xff] }
 0x1de   : > { %v3046_v3 = vpop.f32.mrf.mxu1 }
 0x1df   : > { %9073 = vst [vmem:[#allocation15_spill] sm:$0xff] %v8566_v11  ;;  %v8572_v31 = vadd.f32 %v3113_v35, %v8311_v48  ;;  %v3111_v26 = vadd.f32 %v3046_v3, %v9076_v17  ;;  %v9081_v48 = vld [vmem:[#allocation7_spill] sm:$0xff]  ;;  %v9083_v3 = vld [vmem:[#allocation24_spill] sm:$0xff] }
 0x1e0   : > { %v5795_v29 = vpop.f32.mrf.mxu1 }
 0x1e1   : > { %9075 = vst [vmem:[#allocation35_spill] sm:$0xff] %v8572_v31  ;;  %v8576_v9 = vadd.f32 %v3111_v26, %v9077_v55  ;;  %v3116_v52 = vadd.f32 %v5795_v29, %v9079_v20 }
 0x1e2   : > { %v3059_v2 = vpop.f32.mrf.mxu1 }
 0x1e3   : > { %9078 = vst [vmem:[#allocation33_spill] sm:$0xff] %v8576_v9  ;;  %v8582_v11 = vadd.f32 %v3116_v52, %v9080_v60  ;;  %v3114_v59 = vadd.f32 %v3059_v2, %v8422_v5  ;;  %v9084_v9 = vld [vmem:[#allocation27_spill] sm:$0xff]  ;;  %v9086_v52 = vld [vmem:[#allocation10_spill] sm:$0xff] }
 0x1e4   : > { %v5796_v61 = vpop.f32.mrf.mxu1  ;;  %v8585_v57 = vpop.f32.mrf.mxu0 }
 0x1e5   : > { %v8588_v35 = vadd.f32 %v3114_v59, %v9081_v48  ;;  %v3117_v17 = vadd.f32 %v5796_v61, %v9083_v3  ;;  %v9088_v48 = vld [vmem:[#allocation19_spill] sm:$0xff] }
 0x1e6   : > { %v3062_v26 = vpop.f32.mrf.mxu1  ;;  %v8591_v55 = vpop.f32.mrf.mxu0 }
 0x1e7   : > { %9082 = vst [vmem:[#allocation39_spill] sm:$0xff] %v8588_v35  ;;  %v8594_v31 = vadd.f32 %v3117_v17, %v9084_v9  ;;  %v3115_v29 = vadd.f32 %v3062_v26, %v8426_v16  ;;  %v9090_v17 = vld [vmem:[#allocation18_spill] sm:$0xff] }
 0x1e8   : > { %v8600_v5 = vpop.f32.mrf.mxu0 }
 0x1e9   : > { %9085 = vst [vmem:[#allocation16_spill] sm:$0xff] %v8594_v31  ;;  %v8598_v20 = vadd.f32 %v3115_v29, %v9086_v52  ;;  %v9092_v52 = vld [vmem:[#allocation22_spill] sm:$0xff] }
 0x1ea   : > { %v5799_v2 = vpop.f32.mrf.mxu1  ;;  %v8607_v3 = vpop.f32.mrf.mxu0 }
 0x1eb   : > { %9087 = vst [vmem:[#allocation17_spill] sm:$0xff] %v8598_v20  ;;  %v3120_v60 = vadd.f32 %v5799_v2, %v8428_v45 }
 0x1ec   : > { %v3075_v59 = vpop.f32.mrf.mxu1 }
 0x1ed   : > { %v8604_v35 = vadd.f32 %v3120_v60, %v9088_v48  ;;  %v3118_v61 = vadd.f32 %v3075_v59, %v8430_v8  ;;  %v9095_v8 = vld [vmem:[#allocation21_spill] sm:$0xff] }
 0x1ee   : > { %v5800_v9 = vpop.f32.mrf.mxu1 }
 0x1ef   : > { %9089 = vst [vmem:[#allocation6_spill] sm:$0xff] %v8604_v35  ;;  %v8610_v16 = vadd.f32 %v3118_v61, %v9090_v17  ;;  %v3121_v26 = vadd.f32 %v5800_v9, %v8432_v1  ;;  %v9099_v1 = vld [vmem:[#allocation36_spill] sm:$0xff] }
 0x1f0   : > { %v3078_v29 = vpop.f32.mrf.mxu1  ;;  %v8617_v2 = vpop.f32.mrf.mxu0 }
 0x1f1   : > { %9091 = vst [vmem:[#allocation9_spill] sm:$0xff] %v8610_v16  ;;  %v8614_v20 = vadd.f32 %v3121_v26, %v9092_v52  ;;  %v3119_v45 = vadd.f32 %v3078_v29, %v8436_v40  ;;  %9094 = vst [vmem:[#allocation11_spill] sm:$0xff] %v8617_v2  ;;  %v9101_v52 = vld [vmem:[#allocation30_spill] sm:$0xff] }
 0x1f2   : > { %v5839_v60 = vpop.f32.mrf.mxu1  ;;  %v8622_v48 = vpop.f32.mrf.mxu0 }
 0x1f3   : > { %9093 = vst [vmem:[#allocation12_spill] sm:$0xff] %v8614_v20  ;;  %v8620_v59 = vadd.f32 %v3119_v45, %v9095_v8  ;;  %9097 = vst [vmem:[#allocation23_spill] sm:$0xff] %v8622_v48  ;;  %v4089_v9 = vadd.f32 %v5839_v60, %v9099_v1 }
 0x1f4   : > { %v4080_v35 = vpop.f32.mrf.mxu1  ;;  %v8624_v61 = vpop.f32.mrf.mxu0 }
 0x1f5   : > { %9096 = vst [vmem:[#allocation20_spill] sm:$0xff] %v8620_v59  ;;  %9098 = vst [vmem:[#allocation26_spill] sm:$0xff] %v8624_v61  ;;  %v4081_v40 = vadd.f32 %v4080_v35, %v9101_v52  ;;  %v8637_v59 = vld [vmem:[%s8824_s2] ss:$0 sm:$0xff] }
 0x1f6   : > { %v5840_v17 = vpop.f32.mrf.mxu1  ;;  %v8627_v16 = vpop.f32.mrf.mxu0 }
 0x1f7   : > { %9100 = vst [vmem:[#allocation28_spill] sm:$0xff] %v8627_v16  ;;  %v4092_v8 = vadd.f32 %v5840_v17, %v8441_v18 }
 0x1f8   : > { %v4083_v26 = vpop.f32.mrf.mxu1  ;;  %v5873_v29 = vpop.f32.mrf.mxu0 }
 0x1f9   : > { %v4631_v45 = vadd.f32 %v5873_v29, %v4089_v9  ;;  %v4084_v48 = vadd.f32 %v4083_v26, %v8447_v23 }
 0x1fa   : > { %v5843_v20 = vpop.f32.mrf.mxu1  ;;  %v4502_v61 = vpop.f32.mrf.mxu0 }
 0x1fb   : > { %v4695_v1 = vadd.f32 %v4631_v45, %v8444_v14  ;;  %v4629_v16 = vadd.f32 %v4502_v61, %v4081_v40  ;;  %v4105_v18 = vadd.f32 %v5843_v20, %v8453_v15 }
 0x1fc   : > { %v4096_v60 = vpop.f32.mrf.mxu1  ;;  %v5874_v35 = vpop.f32.mrf.mxu0 }
 0x1fd   : > { %v4798_v31 = vadd.f32 %v8637_v59, %v4695_v1  ;;  %v4693_v9 = vadd.f32 %v4629_v16, %v8450_v34  ;;  %v4632_v29 = vadd.f32 %v5874_v35, %v4092_v8  ;;  %v4097_v26 = vadd.f32 %v4096_v60, %v8459_v56 }
 0x1fe   : > { %v5844_v52 = vpop.f32.mrf.mxu1  ;;  %v4505_v17 = vpop.f32.mrf.mxu0 }
 0x1ff   : > { %4830 = vst [vmem:[%s8644_s9 + $0x10] sm:$0xff] %v4798_v31  ;;  %v4796_v14 = vadd.f32 %v8637_v59, %v4693_v9  ;;  %v4696_v23 = vadd.f32 %v4632_v29, %v8456_v33  ;;  %v4630_v61 = vadd.f32 %v4505_v17, %v4084_v48  ;;  %v4108_v45 = vadd.f32 %v5844_v52, %v8465_v36 }
 0x200   : > { %v4099_v2 = vpop.f32.mrf.mxu1  ;;  %v5877_v40 = vpop.f32.mrf.mxu0 }
 0x201   : > { %4828 = vst [vmem:[%s8644_s9] sm:$0xff] %v4796_v14  ;;  %v4799_v15 = vadd.f32 %v8637_v59, %v4696_v23  ;;  %v4694_v20 = vadd.f32 %v4630_v61, %v8462_v58  ;;  %v4635_v16 = vadd.f32 %v5877_v40, %v4105_v18  ;;  %v4100_v60 = vadd.f32 %v4099_v2, %v8471_v12 }
 0x202   : > { %v5847_v34 = vpop.f32.mrf.mxu1  ;;  %v4518_v8 = vpop.f32.mrf.mxu0 }
 0x203   : > { %4831 = vst [vmem:[%s8644_s9 + $0x18] sm:$0xff] %v4799_v15  ;;  %v4797_v33 = vadd.f32 %v8637_v59, %v4694_v20  ;;  %v4699_v48 = vadd.f32 %v4635_v16, %v8468_v46  ;;  %v4633_v56 = vadd.f32 %v4518_v8, %v4097_v26  ;;  %v4121_v52 = vadd.f32 %v5847_v34, %v8477_v51 }
 0x204   : > { %v4112_v31 = vpop.f32.mrf.mxu1  ;;  %v5878_v1 = vpop.f32.mrf.mxu0 }
 0x205   : > { %4829 = vst [vmem:[%s8644_s9 + $0x8] sm:$0xff] %v4797_v33  ;;  %v4802_v58 = vadd.f32 %v8637_v59, %v4699_v48  ;;  %v4697_v9 = vadd.f32 %v4633_v56, %v8474_v50  ;;  %v4636_v36 = vadd.f32 %v5878_v1, %v4108_v45  ;;  %v4113_v2 = vadd.f32 %v4112_v31, %v8483_v7 }
 0x206   : > { %v5848_v35 = vpop.f32.mrf.mxu1  ;;  %v4521_v29 = vpop.f32.mrf.mxu0 }
 0x207   : > { %4834 = vst [vmem:[%s8644_s9 + $0x30] sm:$0xff] %v4802_v58  ;;  %v4800_v46 = vadd.f32 %v8637_v59, %v4697_v9  ;;  %v4700_v17 = vadd.f32 %v4636_v36, %v8480_v22  ;;  %v4634_v12 = vadd.f32 %v4521_v29, %v4100_v60  ;;  %v4124_v26 = vadd.f32 %v5848_v35, %v8489_v10 }
 0x208   : > { %v4115_v18 = vpop.f32.mrf.mxu1  ;;  %v5881_v14 = vpop.f32.mrf.mxu0 }
 0x209   : > { %4832 = vst [vmem:[%s8644_s9 + $0x20] sm:$0xff] %v4800_v46  ;;  %v4803_v50 = vadd.f32 %v8637_v59, %v4700_v17  ;;  %v4698_v61 = vadd.f32 %v4634_v12, %v8486_v30  ;;  %v4639_v51 = vadd.f32 %v5881_v14, %v4121_v52  ;;  %v4116_v20 = vadd.f32 %v4115_v18, %v8495_v44 }
 0x20a   : > { %v5851_v23 = vpop.f32.mrf.mxu1  ;;  %v4534_v40 = vpop.f32.mrf.mxu0 }
 0x20b   : > { %4835 = vst [vmem:[%s8644_s9 + $0x38] sm:$0xff] %v4803_v50  ;;  %v4801_v22 = vadd.f32 %v8637_v59, %v4698_v61  ;;  %v4703_v15 = vadd.f32 %v4639_v51, %v8492_v19  ;;  %v4637_v7 = vadd.f32 %v4534_v40, %v4113_v2  ;;  %v4137_v31 = vadd.f32 %v5851_v23, %v8501_v49 }
 0x20c   : > { %v4128_v34 = vpop.f32.mrf.mxu1  ;;  %v5882_v16 = vpop.f32.mrf.mxu0 }
 0x20d   : > { %4833 = vst [vmem:[%s8644_s9 + $0x28] sm:$0xff] %v4801_v22  ;;  %v4806_v30 = vadd.f32 %v8637_v59, %v4703_v15  ;;  %v4701_v8 = vadd.f32 %v4637_v7, %v8498_v4  ;;  %v4640_v10 = vadd.f32 %v5882_v16, %v4124_v26  ;;  %v4129_v60 = vadd.f32 %v4128_v34, %v8507_v24 }
 0x20e   : > { %v5852_v45 = vpop.f32.mrf.mxu1  ;;  %v4537_v33 = vpop.f32.mrf.mxu0 }
 0x20f   : > { %4838 = vst [vmem:[%s8644_s9 + $0x50] sm:$0xff] %v4806_v30  ;;  %v4804_v19 = vadd.f32 %v8637_v59, %v4701_v8  ;;  %v4704_v56 = vadd.f32 %v4640_v10, %v8504_v32  ;;  %v4638_v44 = vadd.f32 %v4537_v33, %v4116_v20  ;;  %v4140_v9 = vadd.f32 %v5852_v45, %v8513_v43 }
 0x210   : > { %v4131_v48 = vpop.f32.mrf.mxu1  ;;  %v5885_v1 = vpop.f32.mrf.mxu0 }
 0x211   : > { %4836 = vst [vmem:[%s8644_s9 + $0x40] sm:$0xff] %v4804_v19  ;;  %v4807_v4 = vadd.f32 %v8637_v59, %v4704_v56  ;;  %v4702_v58 = vadd.f32 %v4638_v44, %v8510_v27  ;;  %v4643_v49 = vadd.f32 %v5885_v1, %v4137_v31  ;;  %v4132_v18 = vadd.f32 %v4131_v48, %v8519_v6 }
 0x212   : > { %v5855_v35 = vpop.f32.mrf.mxu1  ;;  %v4550_v36 = vpop.f32.mrf.mxu0 }
 0x213   : > { %4839 = vst [vmem:[%s8644_s9 + $0x58] sm:$0xff] %v4807_v4  ;;  %v4805_v32 = vadd.f32 %v8637_v59, %v4702_v58  ;;  %v4707_v29 = vadd.f32 %v4643_v49, %v8516_v63  ;;  %v4641_v24 = vadd.f32 %v4550_v36, %v4129_v60  ;;  %v4153_v2 = vadd.f32 %v5855_v35, %v8525_v37  ;;  %v9102_v60 = vld [vmem:[#allocation31_spill] sm:$0xff]  ;;  %v9103_v58 = vld [vmem:[#allocation29_spill] sm:$0xff] }
 0x214   : > { %v4144_v52 = vpop.f32.mrf.mxu1  ;;  %v5886_v46 = vpop.f32.mrf.mxu0 }
 0x215   : > { %4837 = vst [vmem:[%s8644_s9 + $0x48] sm:$0xff] %v4805_v32  ;;  %v4810_v27 = vadd.f32 %v8637_v59, %v4707_v29  ;;  %v4705_v12 = vadd.f32 %v4641_v24, %v8522_v38  ;;  %v4644_v43 = vadd.f32 %v5886_v46, %v4140_v9  ;;  %v4145_v61 = vadd.f32 %v4144_v52, %v8531_v28  ;;  %v9104_v32 = vld [vmem:[#allocation15_spill] sm:$0xff] }
 0x216   : > { %v5856_v17 = vpop.f32.mrf.mxu1  ;;  %v4553_v14 = vpop.f32.mrf.mxu0 }
 0x217   : > { %4842 = vst [vmem:[%s8644_s9 + $0x70] sm:$0xff] %v4810_v27  ;;  %v4808_v63 = vadd.f32 %v8637_v59, %v4705_v12  ;;  %v4708_v50 = vadd.f32 %v4644_v43, %v8528_v21  ;;  %v4642_v6 = vadd.f32 %v4553_v14, %v4132_v18  ;;  %v4156_v34 = vadd.f32 %v5856_v17, %v8537_v25  ;;  %v9105_v12 = vld [vmem:[#allocation35_spill] sm:$0xff] }
 0x218   : > { %v4147_v23 = vpop.f32.mrf.mxu1  ;;  %v5889_v51 = vpop.f32.mrf.mxu0 }
 0x219   : > { %4840 = vst [vmem:[%s8644_s9 + $0x60] sm:$0xff] %v4808_v63  ;;  %v4811_v38 = vadd.f32 %v8637_v59, %v4708_v50  ;;  %v4706_v40 = vadd.f32 %v4642_v6, %v8534_v42  ;;  %v4647_v37 = vadd.f32 %v5889_v51, %v4153_v2  ;;  %v4148_v20 = vadd.f32 %v4147_v23, %v8547_v41  ;;  %v9106_v50 = vld [vmem:[#allocation33_spill] sm:$0xff] }
 0x21a   : > { %v5859_v26 = vpop.f32.mrf.mxu1  ;;  %v4566_v22 = vpop.f32.mrf.mxu0 }
 0x21b   : > { %4843 = vst [vmem:[%s8644_s9 + $0x78] sm:$0xff] %v4811_v38  ;;  %v4809_v21 = vadd.f32 %v8637_v59, %v4706_v40  ;;  %v4711_v7 = vadd.f32 %v4647_v37, %v8540_v54  ;;  %v4645_v28 = vadd.f32 %v4566_v22, %v4145_v61  ;;  %v4169_v8 = vadd.f32 %v5859_v26, %v8557_v39 }
 0x21c   : > { %v4160_v15 = vpop.f32.mrf.mxu1  ;;  %v5890_v16 = vpop.f32.mrf.mxu0 }
 0x21d   : > { %4841 = vst [vmem:[%s8644_s9 + $0x68] sm:$0xff] %v4809_v21  ;;  %v4814_v42 = vadd.f32 %v8637_v59, %v4711_v7  ;;  %v4709_v30 = vadd.f32 %v4645_v28, %v8544_v62  ;;  %v4648_v25 = vadd.f32 %v5890_v16, %v4156_v34  ;;  %v4161_v48 = vadd.f32 %v4160_v15, %v8563_v13  ;;  %v9107_v21 = vld [vmem:[#allocation39_spill] sm:$0xff] }
 0x21e   : > { %v5860_v45 = vpop.f32.mrf.mxu1  ;;  %v4569_v10 = vpop.f32.mrf.mxu0  ;;  %v9108_v28 = vld [vmem:[#allocation11_spill] sm:$0xff] }
 0x21f   : > { %4846 = vst [vmem:[%s8644_s9 + $0x90] sm:$0xff] %v4814_v42  ;;  %v4812_v54 = vadd.f32 %v8637_v59, %v4709_v30  ;;  %v4712_v33 = vadd.f32 %v4648_v25, %v8550_v0  ;;  %v4646_v41 = vadd.f32 %v4569_v10, %v4148_v20  ;;  %v4172_v1 = vadd.f32 %v5860_v45, %v9102_v60 }
 0x220   : > { %v4163_v31 = vpop.f32.mrf.mxu1  ;;  %v5893_v19 = vpop.f32.mrf.mxu0 }
 0x221   : > { %4844 = vst [vmem:[%s8644_s9 + $0x80] sm:$0xff] %v4812_v54  ;;  %v4815_v62 = vadd.f32 %v8637_v59, %v4712_v33  ;;  %v4710_v44 = vadd.f32 %v4646_v41, %v8554_v47  ;;  %v4651_v39 = vadd.f32 %v5893_v19, %v4169_v8  ;;  %v4164_v9 = vadd.f32 %v4163_v31, %v8578_v53  ;;  %v9111_v54 = vld [vmem:[#allocation17_spill] sm:$0xff] }
 0x222   : > { %v5863_v56 = vpop.f32.mrf.mxu1  ;;  %v4582_v35 = vpop.f32.mrf.mxu0 }
 0x223   : > { %4847 = vst [vmem:[%s8644_s9 + $0x98] sm:$0xff] %v4815_v62  ;;  %v4813_v0 = vadd.f32 %v8637_v59, %v4710_v44  ;;  %v4715_v49 = vadd.f32 %v4651_v39, %v9103_v58  ;;  %v4649_v13 = vadd.f32 %v4582_v35, %v4161_v48  ;;  %v4185_v18 = vadd.f32 %v5863_v56, %v8585_v57  ;;  %v9112_v48 = vld [vmem:[#allocation26_spill] sm:$0xff]  ;;  %v9115_v58 = vld [vmem:[#allocation9_spill] sm:$0xff] }
 0x224   : > { %v4176_v4 = vpop.f32.mrf.mxu1  ;;  %v5894_v36 = vpop.f32.mrf.mxu0  ;;  %v9113_v44 = vld [vmem:[#allocation6_spill] sm:$0xff] }
 0x225   : > { %4845 = vst [vmem:[%s8644_s9 + $0x88] sm:$0xff] %v4813_v0  ;;  %v4818_v47 = vadd.f32 %v8637_v59, %v4715_v49  ;;  %v4713_v29 = vadd.f32 %v4649_v13, %v9104_v32  ;;  %v4652_v24 = vadd.f32 %v5894_v36, %v4172_v1  ;;  %v4177_v2 = vadd.f32 %v4176_v4, %v8591_v55  ;;  %v9114_v1 = vld [vmem:[#allocation28_spill] sm:$0xff] }
 0x226   : > { %v5864_v52 = vpop.f32.mrf.mxu1  ;;  %v4585_v46 = vpop.f32.mrf.mxu0 }
 0x227   : > { %4850 = vst [vmem:[%s8644_s9 + $0xb0] sm:$0xff] %v4818_v47  ;;  %v4816_v27 = vadd.f32 %v8637_v59, %v4713_v29  ;;  %v4716_v43 = vadd.f32 %v4652_v24, %v9105_v12  ;;  %v4650_v53 = vadd.f32 %v4585_v46, %v4164_v9  ;;  %v4188_v61 = vadd.f32 %v5864_v52, %v8600_v5  ;;  %v9116_v52 = vld [vmem:[#allocation12_spill] sm:$0xff] }
 0x228   : > { %v4179_v17 = vpop.f32.mrf.mxu1  ;;  %v5897_v14 = vpop.f32.mrf.mxu0  ;;  %v9117_v24 = vld [vmem:[#allocation20_spill] sm:$0xff] }
 0x229   : > { %4848 = vst [vmem:[%s8644_s9 + $0xa0] sm:$0xff] %v4816_v27  ;;  %v4819_v63 = vadd.f32 %v8637_v59, %v4716_v43  ;;  %v4714_v6 = vadd.f32 %v4650_v53, %v9106_v50  ;;  %v4655_v57 = vadd.f32 %v5897_v14, %v4185_v18  ;;  %v4180_v37 = vadd.f32 %v4179_v17, %v8607_v3  ;;  %v9110_v3 = vld [vmem:[#allocation23_spill] sm:$0xff] }
 0x22a   : > { %v5867_v23 = vpop.f32.mrf.mxu1  ;;  %v4598_v51 = vpop.f32.mrf.mxu0 }
 0x22b   : > { %4851 = vst [vmem:[%s8644_s9 + $0xb8] sm:$0xff] %v4819_v63  ;;  %v4817_v38 = vadd.f32 %v8637_v59, %v4714_v6  ;;  %v4719_v40 = vadd.f32 %v4655_v57, %v8582_v11  ;;  %v4653_v55 = vadd.f32 %v4598_v51, %v4177_v2  ;;  %v4201_v20 = vadd.f32 %v5867_v23, %v9108_v28  ;;  %v9109_v11 = vld [vmem:[#allocation16_spill] sm:$0xff] }
 0x22c   : > { %v4192_v26 = vpop.f32.mrf.mxu1  ;;  %v5898_v34 = vpop.f32.mrf.mxu0 }
 0x22d   : > { %4849 = vst [vmem:[%s8644_s9 + $0xa8] sm:$0xff] %v4817_v38  ;;  %v4822_v15 = vadd.f32 %v8637_v59, %v4719_v40  ;;  %v4717_v7 = vadd.f32 %v4653_v55, %v9107_v21  ;;  %v4656_v5 = vadd.f32 %v5898_v34, %v4188_v61  ;;  %v4193_v25 = vadd.f32 %v4192_v26, %v9110_v3 }
 0x22e   : > { %v5868_v22 = vpop.f32.mrf.mxu1  ;;  %v4601_v16 = vpop.f32.mrf.mxu0 }
 0x22f   : > { %4854 = vst [vmem:[%s8644_s9 + $0xd0] sm:$0xff] %v4822_v15  ;;  %v4820_v45 = vadd.f32 %v8637_v59, %v4717_v7  ;;  %v4720_v42 = vadd.f32 %v4656_v5, %v9109_v11  ;;  %v4654_v30 = vadd.f32 %v4601_v16, %v4180_v37  ;;  %v4204_v19 = vadd.f32 %v5868_v22, %v9112_v48 }
 0x230   : > { %v5901_v8 = vpop.f32.mrf.mxu0  ;;  %v4195_v10 = vpop.f32.mrf.mxu1 }
 0x231   : > { %4852 = vst [vmem:[%s8644_s9 + $0xc0] sm:$0xff] %v4820_v45  ;;  %v4823_v31 = vadd.f32 %v8637_v59, %v4720_v42  ;;  %v4718_v33 = vadd.f32 %v4654_v30, %v9111_v54  ;;  %v4659_v41 = vadd.f32 %v5901_v8, %v4201_v20  ;;  %v4196_v35 = vadd.f32 %v4195_v10, %v9114_v1 }
 0x232   : > { %v4614_v56 = vpop.f32.mrf.mxu0 }
 0x233   : > { %4855 = vst [vmem:[%s8644_s9 + $0xd8] sm:$0xff] %v4823_v31  ;;  %v4821_v62 = vadd.f32 %v8637_v59, %v4718_v33  ;;  %v4723_v39 = vadd.f32 %v4659_v41, %v9113_v44  ;;  %v4657_v60 = vadd.f32 %v4614_v56, %v4193_v25 }
 0x234   : > { %v5902_v4 = vpop.f32.mrf.mxu0 }
 0x235   : > { %4853 = vst [vmem:[%s8644_s9 + $0xc8] sm:$0xff] %v4821_v62  ;;  %v4826_v0 = vadd.f32 %v8637_v59, %v4723_v39  ;;  %v4721_v49 = vadd.f32 %v4657_v60, %v9115_v58  ;;  %v4660_v13 = vadd.f32 %v5902_v4, %v4204_v19 }
 0x236   : > { %v4617_v9 = vpop.f32.mrf.mxu0 }
 0x237   : > { %4858 = vst [vmem:[%s8644_s9 + $0xf0] sm:$0xff] %v4826_v0  ;;  %v4824_v36 = vadd.f32 %v8637_v59, %v4721_v49  ;;  %v4724_v47 = vadd.f32 %v4660_v13, %v9116_v52  ;;  %v4658_v32 = vadd.f32 %v4617_v9, %v4196_v35 }
 0x239   : > { %4856 = vst [vmem:[%s8644_s9 + $0xe0] sm:$0xff] %v4824_v36  ;;  %v4827_v29 = vadd.f32 %v8637_v59, %v4724_v47  ;;  %v4722_v18 = vadd.f32 %v4658_v32, %v9117_v24 }
 0x23b   : > { %4859 = vst [vmem:[%s8644_s9 + $0xf8] sm:$0xff] %v4827_v29  ;;  %v4825_v46 = vadd.f32 %v8637_v59, %v4722_v18 }
 0x23d   : > { %4857 = vst [vmem:[%s8644_s9 + $0xe8] sm:$0xff] %v4825_v46 }
 0x23e   : > { %6043 = shalt.err (!%p6040_p5)
}
 0x23f   : > { %s6044_s29 = scalar_lea.hbm %s8768_s21, 4096  ;;  %s6048_s5 = scalar_lea.hbm %s8825_s3, 8192 }
 0x240   : > { %p6045_p6 = scmp.ne.s32.totalorder %s8768_s21, %s6044_s29  ;;  %p6049_p10 = scmp.lt.s32.totalorder %s8768_s21, %s8825_s3 }
 0x241   : > { %p6050_p11 = scmp.lt.s32.totalorder %s6048_s5, %s6044_s29 }
 0x242   : > { %p6046_p7 = pnand %p6045_p6, %p6171_p4 }
 0x243   : > { %p6051_p12 = por %p6050_p11, %p6049_p10 }
 0x244   : > { %p6047_p9 = pneg %p6046_p7 }
 0x246   : > { %p6052_p13 = pnand %p6051_p12, %p6047_p9 }
 0x248   : > { %6055 = shalt.err (!%p6052_p13)
}
 0x249   : > { %s6109_s8 = smov 128   ;;  %s6110_s9 = smov 8  }
 0x24a   : > { %5916 = dma.vmem_to_hbm [thread:$0]  (%p6171_p4), %s8770_s11, 4096, %s8768_s21, %s8777_s15, %s6109_s8, %s6109_s8, %s6110_s9  }
 0x24b PF: > { %p5922_p0 = scmp.ge.s32.totalorder %s6106_s17, 2  ;;  %s4891_s10 = sand.u32 1, %s6086_s12  }
 0x24c   : > { %s4892_s18 = scalar_lea.sflag [#allocation4], %s4891_s10 }
 0x24d   : > { %p5919_p1 = pnand %p5922_p0, %p6178_p8 }
 0x24f   : > { %p5920_p2 = pneg %p5919_p1 }
 0x251   : > { %6081 = dma.done.wait (%p5920_p2), %s4892_s18, 4096  }
 0x252   : > { %6083 = vsyncadd (%p5920_p2), %s4892_s18, 4294963200  ;;  %s16_s17 = sadd.s32 1, %s6106_s17   ;;  %s9118_s12 = smov %s6090_s13 }
 0x253   : > { %p13_p3 = scmp.ge.s32.totalorder %s16_s17, 4   ;;  %s9119_s13 = smov %s6094_s14 }
 0x254   : > { %s9120_s14 = smov %s6184_s25  ;;  %s9121_s15 = smov %s6102_s16 }
 0x255   : > { %s9122_s16 = smov %s9124_s20  ;;  %15 = sbr.rel (!%p13_p3) target bundleno = 4 (0x4), region = 77 }
 0x25a   :  { %4897 = vsyncpa [#allocation4], 1 }
 0x25b   :  { %4899 = vsyncpa [#allocation4 + $0x1], 1 }

</bundles_post_ra>
